<compile_context>
chip_gen: v7x
topology: tpu7x:2x2x1
jax: 0.10.0
libtpu: 0.0.40
codegen_flags: <defaults>
</compile_context>

<pallas_src>
import math
from functools import partial

import jax
import jax.numpy as jnp
from jax import lax
from jax.experimental import pallas as pl
from jax.experimental.pallas import tpu as pltpu

LANE = 128


def _round_up(x, m):
    return (x + m - 1) // m * m


def _pad_last(a, target):
    c = a.shape[-1]
    if c == target:
        return a
    return jnp.pad(a, [(0, 0)] * (a.ndim - 1) + [(0, target - c)])


def _pick_tile(h, max_tile):
    best = 1
    for d in range(1, min(h, max_tile) + 1):
        if h % d == 0:
            best = d
    return best


def _make_conv_kernel(*, kw, pad, th, W, Hp, n_h, relu_input, scale, has_residual):
    """Direct conv kernel: manual halo DMA + in-kernel kw*kw tap loop over Cin."""
    halo = th + 2 * pad

    def kernel(x_hbm, w_ref, b_ref, *rest):
        if has_residual:
            res_ref, o_ref, xbuf, sem = rest
        else:
            res_ref = None
            o_ref, xbuf, sem = rest

        n = pl.program_id(0)   # image          (parallel)
        i = pl.program_id(1)   # H row-tile     (arbitrary)
        co = pl.program_id(2)  # Cout tile      (arbitrary, fastest)
        slot = i % 2

        def halo_copy(tile, slot_):
            row0 = n * Hp + tile * th
            return pltpu.make_async_copy(
                x_hbm.at[pl.ds(row0, halo)], xbuf.at[slot_], sem.at[slot_])

        # Prime the per-image pipeline (fires for every n -> safe under megacore
        # sharding of the "parallel" n axis).
        @pl.when((i == 0) & (co == 0))
        def _():
            halo_copy(0, 0).start()

        # First Cout-tile for this (n, i): wait for the current halo block.
        @pl.when(co == 0)
        def _():
            halo_copy(i, slot).wait()

        # Prefetch the next row-tile of the same image; overlaps with compute.
        @pl.when((co == 0) & (i + 1 < n_h))
        def _():
            halo_copy(i + 1, 1 - slot).start()

        x = xbuf[slot]                               # (halo, Wp_al, Cp_in)
        if relu_input:
            x = jnp.maximum(x, 0.0)

        acc = None
        for t in range(kw * kw):                     # static, fully unrolled (<= 9)
            dy, dx = divmod(t, kw)
            patch = x[dy:dy + th, dx:dx + W, :].reshape(th * W, x.shape[-1])
            contrib = jnp.dot(patch, w_ref[t], preferred_element_type=jnp.float32)
            acc = contrib if acc is None else acc + contrib

        acc = acc + b_ref[...]                       # (1, t_co) broadcast
        if scale != 1.0:
            acc = acc * scale
        out = acc.reshape(1, th, W, acc.shape[-1])
        if has_residual:
            out = out + res_ref[...]                 # fused: residual + scale*conv
        o_ref[...] = out.astype(o_ref.dtype)

    return kernel


def conv2d_nhwc(x, w, b, kw, *, relu_input=False, scale=1.0, residual=None,
                th_max=32, tile_cout=LANE):
    """stride-1 conv, padding=(kw-1)//2, on channel-padded NHWC float32 input.

    x:        (N, H, W, Cp_in) with Cp_in = round_up(Cin, 128), padded channels zero.
    w:        (Cout, Cin, kw, kw)  (PyTorch OIHW layout).
    b:        (Cout,)
    residual: optional (N, H, W, Cp_out);  out = residual + scale * conv(relu?(x)).
    returns   (N, H, W, Cp_out), Cp_out = round_up(Cout, 128), padded channels zero.
    """
    N, H, W, Cp_in = x.shape
    Cout, Cin, kh, kw2 = w.shape
    assert kh == kw and kw2 == kw and kw % 2 == 1
    assert Cp_in == _round_up(Cin, LANE)
    Cp_out = _round_up(Cout, LANE)
    assert Cp_out % tile_cout == 0

    pad = (kw - 1) // 2
    Hp = H + 2 * pad
    Wp = W + 2 * pad
    Wp_al = _round_up(Wp, 8)          # width aligned to sublane tile for clean DMAs
    th = _pick_tile(H, th_max)
    n_h = H // th
    n_co = Cp_out // tile_cout
    halo = th + 2 * pad

    # Host-side glue: spatial zero pad + flatten (N, Hp) so the halo DMA is one
    # contiguous dynamic slice of the leading axis.
    xp = jnp.pad(x, ((0, 0), (pad, pad), (pad, pad + (Wp_al - Wp)), (0, 0)))
    xp = xp.reshape(N * Hp, Wp_al, Cp_in)

    # (Cout, Cin, kh, kw) -> (kh*kw, Cp_in, Cp_out); tap t = dy*kw + dx.
    wt = jnp.transpose(w.astype(jnp.float32), (2, 3, 1, 0)).reshape(kw * kw, Cin, Cout)
    wt = jnp.pad(wt, ((0, 0), (0, Cp_in - Cin), (0, Cp_out - Cout)))
    bp = _pad_last(b.astype(jnp.float32).reshape(1, Cout), Cp_out)

    has_residual = residual is not None
    kernel = _make_conv_kernel(kw=kw, pad=pad, th=th, W=W, Hp=Hp, n_h=n_h,
                               relu_input=relu_input, scale=float(scale),
                               has_residual=has_residual)

    in_specs = [
        pl.BlockSpec(memory_space=pl.ANY),                                        # x (HBM, manual DMA)
        pl.BlockSpec((kw * kw, Cp_in, tile_cout), lambda n, i, co: (0, 0, co)),   # weights
        pl.BlockSpec((1, tile_cout), lambda n, i, co: (0, co)),                   # bias
    ]
    args = [xp, wt, bp]
    if has_residual:
        assert residual.shape == (N, H, W, Cp_out)
        in_specs.append(pl.BlockSpec((1, th, W, tile_cout),
                                     lambda n, i, co: (n, i, 0, co)))
        args.append(residual)

    flops = 2 * N * H * W * (kw * kw) * Cp_in * Cp_out
    bytes_accessed = 4 * (xp.size + wt.size + N * H * W * Cp_out
                          + (residual.size if has_residual else 0))

    out = pl.pallas_call(
        kernel,
        out_shape=jax.ShapeDtypeStruct((N, H, W, Cp_out), jnp.float32),
        grid_spec=pltpu.PrefetchScalarGridSpec(
            num_scalar_prefetch=0,
            grid=(N, n_h, n_co),
            in_specs=in_specs,
            out_specs=pl.BlockSpec((1, th, W, tile_cout),
                                   lambda n, i, co: (n, i, 0, co)),
            scratch_shapes=[
                pltpu.VMEM((2, halo, Wp_al, Cp_in), jnp.float32),   # double-buffered halo
                pltpu.SemaphoreType.DMA((2,)),
            ],
        ),
        compiler_params=pltpu.CompilerParams(
            dimension_semantics=("parallel", "arbitrary", "arbitrary"),
            vmem_limit_bytes=32 * 1024 * 1024,
        ),
        cost_estimate=pl.CostEstimate(flops=flops, transcendentals=0,
                                      bytes_accessed=bytes_accessed),
    )(*args)
    return out


def init_encoder_block(key, n_in, n_out):
    """Deterministic init matching the torch module: w ~ N(0, 1/sqrt(cin*kw^2)), b = 0."""
    n_hid = n_out // 4

    def make_conv(k, cin, cout, kw):
        w = jax.random.normal(k, (cout, cin, kw, kw), jnp.float32) * (
            1.0 / math.sqrt(cin * kw * kw))
        return (w, jnp.zeros((cout,), jnp.float32))

    keys = jax.random.split(key, 5)
    return {
        "id": make_conv(keys[0], n_in, n_out, 1) if n_in != n_out else None,
        "conv1": make_conv(keys[1], n_in, n_hid, 3),
        "conv2": make_conv(keys[2], n_hid, n_hid, 3),
        "conv3": make_conv(keys[3], n_hid, n_hid, 3),
        "conv4": make_conv(keys[4], n_hid, n_out, 1),
    }


def encoder_block_forward(x, params, *, n_layers, th_max=32):
    """EncoderBlock.forward: id_path(x) + post_gain * res_path(x). x is NCHW."""
    post_gain = 1.0 / float(n_layers) ** 2
    x = x.astype(jnp.float32)   # mirrors the non-CUDA float32 branch of the reference
    N, Cin, H, W = x.shape
    n_out = params["conv4"][0].shape[0]
    Cp_in = _round_up(Cin, LANE)
    Cp_out = _round_up(n_out, LANE)

    # One NCHW -> NHWC transpose + one channel pad at the module boundary; the
    # lane-padded NHWC representation then flows through all five convs.
    x_nhwc = _pad_last(jnp.transpose(x, (0, 2, 3, 1)), Cp_in)

    if params["id"] is not None:
        w_id, b_id = params["id"]
        id_out = conv2d_nhwc(x_nhwc, w_id, b_id, 1, th_max=th_max)
    else:
        assert Cp_in == Cp_out
        id_out = x_nhwc

    w1, b1 = params["conv1"]
    w2, b2 = params["conv2"]
    w3, b3 = params["conv3"]
    w4, b4 = params["conv4"]

    h = conv2d_nhwc(x_nhwc, w1, b1, 3, relu_input=True, th_max=th_max)
    h = conv2d_nhwc(h, w2, b2, 3, relu_input=True, th_max=th_max)
    h = conv2d_nhwc(h, w3, b3, 3, relu_input=True, th_max=th_max)
    # Last 1x1 conv with fused post_gain scale + residual add (id_path output).
    out = conv2d_nhwc(h, w4, b4, 1, relu_input=True, scale=post_gain,
                      residual=id_out, th_max=th_max)

    out = out[..., :n_out]                        # drop lane padding
    return jnp.transpose(out, (0, 3, 1, 2))       # back to NCHW


def encoder_block_reference(x, params, *, n_layers):
    """Plain-JAX reference mirroring the PyTorch module."""
    post_gain = 1.0 / float(n_layers) ** 2

    def conv(h, wb, padv):
        w, b = wb
        y = lax.conv_general_dilated(
            h, w, window_strides=(1, 1), padding=[(padv, padv), (padv, padv)],
            dimension_numbers=("NCHW", "OIHW", "NCHW"),
            precision=lax.Precision.HIGHEST)
        return y + b.reshape(1, -1, 1, 1)

    idp = conv(x, params["id"], 0) if params["id"] is not None else x
    h = conv(jnp.maximum(x, 0.0), params["conv1"], 1)
    h = conv(jnp.maximum(h, 0.0), params["conv2"], 1)
    h = conv(jnp.maximum(h, 0.0), params["conv3"], 1)
    h = conv(jnp.maximum(h, 0.0), params["conv4"], 0)
    return idp + post_gain * h


if __name__ == "__main__":
    key = jax.random.PRNGKey(0)
    batch, n_in, n_out, n_layers, spatial = 2, 16, 64, 2, 16

    k_p, k_x = jax.random.split(key)
    params = init_encoder_block(k_p, n_in, n_out)
    x = jax.random.normal(k_x, (batch, n_in, spatial, spatial), jnp.float32)

    # th_max=8 -> 2 row-tiles per image so the halo double-buffer path is exercised.
    fwd = jax.jit(partial(encoder_block_forward, n_layers=n_layers, th_max=8))
    y = fwd(x, params)
    jax.block_until_ready(y)

    y_ref = encoder_block_reference(x, params, n_layers=n_layers)
    assert y.shape == (batch, n_out, spatial, spatial)
    assert jnp.allclose(y, y_ref, atol=1e-2, rtol=1e-2), \
        float(jnp.max(jnp.abs(y - y_ref)))

    print("KERNEL_OK")
</pallas_src>

<mosaic_0001>
module attributes {stable_mosaic.version = 11 : i64} {
  func.func @kernel(%arg0: i32, %arg1: i32, %arg2: i32, %arg3: memref<36x24x128xf32, #tpu.memory_space<any>>, %arg4: memref<9x128x128xf32, #tpu.memory_space<vmem>>, %arg5: memref<1x128xf32, #tpu.memory_space<vmem>>, %arg6: memref<1x8x16x128xf32, #tpu.memory_space<vmem>>, %arg7: memref<2x10x24x128xf32, #tpu.memory_space<vmem>>, %arg8: memref<2x!tpu.dma_semaphore, #tpu.memory_space<semaphore_mem>>) attributes {dimension_semantics = [#tpu.dimension_semantics<parallel>, #tpu.dimension_semantics<arbitrary>, #tpu.dimension_semantics<arbitrary>], iteration_bounds = array<i64: 2, 2, 1>, scalar_prefetch = 0 : i64, scratch_operands = 2 : i64, tpu.core_type = #tpu.core_type<tc>, window_params = [{}, {transform_indices = @transform_1, window_bounds = array<i64: 9, 128, 128>}, {transform_indices = @transform_2, window_bounds = array<i64: 1, 128>}, {transform_indices = @transform_3, window_bounds = array<i64: 1, 8, 16, 128>}]} {
    %c2_i32 = arith.constant 2 : i32
    %c0_i32 = arith.constant 0 : i32
    %0 = arith.cmpi eq, %c2_i32, %c0_i32 : i32
    %c1_i32 = arith.constant 1 : i32
    %1 = arith.select %0, %c1_i32, %c2_i32 : i32
    %2 = arith.remsi %arg1, %1 : i32
    %c0_i32_0 = arith.constant 0 : i32
    %3 = arith.cmpi ne, %2, %c0_i32_0 : i32
    %c0_i32_1 = arith.constant 0 : i32
    %4 = arith.cmpi slt, %2, %c0_i32_1 : i32
    %c0_i32_2 = arith.constant 0 : i32
    %5 = arith.cmpi slt, %1, %c0_i32_2 : i32
    %6 = arith.xori %4, %5 : i1
    %7 = arith.andi %6, %3 : i1
    %8 = arith.addi %2, %1 : i32
    %9 = arith.select %7, %8, %2 : i32
    %c0_i32_3 = arith.constant 0 : i32
    %10 = arith.cmpi eq, %arg1, %c0_i32_3 : i32
    %c0_i32_4 = arith.constant 0 : i32
    %11 = arith.cmpi eq, %arg2, %c0_i32_4 : i32
    %12 = arith.andi %10, %11 : i1
    %13 = arith.extui %12 : i1 to i32
    %c0_i32_5 = arith.constant 0 : i32
    %14 = arith.cmpi ne, %13, %c0_i32_5 : i32
    scf.if %14 {
      %c18_i32 = arith.constant 18 : i32
      %87 = arith.muli %arg0, %c18_i32 : i32
      %c0_i32_48 = arith.constant 0 : i32
      %88 = arith.addi %87, %c0_i32_48 : i32
      %c0_i32_49 = arith.constant 0 : i32
      %c0_i32_50 = arith.constant 0 : i32
      %c0_i32_51 = arith.constant 0 : i32
      %c0_i32_52 = arith.constant 0 : i32
      %89 = tpu.memref_slice %arg3[%88, %c0_i32_51, %c0_i32_52] : memref<36x24x128xf32, #tpu.memory_space<any>> -> memref<10x24x128xf32, #tpu.memory_space<any>>
      %c0_i32_53 = arith.constant 0 : i32
      %c0_i32_54 = arith.constant 0 : i32
      %c0_i32_55 = arith.constant 0 : i32
      %90 = tpu.memref_slice %arg7[%c0_i32_49, %c0_i32_53, %c0_i32_54, %c0_i32_55] : memref<2x10x24x128xf32, #tpu.memory_space<vmem>> -> memref<1x10x24x128xf32, #tpu.memory_space<vmem>>
      %91 = tpu.memref_squeeze %90 : memref<1x10x24x128xf32, #tpu.memory_space<vmem>> -> memref<10x24x128xf32, #tpu.memory_space<vmem>>
      %92 = tpu.memref_slice %arg8[%c0_i32_50] : memref<2x!tpu.dma_semaphore, #tpu.memory_space<semaphore_mem>> -> memref<1x!tpu.dma_semaphore, #tpu.memory_space<semaphore_mem>>
      %93 = tpu.memref_squeeze %92 : memref<1x!tpu.dma_semaphore, #tpu.memory_space<semaphore_mem>> -> memref<!tpu.dma_semaphore, #tpu.memory_space<semaphore_mem>>
      tpu.enqueue_dma source(%89 : memref<10x24x128xf32, #tpu.memory_space<any>>) target(%91 : memref<10x24x128xf32, #tpu.memory_space<vmem>>) target_semaphore(%93 : memref<!tpu.dma_semaphore, #tpu.memory_space<semaphore_mem>>)
    } else {
    }
    %c0_i32_6 = arith.constant 0 : i32
    %15 = arith.cmpi eq, %arg2, %c0_i32_6 : i32
    %16 = arith.extui %15 : i1 to i32
    %c0_i32_7 = arith.constant 0 : i32
    %17 = arith.cmpi ne, %16, %c0_i32_7 : i32
    scf.if %17 {
      %c18_i32 = arith.constant 18 : i32
      %87 = arith.muli %arg0, %c18_i32 : i32
      %c8_i32 = arith.constant 8 : i32
      %88 = arith.muli %arg1, %c8_i32 : i32
      %89 = arith.addi %87, %88 : i32
      %c0_i32_48 = arith.constant 0 : i32
      %c0_i32_49 = arith.constant 0 : i32
      %90 = tpu.memref_slice %arg3[%89, %c0_i32_48, %c0_i32_49] : memref<36x24x128xf32, #tpu.memory_space<any>> -> memref<10x24x128xf32, #tpu.memory_space<any>>
      %c0_i32_50 = arith.constant 0 : i32
      %c0_i32_51 = arith.constant 0 : i32
      %c0_i32_52 = arith.constant 0 : i32
      %91 = tpu.memref_slice %arg7[%9, %c0_i32_50, %c0_i32_51, %c0_i32_52] : memref<2x10x24x128xf32, #tpu.memory_space<vmem>> -> memref<1x10x24x128xf32, #tpu.memory_space<vmem>>
      %92 = tpu.memref_squeeze %91 : memref<1x10x24x128xf32, #tpu.memory_space<vmem>> -> memref<10x24x128xf32, #tpu.memory_space<vmem>>
      %93 = tpu.memref_slice %arg8[%9] : memref<2x!tpu.dma_semaphore, #tpu.memory_space<semaphore_mem>> -> memref<1x!tpu.dma_semaphore, #tpu.memory_space<semaphore_mem>>
      %94 = tpu.memref_squeeze %93 : memref<1x!tpu.dma_semaphore, #tpu.memory_space<semaphore_mem>> -> memref<!tpu.dma_semaphore, #tpu.memory_space<semaphore_mem>>
      tpu.wait_dma2 semaphore(%94 : memref<!tpu.dma_semaphore, #tpu.memory_space<semaphore_mem>>) src(%90 : memref<10x24x128xf32, #tpu.memory_space<any>>) dst(%92 : memref<10x24x128xf32, #tpu.memory_space<vmem>>)
    } else {
    }
    %c0_i32_8 = arith.constant 0 : i32
    %18 = arith.cmpi eq, %arg2, %c0_i32_8 : i32
    %c1_i32_9 = arith.constant 1 : i32
    %19 = arith.addi %arg1, %c1_i32_9 : i32
    %c2_i32_10 = arith.constant 2 : i32
    %20 = arith.cmpi slt, %19, %c2_i32_10 : i32
    %21 = arith.andi %18, %20 : i1
    %22 = arith.extui %21 : i1 to i32
    %c0_i32_11 = arith.constant 0 : i32
    %23 = arith.cmpi ne, %22, %c0_i32_11 : i32
    scf.if %23 {
      %c1_i32_48 = arith.constant 1 : i32
      %87 = arith.addi %arg1, %c1_i32_48 : i32
      %c1_i32_49 = arith.constant 1 : i32
      %88 = arith.subi %c1_i32_49, %9 : i32
      %c18_i32 = arith.constant 18 : i32
      %89 = arith.muli %arg0, %c18_i32 : i32
      %c8_i32 = arith.constant 8 : i32
      %90 = arith.muli %87, %c8_i32 : i32
      %91 = arith.addi %89, %90 : i32
      %c0_i32_50 = arith.constant 0 : i32
      %c0_i32_51 = arith.constant 0 : i32
      %92 = tpu.memref_slice %arg3[%91, %c0_i32_50, %c0_i32_51] : memref<36x24x128xf32, #tpu.memory_space<any>> -> memref<10x24x128xf32, #tpu.memory_space<any>>
      %c0_i32_52 = arith.constant 0 : i32
      %c0_i32_53 = arith.constant 0 : i32
      %c0_i32_54 = arith.constant 0 : i32
      %93 = tpu.memref_slice %arg7[%88, %c0_i32_52, %c0_i32_53, %c0_i32_54] : memref<2x10x24x128xf32, #tpu.memory_space<vmem>> -> memref<1x10x24x128xf32, #tpu.memory_space<vmem>>
      %94 = tpu.memref_squeeze %93 : memref<1x10x24x128xf32, #tpu.memory_space<vmem>> -> memref<10x24x128xf32, #tpu.memory_space<vmem>>
      %95 = tpu.memref_slice %arg8[%88] : memref<2x!tpu.dma_semaphore, #tpu.memory_space<semaphore_mem>> -> memref<1x!tpu.dma_semaphore, #tpu.memory_space<semaphore_mem>>
      %96 = tpu.memref_squeeze %95 : memref<1x!tpu.dma_semaphore, #tpu.memory_space<semaphore_mem>> -> memref<!tpu.dma_semaphore, #tpu.memory_space<semaphore_mem>>
      tpu.enqueue_dma source(%92 : memref<10x24x128xf32, #tpu.memory_space<any>>) target(%94 : memref<10x24x128xf32, #tpu.memory_space<vmem>>) target_semaphore(%96 : memref<!tpu.dma_semaphore, #tpu.memory_space<semaphore_mem>>)
    } else {
    }
    %24 = arith.index_cast %9 : i32 to index
    %c0 = arith.constant 0 : index
    %c0_12 = arith.constant 0 : index
    %c0_13 = arith.constant 0 : index
    %25 = vector.load %arg7[%24, %c0, %c0_12, %c0_13] : memref<2x10x24x128xf32, #tpu.memory_space<vmem>>, vector<1x10x24x128xf32>
    %26 = vector.shape_cast %25 : vector<1x10x24x128xf32> to vector<10x24x128xf32>
    %cst = arith.constant 0.000000e+00 : f32
    %27 = vector.broadcast %cst : f32 to vector<10x24x128xf32>
    %28 = arith.maximumf %26, %27 : vector<10x24x128xf32>
    %29 = vector.extract_strided_slice %28 {offsets = [0, 0, 0], sizes = [8, 16, 128], strides = [1, 1, 1]} : vector<10x24x128xf32> to vector<8x16x128xf32>
    %30 = vector.shape_cast %29 : vector<8x16x128xf32> to vector<128x128xf32>
    %c0_14 = arith.constant 0 : index
    %c0_15 = arith.constant 0 : index
    %c0_16 = arith.constant 0 : index
    %31 = vector.load %arg4[%c0_14, %c0_15, %c0_16] : memref<9x128x128xf32, #tpu.memory_space<vmem>>, vector<1x128x128xf32>
    %32 = vector.shape_cast %31 : vector<1x128x128xf32> to vector<128x128xf32>
    %cst_17 = arith.constant dense<0.000000e+00> : vector<128x128xf32>
    %33 = tpu.matmul %30, %32, %cst_17 {dimension_numbers = #tpu.dot_dimension_numbers<[1], [0], [0], [1], [0, 0, 1, 1], [], []>} : vector<128x128xf32>, vector<128x128xf32>, vector<128x128xf32> -> vector<128x128xf32>
    %34 = vector.extract_strided_slice %28 {offsets = [0, 1, 0], sizes = [8, 16, 128], strides = [1, 1, 1]} : vector<10x24x128xf32> to vector<8x16x128xf32>
    %35 = vector.shape_cast %34 : vector<8x16x128xf32> to vector<128x128xf32>
    %c1 = arith.constant 1 : index
    %c0_18 = arith.constant 0 : index
    %c0_19 = arith.constant 0 : index
    %36 = vector.load %arg4[%c1, %c0_18, %c0_19] : memref<9x128x128xf32, #tpu.memory_space<vmem>>, vector<1x128x128xf32>
    %37 = vector.shape_cast %36 : vector<1x128x128xf32> to vector<128x128xf32>
    %cst_20 = arith.constant dense<0.000000e+00> : vector<128x128xf32>
    %38 = tpu.matmul %35, %37, %cst_20 {dimension_numbers = #tpu.dot_dimension_numbers<[1], [0], [0], [1], [0, 0, 1, 1], [], []>} : vector<128x128xf32>, vector<128x128xf32>, vector<128x128xf32> -> vector<128x128xf32>
    %39 = arith.addf %33, %38 : vector<128x128xf32>
    %40 = vector.extract_strided_slice %28 {offsets = [0, 2, 0], sizes = [8, 16, 128], strides = [1, 1, 1]} : vector<10x24x128xf32> to vector<8x16x128xf32>
    %41 = vector.shape_cast %40 : vector<8x16x128xf32> to vector<128x128xf32>
    %c2 = arith.constant 2 : index
    %c0_21 = arith.constant 0 : index
    %c0_22 = arith.constant 0 : index
    %42 = vector.load %arg4[%c2, %c0_21, %c0_22] : memref<9x128x128xf32, #tpu.memory_space<vmem>>, vector<1x128x128xf32>
    %43 = vector.shape_cast %42 : vector<1x128x128xf32> to vector<128x128xf32>
    %cst_23 = arith.constant dense<0.000000e+00> : vector<128x128xf32>
    %44 = tpu.matmul %41, %43, %cst_23 {dimension_numbers = #tpu.dot_dimension_numbers<[1], [0], [0], [1], [0, 0, 1, 1], [], []>} : vector<128x128xf32>, vector<128x128xf32>, vector<128x128xf32> -> vector<128x128xf32>
    %45 = arith.addf %39, %44 : vector<128x128xf32>
    %46 = vector.extract_strided_slice %28 {offsets = [1, 0, 0], sizes = [8, 16, 128], strides = [1, 1, 1]} : vector<10x24x128xf32> to vector<8x16x128xf32>
    %47 = vector.shape_cast %46 : vector<8x16x128xf32> to vector<128x128xf32>
    %c3 = arith.constant 3 : index
    %c0_24 = arith.constant 0 : index
    %c0_25 = arith.constant 0 : index
    %48 = vector.load %arg4[%c3, %c0_24, %c0_25] : memref<9x128x128xf32, #tpu.memory_space<vmem>>, vector<1x128x128xf32>
    %49 = vector.shape_cast %48 : vector<1x128x128xf32> to vector<128x128xf32>
    %cst_26 = arith.constant dense<0.000000e+00> : vector<128x128xf32>
    %50 = tpu.matmul %47, %49, %cst_26 {dimension_numbers = #tpu.dot_dimension_numbers<[1], [0], [0], [1], [0, 0, 1, 1], [], []>} : vector<128x128xf32>, vector<128x128xf32>, vector<128x128xf32> -> vector<128x128xf32>
    %51 = arith.addf %45, %50 : vector<128x128xf32>
    %52 = vector.extract_strided_slice %28 {offsets = [1, 1, 0], sizes = [8, 16, 128], strides = [1, 1, 1]} : vector<10x24x128xf32> to vector<8x16x128xf32>
    %53 = vector.shape_cast %52 : vector<8x16x128xf32> to vector<128x128xf32>
    %c4 = arith.constant 4 : index
    %c0_27 = arith.constant 0 : index
    %c0_28 = arith.constant 0 : index
    %54 = vector.load %arg4[%c4, %c0_27, %c0_28] : memref<9x128x128xf32, #tpu.memory_space<vmem>>, vector<1x128x128xf32>
    %55 = vector.shape_cast %54 : vector<1x128x128xf32> to vector<128x128xf32>
    %cst_29 = arith.constant dense<0.000000e+00> : vector<128x128xf32>
    %56 = tpu.matmul %53, %55, %cst_29 {dimension_numbers = #tpu.dot_dimension_numbers<[1], [0], [0], [1], [0, 0, 1, 1], [], []>} : vector<128x128xf32>, vector<128x128xf32>, vector<128x128xf32> -> vector<128x128xf32>
    %57 = arith.addf %51, %56 : vector<128x128xf32>
    %58 = vector.extract_strided_slice %28 {offsets = [1, 2, 0], sizes = [8, 16, 128], strides = [1, 1, 1]} : vector<10x24x128xf32> to vector<8x16x128xf32>
    %59 = vector.shape_cast %58 : vector<8x16x128xf32> to vector<128x128xf32>
    %c5 = arith.constant 5 : index
    %c0_30 = arith.constant 0 : index
    %c0_31 = arith.constant 0 : index
    %60 = vector.load %arg4[%c5, %c0_30, %c0_31] : memref<9x128x128xf32, #tpu.memory_space<vmem>>, vector<1x128x128xf32>
    %61 = vector.shape_cast %60 : vector<1x128x128xf32> to vector<128x128xf32>
    %cst_32 = arith.constant dense<0.000000e+00> : vector<128x128xf32>
    %62 = tpu.matmul %59, %61, %cst_32 {dimension_numbers = #tpu.dot_dimension_numbers<[1], [0], [0], [1], [0, 0, 1, 1], [], []>} : vector<128x128xf32>, vector<128x128xf32>, vector<128x128xf32> -> vector<128x128xf32>
    %63 = arith.addf %57, %62 : vector<128x128xf32>
    %64 = vector.extract_strided_slice %28 {offsets = [2, 0, 0], sizes = [8, 16, 128], strides = [1, 1, 1]} : vector<10x24x128xf32> to vector<8x16x128xf32>
    %65 = vector.shape_cast %64 : vector<8x16x128xf32> to vector<128x128xf32>
    %c6 = arith.constant 6 : index
    %c0_33 = arith.constant 0 : index
    %c0_34 = arith.constant 0 : index
    %66 = vector.load %arg4[%c6, %c0_33, %c0_34] : memref<9x128x128xf32, #tpu.memory_space<vmem>>, vector<1x128x128xf32>
    %67 = vector.shape_cast %66 : vector<1x128x128xf32> to vector<128x128xf32>
    %cst_35 = arith.constant dense<0.000000e+00> : vector<128x128xf32>
    %68 = tpu.matmul %65, %67, %cst_35 {dimension_numbers = #tpu.dot_dimension_numbers<[1], [0], [0], [1], [0, 0, 1, 1], [], []>} : vector<128x128xf32>, vector<128x128xf32>, vector<128x128xf32> -> vector<128x128xf32>
    %69 = arith.addf %63, %68 : vector<128x128xf32>
    %70 = vector.extract_strided_slice %28 {offsets = [2, 1, 0], sizes = [8, 16, 128], strides = [1, 1, 1]} : vector<10x24x128xf32> to vector<8x16x128xf32>
    %71 = vector.shape_cast %70 : vector<8x16x128xf32> to vector<128x128xf32>
    %c7 = arith.constant 7 : index
    %c0_36 = arith.constant 0 : index
    %c0_37 = arith.constant 0 : index
    %72 = vector.load %arg4[%c7, %c0_36, %c0_37] : memref<9x128x128xf32, #tpu.memory_space<vmem>>, vector<1x128x128xf32>
    %73 = vector.shape_cast %72 : vector<1x128x128xf32> to vector<128x128xf32>
    %cst_38 = arith.constant dense<0.000000e+00> : vector<128x128xf32>
    %74 = tpu.matmul %71, %73, %cst_38 {dimension_numbers = #tpu.dot_dimension_numbers<[1], [0], [0], [1], [0, 0, 1, 1], [], []>} : vector<128x128xf32>, vector<128x128xf32>, vector<128x128xf32> -> vector<128x128xf32>
    %75 = arith.addf %69, %74 : vector<128x128xf32>
    %76 = vector.extract_strided_slice %28 {offsets = [2, 2, 0], sizes = [8, 16, 128], strides = [1, 1, 1]} : vector<10x24x128xf32> to vector<8x16x128xf32>
    %77 = vector.shape_cast %76 : vector<8x16x128xf32> to vector<128x128xf32>
    %c8 = arith.constant 8 : index
    %c0_39 = arith.constant 0 : index
    %c0_40 = arith.constant 0 : index
    %78 = vector.load %arg4[%c8, %c0_39, %c0_40] : memref<9x128x128xf32, #tpu.memory_space<vmem>>, vector<1x128x128xf32>
    %79 = vector.shape_cast %78 : vector<1x128x128xf32> to vector<128x128xf32>
    %cst_41 = arith.constant dense<0.000000e+00> : vector<128x128xf32>
    %80 = tpu.matmul %77, %79, %cst_41 {dimension_numbers = #tpu.dot_dimension_numbers<[1], [0], [0], [1], [0, 0, 1, 1], [], []>} : vector<128x128xf32>, vector<128x128xf32>, vector<128x128xf32> -> vector<128x128xf32>
    %81 = arith.addf %75, %80 : vector<128x128xf32>
    %c0_42 = arith.constant 0 : index
    %c0_43 = arith.constant 0 : index
    %82 = vector.load %arg5[%c0_42, %c0_43] : memref<1x128xf32, #tpu.memory_space<vmem>>, vector<1x128xf32>
    %83 = vector.broadcast %82 : vector<1x128xf32> to vector<128x128xf32>
    %84 = arith.addf %81, %83 : vector<128x128xf32>
    %85 = vector.shape_cast %84 : vector<128x128xf32> to vector<1x8x16x128xf32>
    %c0_44 = arith.constant 0 : index
    %c0_45 = arith.constant 0 : index
    %c0_46 = arith.constant 0 : index
    %c0_47 = arith.constant 0 : index
    %86 = vector.load %arg6[%c0_44, %c0_45, %c0_46, %c0_47] : memref<1x8x16x128xf32, #tpu.memory_space<vmem>>, vector<1x8x16x128xf32>
    tpu.vector_store %arg6[%c0_44, %c0_45, %c0_46, %c0_47], %85 {strides = array<i32>} : memref<1x8x16x128xf32, #tpu.memory_space<vmem>>, vector<1x8x16x128xf32>,
    return
  }
  func.func @transform_1(%arg0: i32, %arg1: i32, %arg2: i32) -> (i32, i32, i32) {
    %c0_i32 = arith.constant 0 : i32
    %c0_i32_0 = arith.constant 0 : i32
    %c0_i32_1 = arith.constant 0 : i32
    return %c0_i32, %c0_i32_0, %arg2 : i32, i32, i32
  }
  func.func @transform_2(%arg0: i32, %arg1: i32, %arg2: i32) -> (i32, i32) {
    %c0_i32 = arith.constant 0 : i32
    %c0_i32_0 = arith.constant 0 : i32
    return %c0_i32, %arg2 : i32, i32
  }
  func.func @transform_3(%arg0: i32, %arg1: i32, %arg2: i32) -> (i32, i32, i32, i32) {
    %c0_i32 = arith.constant 0 : i32
    %c0_i32_0 = arith.constant 0 : i32
    return %arg0, %arg1, %c0_i32, %arg2 : i32, i32, i32, i32
  }
}

module attributes {stable_mosaic.version = 11 : i64} {
  func.func @kernel(%arg0: i32, %arg1: i32, %arg2: i32, %arg3: memref<32x16x128xf32, #tpu.memory_space<any>>, %arg4: memref<1x128x128xf32, #tpu.memory_space<vmem>>, %arg5: memref<1x128xf32, #tpu.memory_space<vmem>>, %arg6: memref<1x8x16x128xf32, #tpu.memory_space<vmem>>, %arg7: memref<2x8x16x128xf32, #tpu.memory_space<vmem>>, %arg8: memref<2x!tpu.dma_semaphore, #tpu.memory_space<semaphore_mem>>) attributes {dimension_semantics = [#tpu.dimension_semantics<parallel>, #tpu.dimension_semantics<arbitrary>, #tpu.dimension_semantics<arbitrary>], iteration_bounds = array<i64: 2, 2, 1>, scalar_prefetch = 0 : i64, scratch_operands = 2 : i64, tpu.core_type = #tpu.core_type<tc>, window_params = [{}, {transform_indices = @transform_1, window_bounds = array<i64: 1, 128, 128>}, {transform_indices = @transform_2, window_bounds = array<i64: 1, 128>}, {transform_indices = @transform_3, window_bounds = array<i64: 1, 8, 16, 128>}]} {
    %c2_i32 = arith.constant 2 : i32
    %c0_i32 = arith.constant 0 : i32
    %0 = arith.cmpi eq, %c2_i32, %c0_i32 : i32
    %c1_i32 = arith.constant 1 : i32
    %1 = arith.select %0, %c1_i32, %c2_i32 : i32
    %2 = arith.remsi %arg1, %1 : i32
    %c0_i32_0 = arith.constant 0 : i32
    %3 = arith.cmpi ne, %2, %c0_i32_0 : i32
    %c0_i32_1 = arith.constant 0 : i32
    %4 = arith.cmpi slt, %2, %c0_i32_1 : i32
    %c0_i32_2 = arith.constant 0 : i32
    %5 = arith.cmpi slt, %1, %c0_i32_2 : i32
    %6 = arith.xori %4, %5 : i1
    %7 = arith.andi %6, %3 : i1
    %8 = arith.addi %2, %1 : i32
    %9 = arith.select %7, %8, %2 : i32
    %c0_i32_3 = arith.constant 0 : i32
    %10 = arith.cmpi eq, %arg1, %c0_i32_3 : i32
    %c0_i32_4 = arith.constant 0 : i32
    %11 = arith.cmpi eq, %arg2, %c0_i32_4 : i32
    %12 = arith.andi %10, %11 : i1
    %13 = arith.extui %12 : i1 to i32
    %c0_i32_5 = arith.constant 0 : i32
    %14 = arith.cmpi ne, %13, %c0_i32_5 : i32
    scf.if %14 {
      %c16_i32 = arith.constant 16 : i32
      %36 = arith.muli %arg0, %c16_i32 : i32
      %c0_i32_23 = arith.constant 0 : i32
      %37 = arith.addi %36, %c0_i32_23 : i32
      %c0_i32_24 = arith.constant 0 : i32
      %c0_i32_25 = arith.constant 0 : i32
      %c0_i32_26 = arith.constant 0 : i32
      %c0_i32_27 = arith.constant 0 : i32
      %38 = tpu.memref_slice %arg3[%37, %c0_i32_26, %c0_i32_27] : memref<32x16x128xf32, #tpu.memory_space<any>> -> memref<8x16x128xf32, #tpu.memory_space<any>>
      %c0_i32_28 = arith.constant 0 : i32
      %c0_i32_29 = arith.constant 0 : i32
      %c0_i32_30 = arith.constant 0 : i32
      %39 = tpu.memref_slice %arg7[%c0_i32_24, %c0_i32_28, %c0_i32_29, %c0_i32_30] : memref<2x8x16x128xf32, #tpu.memory_space<vmem>> -> memref<1x8x16x128xf32, #tpu.memory_space<vmem>>
      %40 = tpu.memref_squeeze %39 : memref<1x8x16x128xf32, #tpu.memory_space<vmem>> -> memref<8x16x128xf32, #tpu.memory_space<vmem>>
      %41 = tpu.memref_slice %arg8[%c0_i32_25] : memref<2x!tpu.dma_semaphore, #tpu.memory_space<semaphore_mem>> -> memref<1x!tpu.dma_semaphore, #tpu.memory_space<semaphore_mem>>
      %42 = tpu.memref_squeeze %41 : memref<1x!tpu.dma_semaphore, #tpu.memory_space<semaphore_mem>> -> memref<!tpu.dma_semaphore, #tpu.memory_space<semaphore_mem>>
      tpu.enqueue_dma source(%38 : memref<8x16x128xf32, #tpu.memory_space<any>>) target(%40 : memref<8x16x128xf32, #tpu.memory_space<vmem>>) target_semaphore(%42 : memref<!tpu.dma_semaphore, #tpu.memory_space<semaphore_mem>>)
    } else {
    }
    %c0_i32_6 = arith.constant 0 : i32
    %15 = arith.cmpi eq, %arg2, %c0_i32_6 : i32
    %16 = arith.extui %15 : i1 to i32
    %c0_i32_7 = arith.constant 0 : i32
    %17 = arith.cmpi ne, %16, %c0_i32_7 : i32
    scf.if %17 {
      %c16_i32 = arith.constant 16 : i32
      %36 = arith.muli %arg0, %c16_i32 : i32
      %c8_i32 = arith.constant 8 : i32
      %37 = arith.muli %arg1, %c8_i32 : i32
      %38 = arith.addi %36, %37 : i32
      %c0_i32_23 = arith.constant 0 : i32
      %c0_i32_24 = arith.constant 0 : i32
      %39 = tpu.memref_slice %arg3[%38, %c0_i32_23, %c0_i32_24] : memref<32x16x128xf32, #tpu.memory_space<any>> -> memref<8x16x128xf32, #tpu.memory_space<any>>
      %c0_i32_25 = arith.constant 0 : i32
      %c0_i32_26 = arith.constant 0 : i32
      %c0_i32_27 = arith.constant 0 : i32
      %40 = tpu.memref_slice %arg7[%9, %c0_i32_25, %c0_i32_26, %c0_i32_27] : memref<2x8x16x128xf32, #tpu.memory_space<vmem>> -> memref<1x8x16x128xf32, #tpu.memory_space<vmem>>
      %41 = tpu.memref_squeeze %40 : memref<1x8x16x128xf32, #tpu.memory_space<vmem>> -> memref<8x16x128xf32, #tpu.memory_space<vmem>>
      %42 = tpu.memref_slice %arg8[%9] : memref<2x!tpu.dma_semaphore, #tpu.memory_space<semaphore_mem>> -> memref<1x!tpu.dma_semaphore, #tpu.memory_space<semaphore_mem>>
      %43 = tpu.memref_squeeze %42 : memref<1x!tpu.dma_semaphore, #tpu.memory_space<semaphore_mem>> -> memref<!tpu.dma_semaphore, #tpu.memory_space<semaphore_mem>>
      tpu.wait_dma2 semaphore(%43 : memref<!tpu.dma_semaphore, #tpu.memory_space<semaphore_mem>>) src(%39 : memref<8x16x128xf32, #tpu.memory_space<any>>) dst(%41 : memref<8x16x128xf32, #tpu.memory_space<vmem>>)
    } else {
    }
    %c0_i32_8 = arith.constant 0 : i32
    %18 = arith.cmpi eq, %arg2, %c0_i32_8 : i32
    %c1_i32_9 = arith.constant 1 : i32
    %19 = arith.addi %arg1, %c1_i32_9 : i32
    %c2_i32_10 = arith.constant 2 : i32
    %20 = arith.cmpi slt, %19, %c2_i32_10 : i32
    %21 = arith.andi %18, %20 : i1
    %22 = arith.extui %21 : i1 to i32
    %c0_i32_11 = arith.constant 0 : i32
    %23 = arith.cmpi ne, %22, %c0_i32_11 : i32
    scf.if %23 {
      %c1_i32_23 = arith.constant 1 : i32
      %36 = arith.addi %arg1, %c1_i32_23 : i32
      %c1_i32_24 = arith.constant 1 : i32
      %37 = arith.subi %c1_i32_24, %9 : i32
      %c16_i32 = arith.constant 16 : i32
      %38 = arith.muli %arg0, %c16_i32 : i32
      %c8_i32 = arith.constant 8 : i32
      %39 = arith.muli %36, %c8_i32 : i32
      %40 = arith.addi %38, %39 : i32
      %c0_i32_25 = arith.constant 0 : i32
      %c0_i32_26 = arith.constant 0 : i32
      %41 = tpu.memref_slice %arg3[%40, %c0_i32_25, %c0_i32_26] : memref<32x16x128xf32, #tpu.memory_space<any>> -> memref<8x16x128xf32, #tpu.memory_space<any>>
      %c0_i32_27 = arith.constant 0 : i32
      %c0_i32_28 = arith.constant 0 : i32
      %c0_i32_29 = arith.constant 0 : i32
      %42 = tpu.memref_slice %arg7[%37, %c0_i32_27, %c0_i32_28, %c0_i32_29] : memref<2x8x16x128xf32, #tpu.memory_space<vmem>> -> memref<1x8x16x128xf32, #tpu.memory_space<vmem>>
      %43 = tpu.memref_squeeze %42 : memref<1x8x16x128xf32, #tpu.memory_space<vmem>> -> memref<8x16x128xf32, #tpu.memory_space<vmem>>
      %44 = tpu.memref_slice %arg8[%37] : memref<2x!tpu.dma_semaphore, #tpu.memory_space<semaphore_mem>> -> memref<1x!tpu.dma_semaphore, #tpu.memory_space<semaphore_mem>>
      %45 = tpu.memref_squeeze %44 : memref<1x!tpu.dma_semaphore, #tpu.memory_space<semaphore_mem>> -> memref<!tpu.dma_semaphore, #tpu.memory_space<semaphore_mem>>
      tpu.enqueue_dma source(%41 : memref<8x16x128xf32, #tpu.memory_space<any>>) target(%43 : memref<8x16x128xf32, #tpu.memory_space<vmem>>) target_semaphore(%45 : memref<!tpu.dma_semaphore, #tpu.memory_space<semaphore_mem>>)
    } else {
    }
    %24 = arith.index_cast %9 : i32 to index
    %c0 = arith.constant 0 : index
    %c0_12 = arith.constant 0 : index
    %c0_13 = arith.constant 0 : index
    %25 = vector.load %arg7[%24, %c0, %c0_12, %c0_13] : memref<2x8x16x128xf32, #tpu.memory_space<vmem>>, vector<1x8x16x128xf32>
    %26 = vector.shape_cast %25 : vector<1x8x16x128xf32> to vector<8x16x128xf32>
    %27 = vector.shape_cast %26 : vector<8x16x128xf32> to vector<128x128xf32>
    %c0_14 = arith.constant 0 : index
    %c0_15 = arith.constant 0 : index
    %c0_16 = arith.constant 0 : index
    %28 = vector.load %arg4[%c0_14, %c0_15, %c0_16] : memref<1x128x128xf32, #tpu.memory_space<vmem>>, vector<1x128x128xf32>
    %29 = vector.shape_cast %28 : vector<1x128x128xf32> to vector<128x128xf32>
    %cst = arith.constant dense<0.000000e+00> : vector<128x128xf32>
    %30 = tpu.matmul %27, %29, %cst {dimension_numbers = #tpu.dot_dimension_numbers<[1], [0], [0], [1], [0, 0, 1, 1], [], []>} : vector<128x128xf32>, vector<128x128xf32>, vector<128x128xf32> -> vector<128x128xf32>
    %c0_17 = arith.constant 0 : index
    %c0_18 = arith.constant 0 : index
    %31 = vector.load %arg5[%c0_17, %c0_18] : memref<1x128xf32, #tpu.memory_space<vmem>>, vector<1x128xf32>
    %32 = vector.broadcast %31 : vector<1x128xf32> to vector<128x128xf32>
    %33 = arith.addf %30, %32 : vector<128x128xf32>
    %34 = vector.shape_cast %33 : vector<128x128xf32> to vector<1x8x16x128xf32>
    %c0_19 = arith.constant 0 : index
    %c0_20 = arith.constant 0 : index
    %c0_21 = arith.constant 0 : index
    %c0_22 = arith.constant 0 : index
    %35 = vector.load %arg6[%c0_19, %c0_20, %c0_21, %c0_22] : memref<1x8x16x128xf32, #tpu.memory_space<vmem>>, vector<1x8x16x128xf32>
    tpu.vector_store %arg6[%c0_19, %c0_20, %c0_21, %c0_22], %34 {strides = array<i32>} : memref<1x8x16x128xf32, #tpu.memory_space<vmem>>, vector<1x8x16x128xf32>,
    return
  }
  func.func @transform_1(%arg0: i32, %arg1: i32, %arg2: i32) -> (i32, i32, i32) {
    %c0_i32 = arith.constant 0 : i32
    %c0_i32_0 = arith.constant 0 : i32
    %c0_i32_1 = arith.constant 0 : i32
    return %c0_i32, %c0_i32_0, %arg2 : i32, i32, i32
  }
  func.func @transform_2(%arg0: i32, %arg1: i32, %arg2: i32) -> (i32, i32) {
    %c0_i32 = arith.constant 0 : i32
    %c0_i32_0 = arith.constant 0 : i32
    return %c0_i32, %arg2 : i32, i32
  }
  func.func @transform_3(%arg0: i32, %arg1: i32, %arg2: i32) -> (i32, i32, i32, i32) {
    %c0_i32 = arith.constant 0 : i32
    %c0_i32_0 = arith.constant 0 : i32
    return %arg0, %arg1, %c0_i32, %arg2 : i32, i32, i32, i32
  }
}

module attributes {stable_mosaic.version = 11 : i64} {
  func.func @kernel(%arg0: i32, %arg1: i32, %arg2: i32, %arg3: memref<32x16x128xf32, #tpu.memory_space<any>>, %arg4: memref<1x128x128xf32, #tpu.memory_space<vmem>>, %arg5: memref<1x128xf32, #tpu.memory_space<vmem>>, %arg6: memref<1x8x16x128xf32, #tpu.memory_space<vmem>>, %arg7: memref<1x8x16x128xf32, #tpu.memory_space<vmem>>, %arg8: memref<2x8x16x128xf32, #tpu.memory_space<vmem>>, %arg9: memref<2x!tpu.dma_semaphore, #tpu.memory_space<semaphore_mem>>) attributes {dimension_semantics = [#tpu.dimension_semantics<parallel>, #tpu.dimension_semantics<arbitrary>, #tpu.dimension_semantics<arbitrary>], iteration_bounds = array<i64: 2, 2, 1>, scalar_prefetch = 0 : i64, scratch_operands = 2 : i64, tpu.core_type = #tpu.core_type<tc>, window_params = [{}, {transform_indices = @transform_1, window_bounds = array<i64: 1, 128, 128>}, {transform_indices = @transform_2, window_bounds = array<i64: 1, 128>}, {transform_indices = @transform_3, window_bounds = array<i64: 1, 8, 16, 128>}, {transform_indices = @transform_4, window_bounds = array<i64: 1, 8, 16, 128>}]} {
    %c2_i32 = arith.constant 2 : i32
    %c0_i32 = arith.constant 0 : i32
    %0 = arith.cmpi eq, %c2_i32, %c0_i32 : i32
    %c1_i32 = arith.constant 1 : i32
    %1 = arith.select %0, %c1_i32, %c2_i32 : i32
    %2 = arith.remsi %arg1, %1 : i32
    %c0_i32_0 = arith.constant 0 : i32
    %3 = arith.cmpi ne, %2, %c0_i32_0 : i32
    %c0_i32_1 = arith.constant 0 : i32
    %4 = arith.cmpi slt, %2, %c0_i32_1 : i32
    %c0_i32_2 = arith.constant 0 : i32
    %5 = arith.cmpi slt, %1, %c0_i32_2 : i32
    %6 = arith.xori %4, %5 : i1
    %7 = arith.andi %6, %3 : i1
    %8 = arith.addi %2, %1 : i32
    %9 = arith.select %7, %8, %2 : i32
    %c0_i32_3 = arith.constant 0 : i32
    %10 = arith.cmpi eq, %arg1, %c0_i32_3 : i32
    %c0_i32_4 = arith.constant 0 : i32
    %11 = arith.cmpi eq, %arg2, %c0_i32_4 : i32
    %12 = arith.andi %10, %11 : i1
    %13 = arith.extui %12 : i1 to i32
    %c0_i32_5 = arith.constant 0 : i32
    %14 = arith.cmpi ne, %13, %c0_i32_5 : i32
    scf.if %14 {
      %c16_i32 = arith.constant 16 : i32
      %42 = arith.muli %arg0, %c16_i32 : i32
      %c0_i32_29 = arith.constant 0 : i32
      %43 = arith.addi %42, %c0_i32_29 : i32
      %c0_i32_30 = arith.constant 0 : i32
      %c0_i32_31 = arith.constant 0 : i32
      %c0_i32_32 = arith.constant 0 : i32
      %c0_i32_33 = arith.constant 0 : i32
      %44 = tpu.memref_slice %arg3[%43, %c0_i32_32, %c0_i32_33] : memref<32x16x128xf32, #tpu.memory_space<any>> -> memref<8x16x128xf32, #tpu.memory_space<any>>
      %c0_i32_34 = arith.constant 0 : i32
      %c0_i32_35 = arith.constant 0 : i32
      %c0_i32_36 = arith.constant 0 : i32
      %45 = tpu.memref_slice %arg8[%c0_i32_30, %c0_i32_34, %c0_i32_35, %c0_i32_36] : memref<2x8x16x128xf32, #tpu.memory_space<vmem>> -> memref<1x8x16x128xf32, #tpu.memory_space<vmem>>
      %46 = tpu.memref_squeeze %45 : memref<1x8x16x128xf32, #tpu.memory_space<vmem>> -> memref<8x16x128xf32, #tpu.memory_space<vmem>>
      %47 = tpu.memref_slice %arg9[%c0_i32_31] : memref<2x!tpu.dma_semaphore, #tpu.memory_space<semaphore_mem>> -> memref<1x!tpu.dma_semaphore, #tpu.memory_space<semaphore_mem>>
      %48 = tpu.memref_squeeze %47 : memref<1x!tpu.dma_semaphore, #tpu.memory_space<semaphore_mem>> -> memref<!tpu.dma_semaphore, #tpu.memory_space<semaphore_mem>>
      tpu.enqueue_dma source(%44 : memref<8x16x128xf32, #tpu.memory_space<any>>) target(%46 : memref<8x16x128xf32, #tpu.memory_space<vmem>>) target_semaphore(%48 : memref<!tpu.dma_semaphore, #tpu.memory_space<semaphore_mem>>)
    } else {
    }
    %c0_i32_6 = arith.constant 0 : i32
    %15 = arith.cmpi eq, %arg2, %c0_i32_6 : i32
    %16 = arith.extui %15 : i1 to i32
    %c0_i32_7 = arith.constant 0 : i32
    %17 = arith.cmpi ne, %16, %c0_i32_7 : i32
    scf.if %17 {
      %c16_i32 = arith.constant 16 : i32
      %42 = arith.muli %arg0, %c16_i32 : i32
      %c8_i32 = arith.constant 8 : i32
      %43 = arith.muli %arg1, %c8_i32 : i32
      %44 = arith.addi %42, %43 : i32
      %c0_i32_29 = arith.constant 0 : i32
      %c0_i32_30 = arith.constant 0 : i32
      %45 = tpu.memref_slice %arg3[%44, %c0_i32_29, %c0_i32_30] : memref<32x16x128xf32, #tpu.memory_space<any>> -> memref<8x16x128xf32, #tpu.memory_space<any>>
      %c0_i32_31 = arith.constant 0 : i32
      %c0_i32_32 = arith.constant 0 : i32
      %c0_i32_33 = arith.constant 0 : i32
      %46 = tpu.memref_slice %arg8[%9, %c0_i32_31, %c0_i32_32, %c0_i32_33] : memref<2x8x16x128xf32, #tpu.memory_space<vmem>> -> memref<1x8x16x128xf32, #tpu.memory_space<vmem>>
      %47 = tpu.memref_squeeze %46 : memref<1x8x16x128xf32, #tpu.memory_space<vmem>> -> memref<8x16x128xf32, #tpu.memory_space<vmem>>
      %48 = tpu.memref_slice %arg9[%9] : memref<2x!tpu.dma_semaphore, #tpu.memory_space<semaphore_mem>> -> memref<1x!tpu.dma_semaphore, #tpu.memory_space<semaphore_mem>>
      %49 = tpu.memref_squeeze %48 : memref<1x!tpu.dma_semaphore, #tpu.memory_space<semaphore_mem>> -> memref<!tpu.dma_semaphore, #tpu.memory_space<semaphore_mem>>
      tpu.wait_dma2 semaphore(%49 : memref<!tpu.dma_semaphore, #tpu.memory_space<semaphore_mem>>) src(%45 : memref<8x16x128xf32, #tpu.memory_space<any>>) dst(%47 : memref<8x16x128xf32, #tpu.memory_space<vmem>>)
    } else {
    }
    %c0_i32_8 = arith.constant 0 : i32
    %18 = arith.cmpi eq, %arg2, %c0_i32_8 : i32
    %c1_i32_9 = arith.constant 1 : i32
    %19 = arith.addi %arg1, %c1_i32_9 : i32
    %c2_i32_10 = arith.constant 2 : i32
    %20 = arith.cmpi slt, %19, %c2_i32_10 : i32
    %21 = arith.andi %18, %20 : i1
    %22 = arith.extui %21 : i1 to i32
    %c0_i32_11 = arith.constant 0 : i32
    %23 = arith.cmpi ne, %22, %c0_i32_11 : i32
    scf.if %23 {
      %c1_i32_29 = arith.constant 1 : i32
      %42 = arith.addi %arg1, %c1_i32_29 : i32
      %c1_i32_30 = arith.constant 1 : i32
      %43 = arith.subi %c1_i32_30, %9 : i32
      %c16_i32 = arith.constant 16 : i32
      %44 = arith.muli %arg0, %c16_i32 : i32
      %c8_i32 = arith.constant 8 : i32
      %45 = arith.muli %42, %c8_i32 : i32
      %46 = arith.addi %44, %45 : i32
      %c0_i32_31 = arith.constant 0 : i32
      %c0_i32_32 = arith.constant 0 : i32
      %47 = tpu.memref_slice %arg3[%46, %c0_i32_31, %c0_i32_32] : memref<32x16x128xf32, #tpu.memory_space<any>> -> memref<8x16x128xf32, #tpu.memory_space<any>>
      %c0_i32_33 = arith.constant 0 : i32
      %c0_i32_34 = arith.constant 0 : i32
      %c0_i32_35 = arith.constant 0 : i32
      %48 = tpu.memref_slice %arg8[%43, %c0_i32_33, %c0_i32_34, %c0_i32_35] : memref<2x8x16x128xf32, #tpu.memory_space<vmem>> -> memref<1x8x16x128xf32, #tpu.memory_space<vmem>>
      %49 = tpu.memref_squeeze %48 : memref<1x8x16x128xf32, #tpu.memory_space<vmem>> -> memref<8x16x128xf32, #tpu.memory_space<vmem>>
      %50 = tpu.memref_slice %arg9[%43] : memref<2x!tpu.dma_semaphore, #tpu.memory_space<semaphore_mem>> -> memref<1x!tpu.dma_semaphore, #tpu.memory_space<semaphore_mem>>
      %51 = tpu.memref_squeeze %50 : memref<1x!tpu.dma_semaphore, #tpu.memory_space<semaphore_mem>> -> memref<!tpu.dma_semaphore, #tpu.memory_space<semaphore_mem>>
      tpu.enqueue_dma source(%47 : memref<8x16x128xf32, #tpu.memory_space<any>>) target(%49 : memref<8x16x128xf32, #tpu.memory_space<vmem>>) target_semaphore(%51 : memref<!tpu.dma_semaphore, #tpu.memory_space<semaphore_mem>>)
    } else {
    }
    %24 = arith.index_cast %9 : i32 to index
    %c0 = arith.constant 0 : index
    %c0_12 = arith.constant 0 : index
    %c0_13 = arith.constant 0 : index
    %25 = vector.load %arg8[%24, %c0, %c0_12, %c0_13] : memref<2x8x16x128xf32, #tpu.memory_space<vmem>>, vector<1x8x16x128xf32>
    %26 = vector.shape_cast %25 : vector<1x8x16x128xf32> to vector<8x16x128xf32>
    %cst = arith.constant 0.000000e+00 : f32
    %27 = vector.broadcast %cst : f32 to vector<8x16x128xf32>
    %28 = arith.maximumf %26, %27 : vector<8x16x128xf32>
    %29 = vector.shape_cast %28 : vector<8x16x128xf32> to vector<128x128xf32>
    %c0_14 = arith.constant 0 : index
    %c0_15 = arith.constant 0 : index
    %c0_16 = arith.constant 0 : index
    %30 = vector.load %arg4[%c0_14, %c0_15, %c0_16] : memref<1x128x128xf32, #tpu.memory_space<vmem>>, vector<1x128x128xf32>
    %31 = vector.shape_cast %30 : vector<1x128x128xf32> to vector<128x128xf32>
    %cst_17 = arith.constant dense<0.000000e+00> : vector<128x128xf32>
    %32 = tpu.matmul %29, %31, %cst_17 {dimension_numbers = #tpu.dot_dimension_numbers<[1], [0], [0], [1], [0, 0, 1, 1], [], []>} : vector<128x128xf32>, vector<128x128xf32>, vector<128x128xf32> -> vector<128x128xf32>
    %c0_18 = arith.constant 0 : index
    %c0_19 = arith.constant 0 : index
    %33 = vector.load %arg5[%c0_18, %c0_19] : memref<1x128xf32, #tpu.memory_space<vmem>>, vector<1x128xf32>
    %34 = vector.broadcast %33 : vector<1x128xf32> to vector<128x128xf32>
    %35 = arith.addf %32, %34 : vector<128x128xf32>
    %cst_20 = arith.constant 2.500000e-01 : f32
    %36 = vector.broadcast %cst_20 : f32 to vector<128x128xf32>
    %37 = arith.mulf %35, %36 : vector<128x128xf32>
    %38 = vector.shape_cast %37 : vector<128x128xf32> to vector<1x8x16x128xf32>
    %c0_21 = arith.constant 0 : index
    %c0_22 = arith.constant 0 : index
    %c0_23 = arith.constant 0 : index
    %c0_24 = arith.constant 0 : index
    %39 = vector.load %arg6[%c0_21, %c0_22, %c0_23, %c0_24] : memref<1x8x16x128xf32, #tpu.memory_space<vmem>>, vector<1x8x16x128xf32>
    %40 = arith.addf %38, %39 : vector<1x8x16x128xf32>
    %c0_25 = arith.constant 0 : index
    %c0_26 = arith.constant 0 : index
    %c0_27 = arith.constant 0 : index
    %c0_28 = arith.constant 0 : index
    %41 = vector.load %arg7[%c0_25, %c0_26, %c0_27, %c0_28] : memref<1x8x16x128xf32, #tpu.memory_space<vmem>>, vector<1x8x16x128xf32>
    tpu.vector_store %arg7[%c0_25, %c0_26, %c0_27, %c0_28], %40 {strides = array<i32>} : memref<1x8x16x128xf32, #tpu.memory_space<vmem>>, vector<1x8x16x128xf32>,
    return
  }
  func.func @transform_1(%arg0: i32, %arg1: i32, %arg2: i32) -> (i32, i32, i32) {
    %c0_i32 = arith.constant 0 : i32
    %c0_i32_0 = arith.constant 0 : i32
    %c0_i32_1 = arith.constant 0 : i32
    return %c0_i32, %c0_i32_0, %arg2 : i32, i32, i32
  }
  func.func @transform_2(%arg0: i32, %arg1: i32, %arg2: i32) -> (i32, i32) {
    %c0_i32 = arith.constant 0 : i32
    %c0_i32_0 = arith.constant 0 : i32
    return %c0_i32, %arg2 : i32, i32
  }
  func.func @transform_3(%arg0: i32, %arg1: i32, %arg2: i32) -> (i32, i32, i32, i32) {
    %c0_i32 = arith.constant 0 : i32
    %c0_i32_0 = arith.constant 0 : i32
    return %arg0, %arg1, %c0_i32, %arg2 : i32, i32, i32, i32
  }
  func.func @transform_4(%arg0: i32, %arg1: i32, %arg2: i32) -> (i32, i32, i32, i32) {
    %c0_i32 = arith.constant 0 : i32
    %c0_i32_0 = arith.constant 0 : i32
    return %arg0, %arg1, %c0_i32, %arg2 : i32, i32, i32, i32
  }
}

</mosaic_0001>

<bundles_post_ra>
// kernel: encoder_block_forward.5
= control target key start
LH: loop header
LB: loop body
LE: loop exit
PB: predicated region body
PF: predicated region fallthrough
CT: control target
= control target key end

     0   :  { %s1032_s12 = smov 0   ;;  %s1034_s13 = smov 0   ;;  %s1237_s0 = inlined_call_operand.vmem [shape: f32[32,16,128], index: 0, kind: input, shape index: {}]   ;;  %s1238_s1 = inlined_call_operand.vmem [shape: f32[1,128,128], index: 1, kind: input, shape index: {}]   ;;  %s1239_s2 = inlined_call_operand.vmem [shape: f32[1,128], index: 2, kind: input, shape index: {}]   ;;  %s1240_s3 = inlined_call_operand.vmem [shape: f32[2,16,16,128], index: 3, kind: output, shape index: {}]  }
   0x1   :  { %s1036_s14 = smov 0   ;;  %s1038_s15 = smov 0  }
   0x2   :  { %s1040_s16 = smov 0  }
   0x3 LB: > { %s28_s17 = sadd.s32 1, %s1002_s14  ;;  %s32_s18 = sadd.s32 1, %s1006_s15  ;;  %s1010_s16 = sphi %s1040_s16, %s13_s16   ;;  %s1006_s15 = sphi %s1038_s15, %s1244_s15   ;;  %s1002_s14 = sphi %s1036_s14, %s1243_s14   ;;  %s998_s13 = sphi %s1034_s13, %s1242_s13   ;;  %s994_s12 = sphi %s1032_s12, %s1241_s12  }
   0x4   : > { %p30_p0 = scmp.ge.s32.totalorder %s28_s17, 2  ;;  %p752_p1 = scmp.ge.s32.totalorder %s1010_s16, 1 }
   0x5   : > { %p143_p2 = scmp.lt.s32.totalorder %s1010_s16, 5 }
   0x6   : > { %s1246_s17 = smov (%p30_p0, %s28_s17), 0  ;;  %s1248_s18 = smov (!%p30_p0, %s32_s18), %s1006_s15 }
   0x7   : > { %p144_p3 = pnand %p752_p1, %p143_p2  ;;  %p34_p4 = scmp.ge.s32.totalorder %s1248_s18, 2 }
   0x8   : > { %s1067_s19 = sshll.u32 (!%p144_p3), %s994_s12, 3  ;;  %p183_p5 = scmp.lt.s32.totalorder (!%p144_p3), %s998_s13, 1 }
   0x9   : > { %s1250_s18 = smov (%p34_p4, %s1248_s18), 0  ;;  %147 = sbr.rel (%p144_p3) target bundleno = 317 (0x13d), region = 28 }
   0xa   : > { %p185_p6 = scmp.lt.s32.totalorder (!%p144_p3), %s1067_s19, 15  ;;  %p196_p7 = scmp.lt.s32.totalorder (!%p144_p3), %s994_s12, 0 }
   0xb   : > { %s197_s23 = ssub.s32 (!%p144_p3), 0, %s994_s12  ;;  %p208_p8 = scmp.eq.s32.totalorder (!%p144_p3), %s994_s12, 0 }
   0xc   : > { %s757_s25 = smin.u32 (!%p144_p3), %s994_s12, %s197_s23 }
   0xd   : > { %s199_s27 = sand.u32 (!%p144_p3), 1, %s757_s25  }
   0xe   : > { %s200_s29 = ssub.s32 (!%p144_p3), 0, %s199_s27 }
  0x10   : > { %s184_s20 = scalar_select %p183_p5, %s998_s13, 1 }
  0x11   : > { %s186_s21 = scalar_select %p185_p6, %s1067_s19, 15 }
  0x12   : > { %s755_s22 = sshll.u32 %s184_s20, 5  ;;  %s1252_s29 = smov (!%p196_p7, %s200_s29), %s199_s27 }
  0x13   : > { %s754_s24 = sshll.u32 %s186_s21, 1  ;;  %p759_p9 = scmp.lt.s32.totalorder %s1252_s29, 0 }
  0x14   : > { %s192_s26 = sadd.s32 %s755_s22, %s754_s24  ;;  %s206_s6 = sadd.s32 2, %s1252_s29 }
  0x15   : > { %s756_s28 = sshll.u32 %s192_s26, 3  ;;  %s1254_s6 = smov (!%p759_p9, %s206_s6), %s1252_s29 }
  0x16   : > { %s1079_s5 = scalar_lea.vmem %s1240_s3, %s756_s28  ;;  %213 = sbr.rel (!%p208_p8) target bundleno = 35 (0x23), region = 32 }
  0x17   : > { %s792_s7 = sshll.u32 (%p208_p8), %s998_s13, 8 }
  0x18   : > { %s1088_s10 = scalar_lea.vmem (%p208_p8), %s1237_s0, %s792_s7 }
  0x19   : > { %v249_v0 = vld [vmem:[%s1088_s10] sm:$0xff] (%p208_p8)  ;;  %v251_v1 = vld [vmem:[%s1088_s10 + $0x8] sm:$0xff] (%p208_p8)  ;;  %v253_v2 = vld [vmem:[%s1088_s10 + $0x10] sm:$0xff] (%p208_p8) }
  0x1a   : > { %250 = vst [vmem:[#allocation2] sm:$0xff] (%p208_p8), %v249_v0  ;;  %252 = vst [vmem:[#allocation2 + $0x8] sm:$0xff] (%p208_p8), %v251_v1  ;;  %v255_v3 = vld [vmem:[%s1088_s10 + $0x18] sm:$0xff] (%p208_p8)  ;;  %v257_v4 = vld [vmem:[%s1088_s10 + $0x20] sm:$0xff] (%p208_p8) }
  0x1b   : > { %254 = vst [vmem:[#allocation2 + $0x10] sm:$0xff] (%p208_p8), %v253_v2  ;;  %v259_v5 = vld [vmem:[%s1088_s10 + $0x28] sm:$0xff] (%p208_p8)  ;;  %256 = vst [vmem:[#allocation2 + $0x18] sm:$0xff] (%p208_p8), %v255_v3  ;;  %v261_v6 = vld [vmem:[%s1088_s10 + $0x30] sm:$0xff] (%p208_p8) }
  0x1c   : > { %258 = vst [vmem:[#allocation2 + $0x20] sm:$0xff] (%p208_p8), %v257_v4  ;;  %260 = vst [vmem:[#allocation2 + $0x28] sm:$0xff] (%p208_p8), %v259_v5  ;;  %v263_v7 = vld [vmem:[%s1088_s10 + $0x38] sm:$0xff] (%p208_p8)  ;;  %v265_v8 = vld [vmem:[%s1088_s10 + $0x40] sm:$0xff] (%p208_p8) }
  0x1d   : > { %262 = vst [vmem:[#allocation2 + $0x30] sm:$0xff] %v261_v6  ;;  %264 = vst [vmem:[#allocation2 + $0x38] sm:$0xff] %v263_v7  ;;  %v267_v9 = vld [vmem:[%s1088_s10 + $0x48] sm:$0xff]  ;;  %v269_v10 = vld [vmem:[%s1088_s10 + $0x50] sm:$0xff] }
  0x1e   : > { %266 = vst [vmem:[#allocation2 + $0x40] sm:$0xff] %v265_v8  ;;  %v271_v11 = vld [vmem:[%s1088_s10 + $0x58] sm:$0xff]  ;;  %268 = vst [vmem:[#allocation2 + $0x48] sm:$0xff] %v267_v9  ;;  %v273_v12 = vld [vmem:[%s1088_s10 + $0x60] sm:$0xff] }
  0x1f   : > { %270 = vst [vmem:[#allocation2 + $0x50] sm:$0xff] %v269_v10  ;;  %272 = vst [vmem:[#allocation2 + $0x58] sm:$0xff] %v271_v11  ;;  %v275_v13 = vld [vmem:[%s1088_s10 + $0x68] sm:$0xff]  ;;  %v277_v14 = vld [vmem:[%s1088_s10 + $0x70] sm:$0xff] }
  0x20   : > { %274 = vst [vmem:[#allocation2 + $0x60] sm:$0xff] %v273_v12  ;;  %276 = vst [vmem:[#allocation2 + $0x68] sm:$0xff] %v275_v13  ;;  %v279_v15 = vld [vmem:[%s1088_s10 + $0x78] sm:$0xff] }
  0x21   : > { %278 = vst [vmem:[#allocation2 + $0x70] sm:$0xff] %v277_v14  ;;  %280 = vst [vmem:[#allocation2 + $0x78] sm:$0xff] %v279_v15 }
  0x22   : > { %288 = vsyncadd [#allocation3], 2048 }
  0x23 PF: > { %s292_s11 = scalar_lea.sflag [#allocation3], %s1254_s6 }
  0x24   : > { %990 = dma.done.wait %s292_s11, 2048 }
  0x25   : > { %991 = vsyncadd %s292_s11, 4294965248  ;;  %s297_s20 = sadd.s32 1, %s994_s12 }
  0x26   : > { %p298_p10 = scmp.lt.s32.totalorder %s297_s20, 2 }
  0x27   : > { %s303_s21 = ssub.s32 (%p298_p10), 1, %s1254_s6  ;;  %s764_s22 = sshll.u32 (%p298_p10), %s998_s13, 4 }
  0x28   : > { %302 = sbr.rel (!%p298_p10) target bundleno = 53 (0x35), region = 74  ;;  %s663_s23 = sadd.s32 (%p298_p10), %s764_s22, %s1067_s19 }
  0x29   : > { %s767_s24 = sshll.u32 (%p298_p10), %s303_s21, 7  ;;  %s766_s25 = sshll.u32 (%p298_p10), %s663_s23, 4 }
  0x2a   : > { %s1116_s28 = scalar_lea.vmem (%p298_p10), %s1237_s0, %s766_s25  ;;  %s310_s12 = scalar_lea.vmem (%p298_p10), [#allocation2], %s767_s24 }
  0x2b   : > { %v768_v16 = vld [vmem:[%s1116_s28 + $0x80] sm:$0xff] (%p298_p10)  ;;  %v769_v17 = vld [vmem:[%s1116_s28 + $0x88] sm:$0xff] (%p298_p10)  ;;  %v770_v18 = vld [vmem:[%s1116_s28 + $0x90] sm:$0xff] (%p298_p10)  ;;  %s311_s13 = scalar_lea.sflag (%p298_p10), [#allocation3], %s303_s21 }
  0x2c   : > { %345 = vst [vmem:[%s310_s12] sm:$0xff] (%p298_p10), %v768_v16  ;;  %347 = vst [vmem:[%s310_s12 + $0x8] sm:$0xff] (%p298_p10), %v769_v17  ;;  %v771_v19 = vld [vmem:[%s1116_s28 + $0x98] sm:$0xff] (%p298_p10)  ;;  %v772_v20 = vld [vmem:[%s1116_s28 + $0xa0] sm:$0xff] (%p298_p10) }
  0x2d   : > { %349 = vst [vmem:[%s310_s12 + $0x10] sm:$0xff] (%p298_p10), %v770_v18  ;;  %v773_v21 = vld [vmem:[%s1116_s28 + $0xa8] sm:$0xff] (%p298_p10)  ;;  %351 = vst [vmem:[%s310_s12 + $0x18] sm:$0xff] (%p298_p10), %v771_v19  ;;  %v774_v22 = vld [vmem:[%s1116_s28 + $0xb0] sm:$0xff] (%p298_p10) }
  0x2e   : > { %353 = vst [vmem:[%s310_s12 + $0x20] sm:$0xff] (%p298_p10), %v772_v20  ;;  %355 = vst [vmem:[%s310_s12 + $0x28] sm:$0xff] (%p298_p10), %v773_v21  ;;  %v775_v23 = vld [vmem:[%s1116_s28 + $0xb8] sm:$0xff] (%p298_p10)  ;;  %v776_v24 = vld [vmem:[%s1116_s28 + $0xc0] sm:$0xff] (%p298_p10) }
  0x2f   : > { %357 = vst [vmem:[%s310_s12 + $0x30] sm:$0xff] %v774_v22  ;;  %359 = vst [vmem:[%s310_s12 + $0x38] sm:$0xff] %v775_v23  ;;  %v777_v25 = vld [vmem:[%s1116_s28 + $0xc8] sm:$0xff]  ;;  %v778_v26 = vld [vmem:[%s1116_s28 + $0xd0] sm:$0xff] }
  0x30   : > { %361 = vst [vmem:[%s310_s12 + $0x40] sm:$0xff] %v776_v24  ;;  %v779_v27 = vld [vmem:[%s1116_s28 + $0xd8] sm:$0xff]  ;;  %363 = vst [vmem:[%s310_s12 + $0x48] sm:$0xff] %v777_v25  ;;  %v780_v28 = vld [vmem:[%s1116_s28 + $0xe0] sm:$0xff] }
  0x31   : > { %365 = vst [vmem:[%s310_s12 + $0x50] sm:$0xff] %v778_v26  ;;  %367 = vst [vmem:[%s310_s12 + $0x58] sm:$0xff] %v779_v27  ;;  %v781_v29 = vld [vmem:[%s1116_s28 + $0xe8] sm:$0xff]  ;;  %v782_v30 = vld [vmem:[%s1116_s28 + $0xf0] sm:$0xff] }
  0x32   : > { %369 = vst [vmem:[%s310_s12 + $0x60] sm:$0xff] %v780_v28  ;;  %371 = vst [vmem:[%s310_s12 + $0x68] sm:$0xff] %v781_v29  ;;  %v783_v31 = vld [vmem:[%s1116_s28 + $0xf8] sm:$0xff] }
  0x33   : > { %373 = vst [vmem:[%s310_s12 + $0x70] sm:$0xff] %v782_v30  ;;  %375 = vst [vmem:[%s310_s12 + $0x78] sm:$0xff] %v783_v31 }
  0x34   : > { %383 = vsyncadd %s311_s13, 2048 }
  0x35 PF: > { %v402_v32 = vld [vmem:[%s1238_s1] sm:$0xff]  ;;  %v403_v33 = vld [vmem:[%s1238_s1 + $0x8] sm:$0xff]  ;;  %v404_v34 = vld [vmem:[%s1238_s1 + $0x10] sm:$0xff]  ;;  %s785_s9 = sshll.u32 %s1254_s6, 7 }
  0x36   : > { %v882_v35 = vpack.c.bf16 %v403_v33, %v402_v32  ;;  %v405_v36 = vld [vmem:[%s1238_s1 + $0x18] sm:$0xff]  ;;  %v406_v38 = vld [vmem:[%s1238_s1 + $0x20] sm:$0xff]  ;;  %v407_v39 = vld [vmem:[%s1238_s1 + $0x28] sm:$0xff]  ;;  %s1155_s6 = scalar_lea.vmem [#allocation2], %s785_s9 }
  0x37   : > { %v886_v37 = vpack.c.bf16 %v405_v36, %v404_v34  ;;  %v890_v40 = vpack.c.bf16 %v407_v39, %v406_v38  ;;  %v408_v43 = vld [vmem:[%s1238_s1 + $0x30] sm:$0xff]  ;;  %v409_v44 = vld [vmem:[%s1238_s1 + $0x38] sm:$0xff]  ;;  %v410_v46 = vld [vmem:[%s1238_s1 + $0x40] sm:$0xff] }
  0x38   : > { %883 = vmatprep.subr.bf16.mxu0 %v882_v35  ;;  %914 = vmatprep.subr.bf16.mxu1 %v882_v35  ;;  %v894_v45 = vpack.c.bf16 %v409_v44, %v408_v43  ;;  %v411_v47 = vld [vmem:[%s1238_s1 + $0x48] sm:$0xff]  ;;  %v412_v49 = vld [vmem:[%s1238_s1 + $0x50] sm:$0xff]  ;;  %v413_v50 = vld [vmem:[%s1238_s1 + $0x58] sm:$0xff] }
  0x39   : > { %885 = vmatpush3.bf16.msra.mxu0 %v882_v35  ;;  %922 = vmatpush3.bf16.msra.mxu1 %v882_v35  ;;  %v898_v48 = vpack.c.bf16 %v411_v47, %v410_v46  ;;  %v902_v51 = vpack.c.bf16 %v413_v50, %v412_v49  ;;  %v414_v52 = vld [vmem:[%s1238_s1 + $0x60] sm:$0xff]  ;;  %v415_v53 = vld [vmem:[%s1238_s1 + $0x68] sm:$0xff]  ;;  %v416_v55 = vld [vmem:[%s1238_s1 + $0x70] sm:$0xff] }
  0x3a   : > { %887 = vmatprep.subr.bf16.mxu0 %v886_v37  ;;  %915 = vmatprep.subr.bf16.mxu1 %v886_v37  ;;  %v906_v54 = vpack.c.bf16 %v415_v53, %v414_v52  ;;  %v417_v56 = vld [vmem:[%s1238_s1 + $0x78] sm:$0xff]  ;;  %v786_v8 = vld [vmem:[%s1239_s2] ss:$0 sm:$0xff] }
  0x3b   : > { %v910_v57 = vpack.c.bf16 %v417_v56, %v416_v55  ;;  %v389_v62 = vld [vmem:[%s1155_s6 + $0x18] sm:$0xff] }
  0x3c   : > { %v386_v41 = vld [vmem:[%s1155_s6] sm:$0xff]  ;;  %v387_v58 = vld [vmem:[%s1155_s6 + $0x8] sm:$0xff]  ;;  %v388_v60 = vld [vmem:[%s1155_s6 + $0x10] sm:$0xff] }
  0x3d   : > { %v394_v42 = vld [vmem:[%s1155_s6 + $0x40] sm:$0xff]  ;;  %858 = vmatprep.mubr.f32.mxu0 %v386_v41  ;;  %889 = vmatpush3.bf16.msra.mxu0 %v886_v37  ;;  %v395_v59 = vld [vmem:[%s1155_s6 + $0x48] sm:$0xff]  ;;  %v396_v61 = vld [vmem:[%s1155_s6 + $0x50] sm:$0xff] }
  0x3e   : > { %870 = vmatprep.mubr.f32.mxu1 %v394_v42  ;;  %923 = vmatpush3.bf16.msra.mxu1 %v886_v37  ;;  %v397_v63 = vld [vmem:[%s1155_s6 + $0x58] sm:$0xff]  ;;  %v390_v0 = vld [vmem:[%s1155_s6 + $0x20] sm:$0xff]  ;;  %v391_v2 = vld [vmem:[%s1155_s6 + $0x28] sm:$0xff] }
  0x3f   : > { %891 = vmatprep.subr.bf16.mxu0 %v890_v40  ;;  %916 = vmatprep.subr.bf16.mxu1 %v890_v40  ;;  %v398_v1 = vld [vmem:[%s1155_s6 + $0x60] sm:$0xff]  ;;  %v399_v3 = vld [vmem:[%s1155_s6 + $0x68] sm:$0xff]  ;;  %v392_v4 = vld [vmem:[%s1155_s6 + $0x30] sm:$0xff] }
  0x40   : > { %v400_v5 = vld [vmem:[%s1155_s6 + $0x70] sm:$0xff]  ;;  %v393_v6 = vld [vmem:[%s1155_s6 + $0x38] sm:$0xff] }
  0x41   : > { %893 = vmatpush3.bf16.msra.mxu0 %v890_v40  ;;  %v401_v7 = vld [vmem:[%s1155_s6 + $0x78] sm:$0xff] }
  0x42   : > { %924 = vmatpush3.bf16.msra.mxu1 %v890_v40  ;;  %895 = vmatprep.subr.bf16.mxu0 %v894_v45 }
  0x43   : > { %917 = vmatprep.subr.bf16.mxu1 %v894_v45 }
  0x45   : > { %897 = vmatpush3.bf16.msra.mxu0 %v894_v45 }
  0x46   : > { %925 = vmatpush3.bf16.msra.mxu1 %v894_v45  ;;  %899 = vmatprep.subr.bf16.mxu0 %v898_v48 }
  0x47   : > { %918 = vmatprep.subr.bf16.mxu1 %v898_v48 }
  0x49   : > { %901 = vmatpush3.bf16.msra.mxu0 %v898_v48 }
  0x4a   : > { %926 = vmatpush3.bf16.msra.mxu1 %v898_v48  ;;  %903 = vmatprep.subr.bf16.mxu0 %v902_v51 }
  0x4b   : > { %919 = vmatprep.subr.bf16.mxu1 %v902_v51 }
  0x4d   : > { %905 = vmatpush3.bf16.msra.mxu0 %v902_v51 }
  0x4e   : > { %927 = vmatpush3.bf16.msra.mxu1 %v902_v51  ;;  %907 = vmatprep.subr.bf16.mxu0 %v906_v54 }
  0x4f   : > { %920 = vmatprep.subr.bf16.mxu1 %v906_v54 }
  0x51   : > { %909 = vmatpush3.bf16.msra.mxu0 %v906_v54 }
  0x52   : > { %928 = vmatpush3.bf16.msra.mxu1 %v906_v54  ;;  %911 = vmatprep.subr.bf16.mxu0 %v910_v57 }
  0x53   : > { %921 = vmatprep.subr.bf16.mxu1 %v910_v57 }
  0x55   : > { %913 = vmatpush3.bf16.msra.mxu0 %v910_v57 }
  0x56   : > { %929 = vmatpush3.bf16.msra.mxu1 %v910_v57 }
  0x58   : > { %859 = vmatmul.mubr.f32.vlgmr.msra.gmra.mrb[0].mxu0 %v387_v58 }
  0x59   : > { %871 = vmatmul.mubr.f32.vlgmr.msra.gmra.mrb[0].mxu1 %v395_v59  ;;  %861 = vmatprep.mubr.f32.mxu0 %v388_v60 }
  0x5a   : > { %873 = vmatprep.mubr.f32.mxu1 %v396_v61 }
  0x5c   : > { %862 = vmatmul.mubr.f32.gmra.mrb[2].mxu0 %v389_v62 }
  0x5d   : > { %874 = vmatmul.mubr.f32.gmra.mrb[2].mxu1 %v397_v63  ;;  %864 = vmatprep.mubr.f32.mxu0 %v390_v0 }
  0x5e   : > { %876 = vmatprep.mubr.f32.mxu1 %v398_v1 }
  0x60   : > { %865 = vmatmul.mubr.f32.gmra.mrb[4].mxu0 %v391_v2 }
  0x61   : > { %877 = vmatmul.mubr.f32.gmra.mrb[4].mxu1 %v399_v3  ;;  %867 = vmatprep.mubr.f32.mxu0 %v392_v4 }
  0x62   : > { %879 = vmatprep.mubr.f32.mxu1 %v400_v5 }
  0x64   : > { %868 = vmatmul.mubr.f32.gmra.mrb[6].mxu0 %v393_v6 }
  0x65   : > { %880 = vmatmul.mubr.f32.gmra.mrb[6].mxu1 %v401_v7 }
 0x12b   : > { %v860_v9 = vpop.f32.mrb[0].mxu0 }
 0x12c   : > { %v872_v10 = vpop.f32.mrb[0].mxu1  ;;  %v497_v11 = vadd.f32 %v860_v9, %v786_v8  ;;  %v491_v13 = vpop.f32.mrb[1].mxu0 }
 0x12d   : > { %v537_v12 = vadd.f32 %v872_v10, %v786_v8  ;;  %v531_v14 = vpop.f32.mrb[1].mxu1  ;;  %v492_v15 = vadd.f32 %v786_v8, %v491_v13 }
 0x12e   : > { %v532_v16 = vadd.f32 %v786_v8, %v531_v14  ;;  %571 = vst [vmem:[%s1079_s5 + $0x8] sm:$0xff] %v497_v11 }
 0x12f   : > { %579 = vst [vmem:[%s1079_s5 + $0x48] sm:$0xff] %v537_v12  ;;  %570 = vst [vmem:[%s1079_s5] sm:$0xff] %v492_v15  ;;  %v863_v17 = vpop.f32.mrb[2].mxu0 }
 0x130   : > { %578 = vst [vmem:[%s1079_s5 + $0x40] sm:$0xff] %v532_v16  ;;  %v875_v18 = vpop.f32.mrb[2].mxu1  ;;  %v507_v19 = vadd.f32 %v863_v17, %v786_v8  ;;  %v501_v21 = vpop.f32.mrb[3].mxu0 }
 0x131   : > { %v547_v20 = vadd.f32 %v875_v18, %v786_v8  ;;  %v541_v22 = vpop.f32.mrb[3].mxu1  ;;  %v502_v23 = vadd.f32 %v786_v8, %v501_v21 }
 0x132   : > { %v542_v24 = vadd.f32 %v786_v8, %v541_v22  ;;  %573 = vst [vmem:[%s1079_s5 + $0x18] sm:$0xff] %v507_v19 }
 0x133   : > { %581 = vst [vmem:[%s1079_s5 + $0x58] sm:$0xff] %v547_v20  ;;  %572 = vst [vmem:[%s1079_s5 + $0x10] sm:$0xff] %v502_v23  ;;  %v866_v25 = vpop.f32.mrb[4].mxu0 }
 0x134   : > { %580 = vst [vmem:[%s1079_s5 + $0x50] sm:$0xff] %v542_v24  ;;  %v878_v26 = vpop.f32.mrb[4].mxu1  ;;  %v517_v27 = vadd.f32 %v866_v25, %v786_v8  ;;  %v511_v29 = vpop.f32.mrb[5].mxu0 }
 0x135   : > { %v557_v28 = vadd.f32 %v878_v26, %v786_v8  ;;  %v551_v30 = vpop.f32.mrb[5].mxu1  ;;  %v512_v31 = vadd.f32 %v786_v8, %v511_v29 }
 0x136   : > { %v552_v32 = vadd.f32 %v786_v8, %v551_v30  ;;  %575 = vst [vmem:[%s1079_s5 + $0x28] sm:$0xff] %v517_v27 }
 0x137   : > { %583 = vst [vmem:[%s1079_s5 + $0x68] sm:$0xff] %v557_v28  ;;  %574 = vst [vmem:[%s1079_s5 + $0x20] sm:$0xff] %v512_v31  ;;  %v869_v33 = vpop.f32.mrb[6].mxu0 }
 0x138   : > { %582 = vst [vmem:[%s1079_s5 + $0x60] sm:$0xff] %v552_v32  ;;  %v881_v34 = vpop.f32.mrb[6].mxu1  ;;  %v527_v35 = vadd.f32 %v869_v33, %v786_v8  ;;  %v521_v37 = vpop.f32.mrb[7].mxu0 }
 0x139   : > { %v567_v36 = vadd.f32 %v881_v34, %v786_v8  ;;  %v561_v38 = vpop.f32.mrb[7].mxu1  ;;  %v522_v39 = vadd.f32 %v786_v8, %v521_v37 }
 0x13a   : > { %v562_v40 = vadd.f32 %v786_v8, %v561_v38  ;;  %577 = vst [vmem:[%s1079_s5 + $0x38] sm:$0xff] %v527_v35 }
 0x13b   : > { %585 = vst [vmem:[%s1079_s5 + $0x78] sm:$0xff] %v567_v36  ;;  %576 = vst [vmem:[%s1079_s5 + $0x30] sm:$0xff] %v522_v39 }
 0x13c   : > { %584 = vst [vmem:[%s1079_s5 + $0x70] sm:$0xff] %v562_v40 }
 0x13d PF: > { %s13_s16 = sadd.s32 1, %s1010_s16   ;;  %s1241_s12 = smov %s1002_s14 }
 0x13e   : > { %p10_p11 = scmp.ge.s32.totalorder %s13_s16, 6   ;;  %s1242_s13 = smov %s1006_s15 }
 0x13f   : > { %s1243_s14 = smov %s1246_s17  ;;  %s1244_s15 = smov %s1250_s18 }
 0x140   :  { %12 = sbr.rel (!%p10_p11) target bundleno = 3 (0x3), region = 164 }
 0x147   :  { %624 = vsyncmov [#allocation3] }
 0x14a   :  { %s625_s5 = vpop.sfrf %624 }
 0x14b   :  { %p789_p12 = scmp.ne.s32.totalorder %s625_s5, 0 }
 0x14d   :  { %629 = shalt.err (%p789_p12)  }
 0x14e   :  { %631 = vsyncmov [#allocation3 + $0x1] }
 0x151   :  { %s632_s6 = vpop.sfrf %631 }
 0x152   :  { %p790_p13 = scmp.ne.s32.totalorder %s632_s6, 0 }
 0x154   :  { %636 = shalt.err (%p790_p13)  }

// kernel: encoder_block_forward.9
= control target key start
LH: loop header
LB: loop body
LE: loop exit
PB: predicated region body
PF: predicated region fallthrough
CT: control target
= control target key end

     0   :  { %s1207_s15 = smov 0   ;;  %s1209_s16 = smov 0   ;;  %s1451_s0 = inlined_call_operand.vmem [shape: f32[32,16,128], index: 0, kind: input, shape index: {}]   ;;  %s1452_s1 = inlined_call_operand.vmem [shape: f32[1,128,128], index: 1, kind: input, shape index: {}]   ;;  %s1453_s2 = inlined_call_operand.vmem [shape: f32[1,128], index: 2, kind: input, shape index: {}]   ;;  %s1454_s3 = inlined_call_operand.vmem [shape: f32[2,16,16,128], index: 3, kind: input, shape index: {}]   ;;  %s1455_s4 = inlined_call_operand.vmem [shape: f32[2,16,16,128], index: 4, kind: output, shape index: {}]  }
   0x1   :  { %s1211_s17 = smov 0   ;;  %s1213_s18 = smov 0  }
   0x2   :  { %s1215_s19 = smov 0  }
   0x3 LB: > { %s29_s20 = sadd.s32 1, %s1172_s17  ;;  %s33_s21 = sadd.s32 1, %s1176_s18  ;;  %s1180_s19 = sphi %s1215_s19, %s14_s19   ;;  %s1176_s18 = sphi %s1213_s18, %s1459_s18   ;;  %s1172_s17 = sphi %s1211_s17, %s1458_s17   ;;  %s1168_s16 = sphi %s1209_s16, %s1457_s16   ;;  %s1164_s15 = sphi %s1207_s15, %s1456_s15  }
   0x4   : > { %p31_p0 = scmp.ge.s32.totalorder %s29_s20, 2  ;;  %p918_p1 = scmp.ge.s32.totalorder %s1180_s19, 1 }
   0x5   : > { %p191_p2 = scmp.lt.s32.totalorder %s1180_s19, 5 }
   0x6   : > { %s1461_s20 = smov (%p31_p0, %s29_s20), 0  ;;  %s1463_s21 = smov (!%p31_p0, %s33_s21), %s1176_s18 }
   0x7   : > { %p192_p3 = pnand %p918_p1, %p191_p2  ;;  %p35_p4 = scmp.ge.s32.totalorder %s1463_s21, 2 }
   0x8   : > { %s1242_s22 = sshll.u32 (!%p192_p3), %s1164_s15, 3  ;;  %p246_p5 = scmp.lt.s32.totalorder (!%p192_p3), %s1168_s16, 1 }
   0x9   : > { %s1465_s21 = smov (%p35_p4, %s1463_s21), 0  ;;  %195 = sbr.rel (%p192_p3) target bundleno = 320 (0x140), region = 32 }
   0xa   : > { %p248_p6 = scmp.lt.s32.totalorder (!%p192_p3), %s1242_s22, 15  ;;  %p273_p7 = scmp.lt.s32.totalorder (!%p192_p3), %s1164_s15, 0 }
   0xb   : > { %s274_s26 = ssub.s32 (!%p192_p3), 0, %s1164_s15  ;;  %p285_p8 = scmp.eq.s32.totalorder (!%p192_p3), %s1164_s15, 0 }
   0xc   : > { %s927_s28 = smin.u32 (!%p192_p3), %s1164_s15, %s274_s26 }
   0xd   : > { %s276_s30 = sand.u32 (!%p192_p3), 1, %s927_s28  }
   0xe   : > { %s277_s6 = ssub.s32 (!%p192_p3), 0, %s276_s30 }
  0x10   : > { %s247_s23 = scalar_select %p246_p5, %s1168_s16, 1 }
  0x11   : > { %s249_s24 = scalar_select %p248_p6, %s1242_s22, 15 }
  0x12   : > { %s921_s25 = sshll.u32 %s247_s23, 5  ;;  %s1467_s6 = smov (!%p273_p7, %s277_s6), %s276_s30 }
  0x13   : > { %s920_s27 = sshll.u32 %s249_s24, 1  ;;  %p929_p9 = scmp.lt.s32.totalorder %s1467_s6, 0 }
  0x14   : > { %s255_s29 = sadd.s32 %s921_s25, %s920_s27  ;;  %s283_s13 = sadd.s32 2, %s1467_s6 }
  0x15   : > { %s922_s5 = sshll.u32 %s255_s29, 3  ;;  %s1469_s13 = smov (!%p929_p9, %s283_s13), %s1467_s6 }
  0x16   : > { %s1254_s9 = scalar_lea.vmem %s1454_s3, %s922_s5  ;;  %s1259_s12 = scalar_lea.vmem %s1455_s4, %s922_s5 }
  0x17   : > { %290 = sbr.rel (!%p285_p8) target bundleno = 35 (0x23), region = 36  ;;  %s962_s14 = sshll.u32 (%p285_p8), %s1168_s16, 8 }
  0x18   : > { %s1268_s25 = scalar_lea.vmem (%p285_p8), %s1451_s0, %s962_s14 }
  0x19   : > { %v326_v0 = vld [vmem:[%s1268_s25] sm:$0xff] (%p285_p8)  ;;  %v328_v1 = vld [vmem:[%s1268_s25 + $0x8] sm:$0xff] (%p285_p8)  ;;  %v330_v2 = vld [vmem:[%s1268_s25 + $0x10] sm:$0xff] (%p285_p8) }
  0x1a   : > { %327 = vst [vmem:[#allocation2] sm:$0xff] (%p285_p8), %v326_v0  ;;  %329 = vst [vmem:[#allocation2 + $0x8] sm:$0xff] (%p285_p8), %v328_v1  ;;  %v332_v3 = vld [vmem:[%s1268_s25 + $0x18] sm:$0xff] (%p285_p8)  ;;  %v334_v4 = vld [vmem:[%s1268_s25 + $0x20] sm:$0xff] (%p285_p8) }
  0x1b   : > { %331 = vst [vmem:[#allocation2 + $0x10] sm:$0xff] (%p285_p8), %v330_v2  ;;  %v336_v5 = vld [vmem:[%s1268_s25 + $0x28] sm:$0xff] (%p285_p8)  ;;  %333 = vst [vmem:[#allocation2 + $0x18] sm:$0xff] (%p285_p8), %v332_v3  ;;  %v338_v6 = vld [vmem:[%s1268_s25 + $0x30] sm:$0xff] (%p285_p8) }
  0x1c   : > { %335 = vst [vmem:[#allocation2 + $0x20] sm:$0xff] (%p285_p8), %v334_v4  ;;  %337 = vst [vmem:[#allocation2 + $0x28] sm:$0xff] (%p285_p8), %v336_v5  ;;  %v340_v7 = vld [vmem:[%s1268_s25 + $0x38] sm:$0xff] (%p285_p8)  ;;  %v342_v8 = vld [vmem:[%s1268_s25 + $0x40] sm:$0xff] (%p285_p8) }
  0x1d   : > { %339 = vst [vmem:[#allocation2 + $0x30] sm:$0xff] (%p285_p8), %v338_v6  ;;  %341 = vst [vmem:[#allocation2 + $0x38] sm:$0xff] (%p285_p8), %v340_v7  ;;  %v344_v9 = vld [vmem:[%s1268_s25 + $0x48] sm:$0xff] (%p285_p8)  ;;  %v346_v10 = vld [vmem:[%s1268_s25 + $0x50] sm:$0xff] (%p285_p8) }
  0x1e   : > { %343 = vst [vmem:[#allocation2 + $0x40] sm:$0xff] %v342_v8  ;;  %v348_v11 = vld [vmem:[%s1268_s25 + $0x58] sm:$0xff]  ;;  %345 = vst [vmem:[#allocation2 + $0x48] sm:$0xff] %v344_v9  ;;  %v350_v12 = vld [vmem:[%s1268_s25 + $0x60] sm:$0xff] }
  0x1f   : > { %347 = vst [vmem:[#allocation2 + $0x50] sm:$0xff] %v346_v10  ;;  %349 = vst [vmem:[#allocation2 + $0x58] sm:$0xff] %v348_v11  ;;  %v352_v13 = vld [vmem:[%s1268_s25 + $0x68] sm:$0xff]  ;;  %v354_v14 = vld [vmem:[%s1268_s25 + $0x70] sm:$0xff] }
  0x20   : > { %351 = vst [vmem:[#allocation2 + $0x60] sm:$0xff] %v350_v12  ;;  %353 = vst [vmem:[#allocation2 + $0x68] sm:$0xff] %v352_v13  ;;  %v356_v15 = vld [vmem:[%s1268_s25 + $0x78] sm:$0xff] }
  0x21   : > { %355 = vst [vmem:[#allocation2 + $0x70] sm:$0xff] %v354_v14  ;;  %357 = vst [vmem:[#allocation2 + $0x78] sm:$0xff] %v356_v15 }
  0x22   : > { %365 = vsyncadd [#allocation3], 2048 }
  0x23 PF: > { %s369_s26 = scalar_lea.sflag [#allocation3], %s1469_s13 }
  0x24   : > { %1160 = dma.done.wait %s369_s26, 2048 }
  0x25   : > { %1161 = vsyncadd %s369_s26, 4294965248  ;;  %s374_s27 = sadd.s32 1, %s1164_s15 }
  0x26   : > { %p375_p10 = scmp.lt.s32.totalorder %s374_s27, 2 }
  0x27   : > { %s380_s28 = ssub.s32 (%p375_p10), 1, %s1469_s13  ;;  %s934_s29 = sshll.u32 (%p375_p10), %s1168_s16, 4 }
  0x28   : > { %379 = sbr.rel (!%p375_p10) target bundleno = 53 (0x35), region = 78  ;;  %s822_s30 = sadd.s32 (%p375_p10), %s934_s29, %s1242_s22 }
  0x29   : > { %s937_s5 = sshll.u32 (%p375_p10), %s380_s28, 7  ;;  %s936_s6 = sshll.u32 (%p375_p10), %s822_s30, 4 }
  0x2a   : > { %s1296_s10 = scalar_lea.vmem (%p375_p10), %s1451_s0, %s936_s6  ;;  %s387_s15 = scalar_lea.vmem (%p375_p10), [#allocation2], %s937_s5 }
  0x2b   : > { %v938_v16 = vld [vmem:[%s1296_s10 + $0x80] sm:$0xff] (%p375_p10)  ;;  %v939_v17 = vld [vmem:[%s1296_s10 + $0x88] sm:$0xff] (%p375_p10)  ;;  %v940_v18 = vld [vmem:[%s1296_s10 + $0x90] sm:$0xff] (%p375_p10)  ;;  %s388_s16 = scalar_lea.sflag (%p375_p10), [#allocation3], %s380_s28 }
  0x2c   : > { %422 = vst [vmem:[%s387_s15] sm:$0xff] (%p375_p10), %v938_v16  ;;  %424 = vst [vmem:[%s387_s15 + $0x8] sm:$0xff] (%p375_p10), %v939_v17  ;;  %v941_v19 = vld [vmem:[%s1296_s10 + $0x98] sm:$0xff] (%p375_p10)  ;;  %v942_v20 = vld [vmem:[%s1296_s10 + $0xa0] sm:$0xff] (%p375_p10) }
  0x2d   : > { %426 = vst [vmem:[%s387_s15 + $0x10] sm:$0xff] (%p375_p10), %v940_v18  ;;  %v943_v21 = vld [vmem:[%s1296_s10 + $0xa8] sm:$0xff] (%p375_p10)  ;;  %428 = vst [vmem:[%s387_s15 + $0x18] sm:$0xff] (%p375_p10), %v941_v19  ;;  %v944_v22 = vld [vmem:[%s1296_s10 + $0xb0] sm:$0xff] (%p375_p10) }
  0x2e   : > { %430 = vst [vmem:[%s387_s15 + $0x20] sm:$0xff] (%p375_p10), %v942_v20  ;;  %432 = vst [vmem:[%s387_s15 + $0x28] sm:$0xff] (%p375_p10), %v943_v21  ;;  %v945_v23 = vld [vmem:[%s1296_s10 + $0xb8] sm:$0xff] (%p375_p10)  ;;  %v946_v24 = vld [vmem:[%s1296_s10 + $0xc0] sm:$0xff] (%p375_p10) }
  0x2f   : > { %434 = vst [vmem:[%s387_s15 + $0x30] sm:$0xff] %v944_v22  ;;  %436 = vst [vmem:[%s387_s15 + $0x38] sm:$0xff] %v945_v23  ;;  %v947_v25 = vld [vmem:[%s1296_s10 + $0xc8] sm:$0xff]  ;;  %v948_v26 = vld [vmem:[%s1296_s10 + $0xd0] sm:$0xff] }
  0x30   : > { %438 = vst [vmem:[%s387_s15 + $0x40] sm:$0xff] %v946_v24  ;;  %v949_v27 = vld [vmem:[%s1296_s10 + $0xd8] sm:$0xff]  ;;  %440 = vst [vmem:[%s387_s15 + $0x48] sm:$0xff] %v947_v25  ;;  %v950_v28 = vld [vmem:[%s1296_s10 + $0xe0] sm:$0xff] }
  0x31   : > { %442 = vst [vmem:[%s387_s15 + $0x50] sm:$0xff] %v948_v26  ;;  %444 = vst [vmem:[%s387_s15 + $0x58] sm:$0xff] %v949_v27  ;;  %v951_v29 = vld [vmem:[%s1296_s10 + $0xe8] sm:$0xff]  ;;  %v952_v30 = vld [vmem:[%s1296_s10 + $0xf0] sm:$0xff] }
  0x32   : > { %446 = vst [vmem:[%s387_s15 + $0x60] sm:$0xff] %v950_v28  ;;  %448 = vst [vmem:[%s387_s15 + $0x68] sm:$0xff] %v951_v29  ;;  %v953_v31 = vld [vmem:[%s1296_s10 + $0xf8] sm:$0xff] }
  0x33   : > { %450 = vst [vmem:[%s387_s15 + $0x70] sm:$0xff] %v952_v30  ;;  %452 = vst [vmem:[%s387_s15 + $0x78] sm:$0xff] %v953_v31 }
  0x34   : > { %460 = vsyncadd %s388_s16, 2048 }
  0x35 PF: > { %v495_v32 = vld [vmem:[%s1452_s1] sm:$0xff]  ;;  %v496_v33 = vld [vmem:[%s1452_s1 + $0x8] sm:$0xff]  ;;  %v497_v34 = vld [vmem:[%s1452_s1 + $0x10] sm:$0xff]  ;;  %s955_s26 = sshll.u32 %s1469_s13, 7 }
  0x36   : > { %v1052_v35 = vpack.c.bf16 %v496_v33, %v495_v32  ;;  %v498_v36 = vld [vmem:[%s1452_s1 + $0x18] sm:$0xff]  ;;  %v499_v38 = vld [vmem:[%s1452_s1 + $0x20] sm:$0xff]  ;;  %v500_v39 = vld [vmem:[%s1452_s1 + $0x28] sm:$0xff]  ;;  %s1335_s13 = scalar_lea.vmem [#allocation2], %s955_s26 }
  0x37   : > { %v1056_v37 = vpack.c.bf16 %v498_v36, %v497_v34  ;;  %v1060_v40 = vpack.c.bf16 %v500_v39, %v499_v38  ;;  %v501_v43 = vld [vmem:[%s1452_s1 + $0x30] sm:$0xff]  ;;  %v502_v44 = vld [vmem:[%s1452_s1 + $0x38] sm:$0xff]  ;;  %v503_v48 = vld [vmem:[%s1452_s1 + $0x40] sm:$0xff] }
  0x38   : > { %1053 = vmatprep.subr.bf16.mxu0 %v1052_v35  ;;  %1084 = vmatprep.subr.bf16.mxu1 %v1052_v35  ;;  %v1064_v47 = vpack.c.bf16 %v502_v44, %v501_v43  ;;  %v504_v49 = vld [vmem:[%s1452_s1 + $0x48] sm:$0xff]  ;;  %v505_v51 = vld [vmem:[%s1452_s1 + $0x50] sm:$0xff]  ;;  %v506_v52 = vld [vmem:[%s1452_s1 + $0x58] sm:$0xff] }
  0x39   : > { %1055 = vmatpush3.bf16.msra.mxu0 %v1052_v35  ;;  %1092 = vmatpush3.bf16.msra.mxu1 %v1052_v35  ;;  %v1068_v50 = vpack.c.bf16 %v504_v49, %v503_v48  ;;  %v1072_v53 = vpack.c.bf16 %v506_v52, %v505_v51  ;;  %v507_v54 = vld [vmem:[%s1452_s1 + $0x60] sm:$0xff]  ;;  %v508_v55 = vld [vmem:[%s1452_s1 + $0x68] sm:$0xff]  ;;  %v509_v57 = vld [vmem:[%s1452_s1 + $0x70] sm:$0xff] }
  0x3a   : > { %1057 = vmatprep.subr.bf16.mxu0 %v1056_v37  ;;  %1085 = vmatprep.subr.bf16.mxu1 %v1056_v37  ;;  %v1076_v56 = vpack.c.bf16 %v508_v55, %v507_v54  ;;  %v510_v58 = vld [vmem:[%s1452_s1 + $0x78] sm:$0xff]  ;;  %v1386_v24 = vld [vmem:[%s1453_s2] ss:$0 sm:$0xff]  ;;  %v680_v31 = vld [vmem:[%s1254_s9 + $0x8] sm:$0xff] }
  0x3b   : > { %v1080_v59 = vpack.c.bf16 %v510_v58, %v509_v57  ;;  %v466_v4 = vld [vmem:[%s1335_s13 + $0x18] sm:$0xff]  ;;  %v688_v32 = vld [vmem:[%s1254_s9 + $0x48] sm:$0xff]  ;;  %v687_v38 = vld [vmem:[%s1254_s9 + $0x40] sm:$0xff] }
  0x3c   : > { %v463_v41 = vld [vmem:[%s1335_s13] sm:$0xff]  ;;  %v464_v60 = vld [vmem:[%s1335_s13 + $0x8] sm:$0xff]  ;;  %v465_v62 = vld [vmem:[%s1335_s13 + $0x10] sm:$0xff]  ;;  %v482_v8 = vmax.f32 %v466_v4, 0.0 }
  0x3d   : > { %v471_v42 = vld [vmem:[%s1335_s13 + $0x40] sm:$0xff]  ;;  %v479_v45 = vmax.f32 %v463_v41, 0.0  ;;  %1059 = vmatpush3.bf16.msra.mxu0 %v1056_v37  ;;  %1093 = vmatpush3.bf16.msra.mxu1 %v1056_v37  ;;  %v472_v61 = vld [vmem:[%s1335_s13 + $0x48] sm:$0xff]  ;;  %v473_v63 = vld [vmem:[%s1335_s13 + $0x50] sm:$0xff]  ;;  %v480_v0 = vmax.f32 %v464_v60, 0.0  ;;  %v481_v2 = vmax.f32 %v465_v62, 0.0 }
  0x3e   : > { %v487_v46 = vmax.f32 %v471_v42, 0.0  ;;  %1061 = vmatprep.subr.bf16.mxu0 %v1060_v40  ;;  %1086 = vmatprep.subr.bf16.mxu1 %v1060_v40  ;;  %v488_v1 = vmax.f32 %v472_v61, 0.0  ;;  %v489_v3 = vmax.f32 %v473_v63, 0.0  ;;  %v474_v5 = vld [vmem:[%s1335_s13 + $0x58] sm:$0xff]  ;;  %v467_v6 = vld [vmem:[%s1335_s13 + $0x20] sm:$0xff]  ;;  %v468_v12 = vld [vmem:[%s1335_s13 + $0x28] sm:$0xff] }
  0x3f   : > { %1028 = vmatprep.mubr.f32.mxu0 %v479_v45  ;;  %v475_v7 = vld [vmem:[%s1335_s13 + $0x60] sm:$0xff]  ;;  %v490_v9 = vmax.f32 %v474_v5, 0.0  ;;  %v483_v10 = vmax.f32 %v467_v6, 0.0  ;;  %v476_v13 = vld [vmem:[%s1335_s13 + $0x68] sm:$0xff]  ;;  %v469_v14 = vld [vmem:[%s1335_s13 + $0x30] sm:$0xff]  ;;  %v484_v16 = vmax.f32 %v468_v12, 0.0 }
  0x40   : > { %1040 = vmatprep.mubr.f32.mxu1 %v487_v46  ;;  %v491_v11 = vmax.f32 %v475_v7, 0.0  ;;  %v477_v15 = vld [vmem:[%s1335_s13 + $0x70] sm:$0xff]  ;;  %v492_v17 = vmax.f32 %v476_v13, 0.0  ;;  %v485_v18 = vmax.f32 %v469_v14, 0.0  ;;  %v470_v20 = vld [vmem:[%s1335_s13 + $0x38] sm:$0xff]  ;;  %v679_v37 = vld [vmem:[%s1254_s9] sm:$0xff] }
  0x41   : > { %1063 = vmatpush3.bf16.msra.mxu0 %v1060_v40  ;;  %1094 = vmatpush3.bf16.msra.mxu1 %v1060_v40  ;;  %v493_v19 = vmax.f32 %v477_v15, 0.0  ;;  %v478_v21 = vld [vmem:[%s1335_s13 + $0x78] sm:$0xff]  ;;  %v486_v22 = vmax.f32 %v470_v20, 0.0  ;;  %v681_v57 = vld [vmem:[%s1254_s9 + $0x10] sm:$0xff]  ;;  %v684_v7 = vld [vmem:[%s1254_s9 + $0x28] sm:$0xff] }
  0x42   : > { %1065 = vmatprep.subr.bf16.mxu0 %v1064_v47  ;;  %1087 = vmatprep.subr.bf16.mxu1 %v1064_v47  ;;  %v494_v23 = vmax.f32 %v478_v21, 0.0  ;;  %v682_v51 = vld [vmem:[%s1254_s9 + $0x18] sm:$0xff]  ;;  %v689_v58 = vld [vmem:[%s1254_s9 + $0x50] sm:$0xff]  ;;  %v683_v13 = vld [vmem:[%s1254_s9 + $0x20] sm:$0xff] }
  0x43   : > { %v690_v52 = vld [vmem:[%s1254_s9 + $0x58] sm:$0xff]  ;;  %v691_v14 = vld [vmem:[%s1254_s9 + $0x60] sm:$0xff] }
  0x45   : > { %1067 = vmatpush3.bf16.msra.mxu0 %v1064_v47  ;;  %1095 = vmatpush3.bf16.msra.mxu1 %v1064_v47 }
  0x46   : > { %1069 = vmatprep.subr.bf16.mxu0 %v1068_v50  ;;  %1088 = vmatprep.subr.bf16.mxu1 %v1068_v50 }
  0x49   : > { %1071 = vmatpush3.bf16.msra.mxu0 %v1068_v50  ;;  %1096 = vmatpush3.bf16.msra.mxu1 %v1068_v50 }
  0x4a   : > { %1073 = vmatprep.subr.bf16.mxu0 %v1072_v53  ;;  %1089 = vmatprep.subr.bf16.mxu1 %v1072_v53 }
  0x4d   : > { %1075 = vmatpush3.bf16.msra.mxu0 %v1072_v53  ;;  %1097 = vmatpush3.bf16.msra.mxu1 %v1072_v53 }
  0x4e   : > { %1077 = vmatprep.subr.bf16.mxu0 %v1076_v56  ;;  %1090 = vmatprep.subr.bf16.mxu1 %v1076_v56 }
  0x51   : > { %1079 = vmatpush3.bf16.msra.mxu0 %v1076_v56  ;;  %1098 = vmatpush3.bf16.msra.mxu1 %v1076_v56 }
  0x52   : > { %1081 = vmatprep.subr.bf16.mxu0 %v1080_v59  ;;  %1091 = vmatprep.subr.bf16.mxu1 %v1080_v59 }
  0x55   : > { %1083 = vmatpush3.bf16.msra.mxu0 %v1080_v59  ;;  %1099 = vmatpush3.bf16.msra.mxu1 %v1080_v59 }
  0x58   : > { %1029 = vmatmul.mubr.f32.vlgmr.msra.gmra.mrb[0].mxu0 %v480_v0  ;;  %1041 = vmatmul.mubr.f32.vlgmr.msra.gmra.mrb[0].mxu1 %v488_v1 }
  0x59   : > { %1031 = vmatprep.mubr.f32.mxu0 %v481_v2  ;;  %1043 = vmatprep.mubr.f32.mxu1 %v489_v3 }
  0x5c   : > { %1032 = vmatmul.mubr.f32.gmra.mrb[2].mxu0 %v482_v8  ;;  %1044 = vmatmul.mubr.f32.gmra.mrb[2].mxu1 %v490_v9  ;;  %v692_v8 = vld [vmem:[%s1254_s9 + $0x68] sm:$0xff] }
  0x5d   : > { %1034 = vmatprep.mubr.f32.mxu0 %v483_v10  ;;  %1046 = vmatprep.mubr.f32.mxu1 %v491_v11 }
  0x60   : > { %1035 = vmatmul.mubr.f32.gmra.mrb[4].mxu0 %v484_v16  ;;  %1047 = vmatmul.mubr.f32.gmra.mrb[4].mxu1 %v492_v17 }
  0x61   : > { %1037 = vmatprep.mubr.f32.mxu0 %v485_v18  ;;  %1049 = vmatprep.mubr.f32.mxu1 %v493_v19 }
  0x64   : > { %1038 = vmatmul.mubr.f32.gmra.mrb[6].mxu0 %v486_v22  ;;  %1050 = vmatmul.mubr.f32.gmra.mrb[6].mxu1 %v494_v23 }
 0x12b   : > { %v1030_v25 = vpop.f32.mrb[0].mxu0  ;;  %v1042_v26 = vpop.f32.mrb[0].mxu1 }
 0x12c   : > { %v590_v27 = vadd.f32 %v1030_v25, %v1386_v24  ;;  %v630_v28 = vadd.f32 %v1042_v26, %v1386_v24  ;;  %v584_v29 = vpop.f32.mrb[1].mxu0  ;;  %v624_v30 = vpop.f32.mrb[1].mxu1 }
 0x12d   : > { %v585_v33 = vadd.f32 %v1386_v24, %v584_v29  ;;  %v625_v34 = vadd.f32 %v1386_v24, %v624_v30  ;;  %v694_v29 = vld [vmem:[%s1254_s9 + $0x78] sm:$0xff] }
 0x12e   : > { %v664_v35 = vmul.f32 0.25, %v590_v27  ;;  %v672_v36 = vmul.f32 0.25, %v630_v28  ;;  %v686_v28 = vld [vmem:[%s1254_s9 + $0x38] sm:$0xff] }
 0x12f   : > { %v663_v39 = vmul.f32 0.25, %v585_v33  ;;  %v671_v40 = vmul.f32 0.25, %v625_v34  ;;  %v1033_v41 = vpop.f32.mrb[2].mxu0  ;;  %v1045_v42 = vpop.f32.mrb[2].mxu1  ;;  %v685_v34 = vld [vmem:[%s1254_s9 + $0x30] sm:$0xff] }
 0x130   : > { %v696_v43 = vadd.f32 %v680_v31, %v664_v35  ;;  %v704_v44 = vadd.f32 %v688_v32, %v672_v36  ;;  %v600_v45 = vadd.f32 %v1033_v41, %v1386_v24  ;;  %v640_v46 = vadd.f32 %v1045_v42, %v1386_v24  ;;  %v594_v47 = vpop.f32.mrb[3].mxu0  ;;  %v634_v48 = vpop.f32.mrb[3].mxu1  ;;  %v693_v35 = vld [vmem:[%s1254_s9 + $0x70] sm:$0xff] }
 0x131   : > { %v695_v49 = vadd.f32 %v679_v37, %v663_v39  ;;  %v703_v50 = vadd.f32 %v687_v38, %v671_v40  ;;  %v595_v53 = vadd.f32 %v1386_v24, %v594_v47  ;;  %v635_v54 = vadd.f32 %v1386_v24, %v634_v48 }
 0x132   : > { %712 = vst [vmem:[%s1259_s12 + $0x8] sm:$0xff] %v696_v43  ;;  %720 = vst [vmem:[%s1259_s12 + $0x48] sm:$0xff] %v704_v44  ;;  %v666_v55 = vmul.f32 0.25, %v600_v45  ;;  %v674_v56 = vmul.f32 0.25, %v640_v46 }
 0x133   : > { %711 = vst [vmem:[%s1259_s12] sm:$0xff] %v695_v49  ;;  %719 = vst [vmem:[%s1259_s12 + $0x40] sm:$0xff] %v703_v50  ;;  %v665_v59 = vmul.f32 0.25, %v595_v53  ;;  %v673_v60 = vmul.f32 0.25, %v635_v54  ;;  %v1036_v61 = vpop.f32.mrb[4].mxu0  ;;  %v1048_v62 = vpop.f32.mrb[4].mxu1 }
 0x134   : > { %v698_v63 = vadd.f32 %v682_v51, %v666_v55  ;;  %v706_v0 = vadd.f32 %v690_v52, %v674_v56  ;;  %v610_v1 = vadd.f32 %v1036_v61, %v1386_v24  ;;  %v650_v2 = vadd.f32 %v1048_v62, %v1386_v24  ;;  %v604_v3 = vpop.f32.mrb[5].mxu0  ;;  %v644_v4 = vpop.f32.mrb[5].mxu1 }
 0x135   : > { %v697_v5 = vadd.f32 %v681_v57, %v665_v59  ;;  %v705_v6 = vadd.f32 %v689_v58, %v673_v60  ;;  %v605_v9 = vadd.f32 %v1386_v24, %v604_v3  ;;  %v645_v10 = vadd.f32 %v1386_v24, %v644_v4 }
 0x136   : > { %714 = vst [vmem:[%s1259_s12 + $0x18] sm:$0xff] %v698_v63  ;;  %722 = vst [vmem:[%s1259_s12 + $0x58] sm:$0xff] %v706_v0  ;;  %v668_v11 = vmul.f32 0.25, %v610_v1  ;;  %v676_v12 = vmul.f32 0.25, %v650_v2 }
 0x137   : > { %713 = vst [vmem:[%s1259_s12 + $0x10] sm:$0xff] %v697_v5  ;;  %721 = vst [vmem:[%s1259_s12 + $0x50] sm:$0xff] %v705_v6  ;;  %v667_v15 = vmul.f32 0.25, %v605_v9  ;;  %v675_v16 = vmul.f32 0.25, %v645_v10  ;;  %v1039_v17 = vpop.f32.mrb[6].mxu0  ;;  %v1051_v18 = vpop.f32.mrb[6].mxu1 }
 0x138   : > { %v700_v19 = vadd.f32 %v684_v7, %v668_v11  ;;  %v708_v20 = vadd.f32 %v692_v8, %v676_v12  ;;  %v620_v21 = vadd.f32 %v1039_v17, %v1386_v24  ;;  %v660_v22 = vadd.f32 %v1051_v18, %v1386_v24  ;;  %v614_v23 = vpop.f32.mrb[7].mxu0  ;;  %v654_v25 = vpop.f32.mrb[7].mxu1 }
 0x139   : > { %v699_v26 = vadd.f32 %v683_v13, %v667_v15  ;;  %v707_v27 = vadd.f32 %v691_v14, %v675_v16  ;;  %v615_v30 = vadd.f32 %v1386_v24, %v614_v23  ;;  %v655_v31 = vadd.f32 %v1386_v24, %v654_v25 }
 0x13a   : > { %716 = vst [vmem:[%s1259_s12 + $0x28] sm:$0xff] %v700_v19  ;;  %724 = vst [vmem:[%s1259_s12 + $0x68] sm:$0xff] %v708_v20  ;;  %v670_v32 = vmul.f32 0.25, %v620_v21  ;;  %v678_v33 = vmul.f32 0.25, %v660_v22 }
 0x13b   : > { %715 = vst [vmem:[%s1259_s12 + $0x20] sm:$0xff] %v699_v26  ;;  %723 = vst [vmem:[%s1259_s12 + $0x60] sm:$0xff] %v707_v27  ;;  %v669_v36 = vmul.f32 0.25, %v615_v30  ;;  %v677_v37 = vmul.f32 0.25, %v655_v31 }
 0x13c   : > { %v702_v38 = vadd.f32 %v686_v28, %v670_v32  ;;  %v710_v39 = vadd.f32 %v694_v29, %v678_v33 }
 0x13d   : > { %v701_v40 = vadd.f32 %v685_v34, %v669_v36  ;;  %v709_v41 = vadd.f32 %v693_v35, %v677_v37 }
 0x13e   : > { %718 = vst [vmem:[%s1259_s12 + $0x38] sm:$0xff] %v702_v38  ;;  %726 = vst [vmem:[%s1259_s12 + $0x78] sm:$0xff] %v710_v39 }
 0x13f   : > { %717 = vst [vmem:[%s1259_s12 + $0x30] sm:$0xff] %v701_v40  ;;  %725 = vst [vmem:[%s1259_s12 + $0x70] sm:$0xff] %v709_v41 }
 0x140 PF: > { %s14_s19 = sadd.s32 1, %s1180_s19   ;;  %s1456_s15 = smov %s1172_s17 }
 0x141   : > { %p11_p11 = scmp.ge.s32.totalorder %s14_s19, 6   ;;  %s1457_s16 = smov %s1176_s18 }
 0x142   : > { %s1458_s17 = smov %s1461_s20  ;;  %s1459_s18 = smov %s1465_s21 }
 0x143   :  { %13 = sbr.rel (!%p11_p11) target bundleno = 3 (0x3), region = 171 }
 0x14a   :  { %765 = vsyncmov [#allocation3] }
 0x14d   :  { %s766_s9 = vpop.sfrf %765 }
 0x14e   :  { %p959_p12 = scmp.ne.s32.totalorder %s766_s9, 0 }
 0x150   :  { %770 = shalt.err (%p959_p12)  }
 0x151   :  { %772 = vsyncmov [#allocation3 + $0x1] }
 0x154   :  { %s773_s12 = vpop.sfrf %772 }
 0x155   :  { %p960_p13 = scmp.ne.s32.totalorder %s773_s12, 0 }
 0x157   :  { %777 = shalt.err (%p960_p13)  }

// kernel: encoder_block_forward.6
= control target key start
LH: loop header
LB: loop body
LE: loop exit
PB: predicated region body
PF: predicated region fallthrough
CT: control target
= control target key end

     0   :  { %s3952_s12 = smov 0   ;;  %s3954_s13 = smov 0   ;;  %s5032_s0 = inlined_call_operand.vmem [shape: f32[36,24,128], index: 0, kind: input, shape index: {}]   ;;  %s5033_s1 = inlined_call_operand.vmem [shape: f32[9,128,128], index: 1, kind: input, shape index: {}]   ;;  %s5034_s2 = inlined_call_operand.vmem [shape: f32[1,128], index: 2, kind: input, shape index: {}]   ;;  %s5035_s3 = inlined_call_operand.vmem [shape: f32[2,16,16,128], index: 3, kind: output, shape index: {}]  }
   0x1   :  { %s3956_s14 = smov 0   ;;  %s3958_s15 = smov 0  }
   0x2   :  { %s3960_s16 = smov 0  }
   0x3 LB: > { %s28_s17 = sadd.s32 1, %s3922_s14  ;;  %s32_s18 = sadd.s32 1, %s3926_s15  ;;  %s3930_s16 = sphi %s3960_s16, %s13_s16   ;;  %s3926_s15 = sphi %s3958_s15, %s5066_s15   ;;  %s3922_s14 = sphi %s3956_s14, %s5065_s14   ;;  %s3918_s13 = sphi %s3954_s13, %s5064_s13   ;;  %s3914_s12 = sphi %s3952_s12, %s5063_s12  }
   0x4   : > { %p30_p0 = scmp.ge.s32.totalorder %s28_s17, 2  ;;  %p2448_p1 = scmp.ge.s32.totalorder %s3930_s16, 1 }
   0x5   : > { %p143_p2 = scmp.lt.s32.totalorder %s3930_s16, 5 }
   0x6   : > { %s5068_s17 = smov (%p30_p0, %s28_s17), 0  ;;  %s5070_s18 = smov (!%p30_p0, %s32_s18), %s3926_s15 }
   0x7   : > { %p144_p3 = pnand %p2448_p1, %p143_p2  ;;  %p34_p4 = scmp.ge.s32.totalorder %s5070_s18, 2 }
   0x9   : > { %s5072_s18 = smov (%p34_p4, %s5070_s18), 0  ;;  %147 = sbr.rel (%p144_p3) target bundleno = 466 (0x1d2), region = 28 }
  0x10   : > { %s3987_s19 = sshll.u32 %s3914_s12, 3  ;;  %p183_p5 = scmp.lt.s32.totalorder %s3918_s13, 1 }
  0x11   : > { %p185_p6 = scmp.lt.s32.totalorder %s3987_s19, 15  ;;  %p196_p7 = scmp.lt.s32.totalorder %s3914_s12, 0 }
  0x12   : > { %s184_s20 = scalar_select %p183_p5, %s3918_s13, 1 }
  0x13   : > { %s186_s21 = scalar_select %p185_p6, %s3987_s19, 15 }
  0x14   : > { %s2451_s22 = sshll.u32 %s184_s20, 5  ;;  %s197_s23 = ssub.s32 0, %s3914_s12 }
  0x15   : > { %s2450_s24 = sshll.u32 %s186_s21, 1  ;;  %s2453_s25 = smin.u32 %s3914_s12, %s197_s23 }
  0x16   : > { %s192_s26 = sadd.s32 %s2451_s22, %s2450_s24  ;;  %s199_s27 = sand.u32 1, %s2453_s25  }
  0x17   : > { %s2452_s28 = sshll.u32 %s192_s26, 3  ;;  %s200_s29 = ssub.s32 0, %s199_s27 }
  0x18   : > { %s3999_s5 = scalar_lea.vmem %s5035_s3, %s2452_s28  ;;  %p208_p8 = scmp.eq.s32.totalorder %s3914_s12, 0 }
  0x19   : > { %s5074_s29 = smov (!%p196_p7, %s200_s29), %s199_s27  ;;  %s2457_s7 = smul.u32 (%p208_p8), 432, %s3918_s13 }
  0x1a   : > { %p2455_p9 = scmp.lt.s32.totalorder %s5074_s29, 0  ;;  %s206_s6 = sadd.s32 2, %s5074_s29 }
  0x1b   : > { %213 = sbr.rel (!%p208_p8) target bundleno = 45 (0x2d), region = 32  ;;  %s4008_s10 = scalar_lea.vmem (%p208_p8), %s5032_s0, %s2457_s7 }
  0x1c   : > { %s5076_s6 = smov (!%p2455_p9, %s206_s6), %s5074_s29  ;;  %v249_v0 = vld [vmem:[%s4008_s10] sm:$0xff] (%p208_p8)  ;;  %v251_v1 = vld [vmem:[%s4008_s10 + $0x8] sm:$0xff] (%p208_p8)  ;;  %v253_v2 = vld [vmem:[%s4008_s10 + $0x10] sm:$0xff] (%p208_p8) }
  0x1d   : > { %250 = vst [vmem:[#allocation2] sm:$0xff] (%p208_p8), %v249_v0  ;;  %252 = vst [vmem:[#allocation2 + $0x8] sm:$0xff] (%p208_p8), %v251_v1  ;;  %v255_v3 = vld [vmem:[%s4008_s10 + $0x18] sm:$0xff] (%p208_p8)  ;;  %v257_v4 = vld [vmem:[%s4008_s10 + $0x20] sm:$0xff] (%p208_p8) }
  0x1e   : > { %254 = vst [vmem:[#allocation2 + $0x10] sm:$0xff] (%p208_p8), %v253_v2  ;;  %v259_v5 = vld [vmem:[%s4008_s10 + $0x28] sm:$0xff] (%p208_p8)  ;;  %256 = vst [vmem:[#allocation2 + $0x18] sm:$0xff] (%p208_p8), %v255_v3  ;;  %v261_v6 = vld [vmem:[%s4008_s10 + $0x30] sm:$0xff] (%p208_p8) }
  0x1f   : > { %258 = vst [vmem:[#allocation2 + $0x20] sm:$0xff] (%p208_p8), %v257_v4  ;;  %260 = vst [vmem:[#allocation2 + $0x28] sm:$0xff] (%p208_p8), %v259_v5  ;;  %v263_v7 = vld [vmem:[%s4008_s10 + $0x38] sm:$0xff] (%p208_p8)  ;;  %v265_v8 = vld [vmem:[%s4008_s10 + $0x40] sm:$0xff] (%p208_p8) }
  0x20   : > { %262 = vst [vmem:[#allocation2 + $0x30] sm:$0xff] (%p208_p8), %v261_v6  ;;  %264 = vst [vmem:[#allocation2 + $0x38] sm:$0xff] (%p208_p8), %v263_v7  ;;  %v267_v9 = vld [vmem:[%s4008_s10 + $0x48] sm:$0xff] (%p208_p8)  ;;  %v269_v10 = vld [vmem:[%s4008_s10 + $0x50] sm:$0xff] (%p208_p8) }
  0x21   : > { %266 = vst [vmem:[#allocation2 + $0x40] sm:$0xff] (%p208_p8), %v265_v8  ;;  %v271_v11 = vld [vmem:[%s4008_s10 + $0x58] sm:$0xff] (%p208_p8)  ;;  %268 = vst [vmem:[#allocation2 + $0x48] sm:$0xff] (%p208_p8), %v267_v9  ;;  %v273_v12 = vld [vmem:[%s4008_s10 + $0x60] sm:$0xff] (%p208_p8) }
  0x22   : > { %270 = vst [vmem:[#allocation2 + $0x50] sm:$0xff] %v269_v10  ;;  %272 = vst [vmem:[#allocation2 + $0x58] sm:$0xff] %v271_v11  ;;  %v275_v13 = vld [vmem:[%s4008_s10 + $0x68] sm:$0xff]  ;;  %v277_v14 = vld [vmem:[%s4008_s10 + $0x70] sm:$0xff] }
  0x23   : > { %274 = vst [vmem:[#allocation2 + $0x60] sm:$0xff] %v273_v12  ;;  %276 = vst [vmem:[#allocation2 + $0x68] sm:$0xff] %v275_v13  ;;  %v279_v15 = vld [vmem:[%s4008_s10 + $0x78] sm:$0xff]  ;;  %v281_v16 = vld [vmem:[%s4008_s10 + $0x80] sm:$0xff] }
  0x24   : > { %278 = vst [vmem:[#allocation2 + $0x70] sm:$0xff] %v277_v14  ;;  %v283_v17 = vld [vmem:[%s4008_s10 + $0x88] sm:$0xff]  ;;  %280 = vst [vmem:[#allocation2 + $0x78] sm:$0xff] %v279_v15  ;;  %v285_v18 = vld [vmem:[%s4008_s10 + $0x90] sm:$0xff] }
  0x25   : > { %282 = vst [vmem:[#allocation2 + $0x80] sm:$0xff] %v281_v16  ;;  %284 = vst [vmem:[#allocation2 + $0x88] sm:$0xff] %v283_v17  ;;  %v287_v19 = vld [vmem:[%s4008_s10 + $0x98] sm:$0xff]  ;;  %v289_v20 = vld [vmem:[%s4008_s10 + $0xa0] sm:$0xff] }
  0x26   : > { %286 = vst [vmem:[#allocation2 + $0x90] sm:$0xff] %v285_v18  ;;  %288 = vst [vmem:[#allocation2 + $0x98] sm:$0xff] %v287_v19  ;;  %v291_v21 = vld [vmem:[%s4008_s10 + $0xa8] sm:$0xff]  ;;  %v293_v22 = vld [vmem:[%s4008_s10 + $0xb0] sm:$0xff] }
  0x27   : > { %290 = vst [vmem:[#allocation2 + $0xa0] sm:$0xff] %v289_v20  ;;  %v295_v23 = vld [vmem:[%s4008_s10 + $0xb8] sm:$0xff]  ;;  %292 = vst [vmem:[#allocation2 + $0xa8] sm:$0xff] %v291_v21  ;;  %v297_v24 = vld [vmem:[%s4008_s10 + $0xc0] sm:$0xff] }
  0x28   : > { %294 = vst [vmem:[#allocation2 + $0xb0] sm:$0xff] %v293_v22  ;;  %296 = vst [vmem:[#allocation2 + $0xb8] sm:$0xff] %v295_v23  ;;  %v299_v25 = vld [vmem:[%s4008_s10 + $0xc8] sm:$0xff]  ;;  %v301_v26 = vld [vmem:[%s4008_s10 + $0xd0] sm:$0xff] }
  0x29   : > { %298 = vst [vmem:[#allocation2 + $0xc0] sm:$0xff] %v297_v24  ;;  %300 = vst [vmem:[#allocation2 + $0xc8] sm:$0xff] %v299_v25  ;;  %v303_v27 = vld [vmem:[%s4008_s10 + $0xd8] sm:$0xff]  ;;  %v305_v28 = vld [vmem:[%s4008_s10 + $0xe0] sm:$0xff] }
  0x2a   : > { %302 = vst [vmem:[#allocation2 + $0xd0] sm:$0xff] %v301_v26  ;;  %v307_v29 = vld [vmem:[%s4008_s10 + $0xe8] sm:$0xff]  ;;  %304 = vst [vmem:[#allocation2 + $0xd8] sm:$0xff] %v303_v27 }
  0x2b   : > { %306 = vst [vmem:[#allocation2 + $0xe0] sm:$0xff] %v305_v28  ;;  %308 = vst [vmem:[#allocation2 + $0xe8] sm:$0xff] %v307_v29 }
  0x2c   : > { %316 = vsyncadd [#allocation3], 3840 }
  0x2d PF: > { %s320_s11 = scalar_lea.sflag [#allocation3], %s5076_s6 }
  0x2e   : > { %3910 = dma.done.wait %s320_s11, 3840 }
  0x2f   : > { %3911 = vsyncadd %s320_s11, 4294963456  ;;  %s325_s20 = sadd.s32 1, %s3914_s12 }
  0x30   : > { %p326_p10 = scmp.lt.s32.totalorder %s325_s20, 2 }
  0x31   : > { %s331_s21 = ssub.s32 (%p326_p10), 1, %s5076_s6  ;;  %s2357_s22 = smul.u32 (%p326_p10), 18, %s3918_s13 }
  0x32   : > { %330 = sbr.rel (!%p326_p10) target bundleno = 72 (0x48), region = 74  ;;  %s339_s13 = scalar_lea.sflag (%p326_p10), [#allocation3], %s331_s21 }
  0x33   : > { %s337_s23 = smul.u32 (%p326_p10), 240, %s331_s21  ;;  %s2359_s24 = sadd.s32 (%p326_p10), %s3987_s19, %s2357_s22 }
  0x34   : > { %s2360_s25 = smul.u32 (%p326_p10), 24, %s2359_s24 }
  0x35   : > { %s4055_s12 = scalar_lea.vmem (%p326_p10), [#allocation2], %s337_s23 }
  0x36   : > { %s4050_s28 = scalar_lea.vmem (%p326_p10), %s5032_s0, %s2360_s25 }
  0x37   : > { %v2460_v30 = vld [vmem:[%s4050_s28 + $0xc0] sm:$0xff] (%p326_p10)  ;;  %v2461_v31 = vld [vmem:[%s4050_s28 + $0xc8] sm:$0xff] (%p326_p10)  ;;  %v2462_v32 = vld [vmem:[%s4050_s28 + $0xd0] sm:$0xff] (%p326_p10) }
  0x38   : > { %373 = vst [vmem:[%s4055_s12] sm:$0xff] (%p326_p10), %v2460_v30  ;;  %375 = vst [vmem:[%s4055_s12 + $0x8] sm:$0xff] (%p326_p10), %v2461_v31  ;;  %v2463_v33 = vld [vmem:[%s4050_s28 + $0xd8] sm:$0xff] (%p326_p10)  ;;  %v2464_v34 = vld [vmem:[%s4050_s28 + $0xe0] sm:$0xff] (%p326_p10) }
  0x39   : > { %377 = vst [vmem:[%s4055_s12 + $0x10] sm:$0xff] %v2462_v32  ;;  %v2465_v35 = vld [vmem:[%s4050_s28 + $0xe8] sm:$0xff]  ;;  %379 = vst [vmem:[%s4055_s12 + $0x18] sm:$0xff] %v2463_v33  ;;  %v2466_v36 = vld [vmem:[%s4050_s28 + $0xf0] sm:$0xff] }
  0x3a   : > { %381 = vst [vmem:[%s4055_s12 + $0x20] sm:$0xff] %v2464_v34  ;;  %383 = vst [vmem:[%s4055_s12 + $0x28] sm:$0xff] %v2465_v35  ;;  %v2467_v37 = vld [vmem:[%s4050_s28 + $0xf8] sm:$0xff]  ;;  %v2468_v38 = vld [vmem:[%s4050_s28 + $0x100] sm:$0xff] }
  0x3b   : > { %385 = vst [vmem:[%s4055_s12 + $0x30] sm:$0xff] %v2466_v36  ;;  %387 = vst [vmem:[%s4055_s12 + $0x38] sm:$0xff] %v2467_v37  ;;  %v2469_v39 = vld [vmem:[%s4050_s28 + $0x108] sm:$0xff]  ;;  %v2470_v40 = vld [vmem:[%s4050_s28 + $0x110] sm:$0xff] }
  0x3c   : > { %389 = vst [vmem:[%s4055_s12 + $0x40] sm:$0xff] %v2468_v38  ;;  %v2471_v41 = vld [vmem:[%s4050_s28 + $0x118] sm:$0xff]  ;;  %391 = vst [vmem:[%s4055_s12 + $0x48] sm:$0xff] %v2469_v39  ;;  %v2472_v42 = vld [vmem:[%s4050_s28 + $0x120] sm:$0xff] }
  0x3d   : > { %393 = vst [vmem:[%s4055_s12 + $0x50] sm:$0xff] %v2470_v40  ;;  %395 = vst [vmem:[%s4055_s12 + $0x58] sm:$0xff] %v2471_v41  ;;  %v2473_v43 = vld [vmem:[%s4050_s28 + $0x128] sm:$0xff]  ;;  %v2474_v44 = vld [vmem:[%s4050_s28 + $0x130] sm:$0xff] }
  0x3e   : > { %397 = vst [vmem:[%s4055_s12 + $0x60] sm:$0xff] %v2472_v42  ;;  %399 = vst [vmem:[%s4055_s12 + $0x68] sm:$0xff] %v2473_v43  ;;  %v2475_v45 = vld [vmem:[%s4050_s28 + $0x138] sm:$0xff]  ;;  %v2476_v46 = vld [vmem:[%s4050_s28 + $0x140] sm:$0xff] }
  0x3f   : > { %401 = vst [vmem:[%s4055_s12 + $0x70] sm:$0xff] %v2474_v44  ;;  %v2477_v47 = vld [vmem:[%s4050_s28 + $0x148] sm:$0xff]  ;;  %403 = vst [vmem:[%s4055_s12 + $0x78] sm:$0xff] %v2475_v45  ;;  %v2478_v48 = vld [vmem:[%s4050_s28 + $0x150] sm:$0xff] }
  0x40   : > { %405 = vst [vmem:[%s4055_s12 + $0x80] sm:$0xff] %v2476_v46  ;;  %407 = vst [vmem:[%s4055_s12 + $0x88] sm:$0xff] %v2477_v47  ;;  %v2479_v49 = vld [vmem:[%s4050_s28 + $0x158] sm:$0xff]  ;;  %v2480_v50 = vld [vmem:[%s4050_s28 + $0x160] sm:$0xff] }
  0x41   : > { %409 = vst [vmem:[%s4055_s12 + $0x90] sm:$0xff] %v2478_v48  ;;  %411 = vst [vmem:[%s4055_s12 + $0x98] sm:$0xff] %v2479_v49  ;;  %v2481_v51 = vld [vmem:[%s4050_s28 + $0x168] sm:$0xff]  ;;  %v2482_v52 = vld [vmem:[%s4050_s28 + $0x170] sm:$0xff] }
  0x42   : > { %413 = vst [vmem:[%s4055_s12 + $0xa0] sm:$0xff] %v2480_v50  ;;  %v2483_v53 = vld [vmem:[%s4050_s28 + $0x178] sm:$0xff]  ;;  %415 = vst [vmem:[%s4055_s12 + $0xa8] sm:$0xff] %v2481_v51  ;;  %v2484_v54 = vld [vmem:[%s4050_s28 + $0x180] sm:$0xff] }
  0x43   : > { %417 = vst [vmem:[%s4055_s12 + $0xb0] sm:$0xff] %v2482_v52  ;;  %419 = vst [vmem:[%s4055_s12 + $0xb8] sm:$0xff] %v2483_v53  ;;  %v2485_v55 = vld [vmem:[%s4050_s28 + $0x188] sm:$0xff]  ;;  %v2486_v56 = vld [vmem:[%s4050_s28 + $0x190] sm:$0xff] }
  0x44   : > { %421 = vst [vmem:[%s4055_s12 + $0xc0] sm:$0xff] %v2484_v54  ;;  %423 = vst [vmem:[%s4055_s12 + $0xc8] sm:$0xff] %v2485_v55  ;;  %v2487_v57 = vld [vmem:[%s4050_s28 + $0x198] sm:$0xff]  ;;  %v2488_v58 = vld [vmem:[%s4050_s28 + $0x1a0] sm:$0xff] }
  0x45   : > { %425 = vst [vmem:[%s4055_s12 + $0xd0] sm:$0xff] %v2486_v56  ;;  %v2489_v59 = vld [vmem:[%s4050_s28 + $0x1a8] sm:$0xff]  ;;  %427 = vst [vmem:[%s4055_s12 + $0xd8] sm:$0xff] %v2487_v57 }
  0x46   : > { %429 = vst [vmem:[%s4055_s12 + $0xe0] sm:$0xff] %v2488_v58  ;;  %431 = vst [vmem:[%s4055_s12 + $0xe8] sm:$0xff] %v2489_v59 }
  0x47   : > { %439 = vsyncadd %s339_s13, 3840 }
  0x48 PF: > { %v2491_v60 = vld [vmem:[%s5033_s1 + $0x80] sm:$0xff]  ;;  %v2492_v61 = vld [vmem:[%s5033_s1 + $0x88] sm:$0xff]  ;;  %v2493_v1 = vld [vmem:[%s5033_s1 + $0x90] sm:$0xff]  ;;  %s440_s7 = smul.u32 240, %s5076_s6  ;;  %vm542_vm0 = vcmask 1046528   ;;  %vm906_vm1 = vcmask 1045504  }
  0x49   : > { %v2539_v62 = vld [vmem:[%s5033_s1 + $0x200] sm:$0xff]  ;;  %v3418_v63 = vpack.c.bf16 %v2492_v61, %v2491_v60  ;;  %v2540_v0 = vld [vmem:[%s5033_s1 + $0x208] sm:$0xff]  ;;  %v2494_v2 = vld [vmem:[%s5033_s1 + $0x98] sm:$0xff] }
  0x4a   : > { %v3546_v3 = vpack.c.bf16 %v2540_v0, %v2539_v62  ;;  %v3422_v4 = vpack.c.bf16 %v2494_v2, %v2493_v1  ;;  %v2541_v5 = vld [vmem:[%s5033_s1 + $0x210] sm:$0xff]  ;;  %v2542_v6 = vld [vmem:[%s5033_s1 + $0x218] sm:$0xff]  ;;  %v2495_v7 = vld [vmem:[%s5033_s1 + $0xa0] sm:$0xff]  ;;  %s4177_s19 = scalar_lea.vmem [#allocation2], %s440_s7 }
  0x4b   : > { %3419 = vmatprep.subr.bf16.mxu1 %v3418_v63  ;;  %v3550_v8 = vpack.c.bf16 %v2542_v6, %v2541_v5  ;;  %v2496_v9 = vld [vmem:[%s5033_s1 + $0xa8] sm:$0xff]  ;;  %v2543_v10 = vld [vmem:[%s5033_s1 + $0x220] sm:$0xff]  ;;  %v2497_v14 = vld [vmem:[%s5033_s1 + $0xb0] sm:$0xff] }
  0x4c   : > { %v2544_v11 = vld [vmem:[%s5033_s1 + $0x228] sm:$0xff]  ;;  %3547 = vmatprep.subr.bf16.mxu0 %v3546_v3  ;;  %3421 = vmatpush3.bf16.msra.mxu1 %v3418_v63  ;;  %v3426_v12 = vpack.c.bf16 %v2496_v9, %v2495_v7  ;;  %v2498_v15 = vld [vmem:[%s5033_s1 + $0xb8] sm:$0xff]  ;;  %v2545_v16 = vld [vmem:[%s5033_s1 + $0x230] sm:$0xff] }
  0x4d   : > { %3549 = vmatpush3.bf16.msra.mxu0 %v3546_v3  ;;  %3423 = vmatprep.subr.bf16.mxu1 %v3422_v4  ;;  %v3554_v13 = vpack.c.bf16 %v2544_v11, %v2543_v10  ;;  %v2546_v17 = vld [vmem:[%s5033_s1 + $0x238] sm:$0xff]  ;;  %v3430_v18 = vpack.c.bf16 %v2498_v15, %v2497_v14  ;;  %v2499_v19 = vld [vmem:[%s5033_s1 + $0xc0] sm:$0xff]  ;;  %v2500_v20 = vld [vmem:[%s5033_s1 + $0xc8] sm:$0xff] }
  0x4e   : > { %3551 = vmatprep.subr.bf16.mxu0 %v3550_v8  ;;  %v3558_v21 = vpack.c.bf16 %v2546_v17, %v2545_v16  ;;  %v2547_v22 = vld [vmem:[%s5033_s1 + $0x240] sm:$0xff]  ;;  %v2548_v23 = vld [vmem:[%s5033_s1 + $0x248] sm:$0xff]  ;;  %v3434_v32 = vpack.c.bf16 %v2500_v20, %v2499_v19  ;;  %v2501_v35 = vld [vmem:[%s5033_s1 + $0xd0] sm:$0xff] }
  0x4f   : > { %v442_v24 = vld [vmem:[%s4177_s19] sm:$0xff]  ;;  %v443_v25 = vld [vmem:[%s4177_s19 + $0x8] sm:$0xff]  ;;  %v445_v27 = vld [vmem:[%s4177_s19 + $0x18] sm:$0xff]  ;;  %v3562_v34 = vpack.c.bf16 %v2548_v23, %v2547_v22 }
  0x50   : > { %3425 = vmatpush3.bf16.msra.mxu1 %v3422_v4  ;;  %v4181_v26 = vmax.f32 %v442_v24, 0.0  ;;  %v446_v28 = vld [vmem:[%s4177_s19 + $0x20] sm:$0xff]  ;;  %v4185_v29 = vmax.f32 %v443_v25, 0.0  ;;  %v4187_v30 = vmax.f32 %v445_v27, 0.0  ;;  %v2502_v36 = vld [vmem:[%s5033_s1 + $0xd8] sm:$0xff]  ;;  %v2504_v47 = vld [vmem:[%s5033_s1 + $0xe8] sm:$0xff] }
  0x51   : > { %3553 = vmatpush3.bf16.msra.mxu0 %v3550_v8  ;;  %3427 = vmatprep.subr.bf16.mxu1 %v3426_v12  ;;  %v4189_v31 = vmax.f32 %v446_v28, 0.0  ;;  %v2549_v40 = vld [vmem:[%s5033_s1 + $0x250] sm:$0xff]  ;;  %v2550_v41 = vld [vmem:[%s5033_s1 + $0x258] sm:$0xff]  ;;  %v3438_v44 = vpack.c.bf16 %v2502_v36, %v2501_v35  ;;  %v2503_v46 = vld [vmem:[%s5033_s1 + $0xe0] sm:$0xff] }
  0x52   : > { %3555 = vmatprep.subr.bf16.mxu0 %v3554_v13  ;;  %v543_v33 = vrot.slane %v4181_v26, 1  ;;  %v544_v37 = vrot.slane %v4185_v29, 1  ;;  %v548_v38 = vrot.slane %v4187_v30, 1  ;;  %v3566_v45 = vpack.c.bf16 %v2550_v41, %v2549_v40  ;;  %v2551_v48 = vld [vmem:[%s5033_s1 + $0x260] sm:$0xff]  ;;  %v2552_v49 = vld [vmem:[%s5033_s1 + $0x268] sm:$0xff]  ;;  %v2505_v53 = vld [vmem:[%s5033_s1 + $0xf0] sm:$0xff] }
  0x53   : > { %v549_v39 = vrot.slane %v4189_v31, 1  ;;  %v3442_v50 = vpack.c.bf16 %v2504_v47, %v2503_v46  ;;  %v4229_v51 = vld [vmem:[%s4177_s19 + $0x10] sm:$0xff]  ;;  %v3570_v52 = vpack.c.bf16 %v2552_v49, %v2551_v48  ;;  %v2506_v54 = vld [vmem:[%s5033_s1 + $0xf8] sm:$0xff]  ;;  %v503_v1 = vld [vmem:[%s5033_s1 + $0x8] sm:$0xff] }
  0x54   : > { %3429 = vmatpush3.bf16.msra.mxu1 %v3426_v12  ;;  %v545_v42 = vsel %vm542_vm0, %v543_v33, %v544_v37  ;;  %v4238_v55 = vld [vmem:[%s4177_s19 + $0x28] sm:$0xff]  ;;  %v2553_v56 = vld [vmem:[%s5033_s1 + $0x270] sm:$0xff]  ;;  %v474_v58 = vmax.f32 %v4229_v51, 0.0  ;;  %v449_v60 = vld [vmem:[%s4177_s19 + $0x38] sm:$0xff]  ;;  %v3446_v61 = vpack.c.bf16 %v2506_v54, %v2505_v53 }
  0x55   : > { %3557 = vmatpush3.bf16.msra.mxu0 %v3554_v13  ;;  %3431 = vmatprep.subr.bf16.mxu1 %v3430_v18  ;;  %v4213_v43 = vsel %vm542_vm0, %v548_v38, %v549_v39  ;;  %v2554_v57 = vld [vmem:[%s5033_s1 + $0x278] sm:$0xff]  ;;  %v448_v59 = vld [vmem:[%s4177_s19 + $0x30] sm:$0xff]  ;;  %v5042_v62 = vmax.f32 %v4238_v55, 0.0  ;;  %v4257_v2 = vld [vmem:[%s4177_s19 + $0x40] sm:$0xff]  ;;  %v4267_v6 = vmax.f32 %v449_v60, 0.0 }
  0x56   : > { %3559 = vmatprep.subr.bf16.mxu0 %v3558_v21  ;;  %2946 = vmatprep.mubr.f32.mxu1 %v545_v42  ;;  %v3574_v63 = vpack.c.bf16 %v2554_v57, %v2553_v56  ;;  %v502_v0 = vld [vmem:[%s5033_s1] sm:$0xff]  ;;  %v2556_v4 = vld [vmem:[%s5033_s1 + $0x288] sm:$0xff]  ;;  %v4265_v5 = vmax.f32 %v448_v59, 0.0  ;;  %v546_v7 = vrot.slane %v474_v58, 1  ;;  %v5041_v12 = vmax.f32 %v4257_v2, 0.0  ;;  %v504_v14 = vld [vmem:[%s5033_s1 + $0x10] sm:$0xff] }
  0x57   : > { %3170 = vmatprep.mubr.f32.mxu0 %v4213_v43  ;;  %v2555_v3 = vld [vmem:[%s5033_s1 + $0x280] sm:$0xff]  ;;  %v451_v8 = vld [vmem:[%s4177_s19 + $0x48] sm:$0xff]  ;;  %v3450_v10 = vpack.c.bf16 %v503_v1, %v502_v0  ;;  %v551_v11 = vrot.slane %v5042_v62, 1  ;;  %v4283_v16 = vld [vmem:[%s4177_s19 + $0x58] sm:$0xff] }
  0x58   : > { %3433 = vmatpush3.bf16.msra.mxu1 %v3430_v18  ;;  %v452_v9 = vld [vmem:[%s4177_s19 + $0x50] sm:$0xff]  ;;  %v3578_v13 = vpack.c.bf16 %v2556_v4, %v2555_v3  ;;  %v505_v15 = vld [vmem:[%s5033_s1 + $0x18] sm:$0xff]  ;;  %v553_v17 = vrot.slane %v4265_v5, 1  ;;  %v554_v18 = vrot.slane %v4267_v6, 1  ;;  %v4287_v19 = vmax.f32 %v451_v8, 0.0  ;;  %v507_v42 = vld [vmem:[%s5033_s1 + $0x28] sm:$0xff] }
  0x59   : > { %3561 = vmatpush3.bf16.msra.mxu0 %v3558_v21  ;;  %3435 = vmatprep.subr.bf16.mxu1 %v3434_v32  ;;  %v4289_v20 = vmax.f32 %v452_v9, 0.0  ;;  %v454_v21 = vld [vmem:[%s4177_s19 + $0x60] sm:$0xff]  ;;  %v455_v22 = vld [vmem:[%s4177_s19 + $0x68] sm:$0xff]  ;;  %v547_v23 = vsel %vm542_vm0, %v544_v37, %v546_v7  ;;  %v552_v27 = vsel %vm542_vm0, %v549_v39, %v551_v11  ;;  %v556_v28 = vrot.slane %v5041_v12, 1  ;;  %v4313_v36 = vld [vmem:[%s4177_s19 + $0x70] sm:$0xff] }
  0x5a   : > { %3563 = vmatprep.subr.bf16.mxu0 %v3562_v34  ;;  %v2557_v24 = vld [vmem:[%s5033_s1 + $0x290] sm:$0xff]  ;;  %v2558_v25 = vld [vmem:[%s5033_s1 + $0x298] sm:$0xff]  ;;  %v3454_v33 = vpack.c.bf16 %v505_v15, %v504_v14  ;;  %v4310_v35 = vmax.f32 %v455_v22, 0.0  ;;  %v4316_v37 = vsel %vm542_vm0, %v553_v17, %v554_v18  ;;  %v558_v39 = vrot.slane %v4287_v19, 1  ;;  %v506_v41 = vld [vmem:[%s5033_s1 + $0x20] sm:$0xff] }
  0x5b   : > { %v3582_v38 = vpack.c.bf16 %v2558_v25, %v2557_v24  ;;  %v559_v40 = vrot.slane %v4289_v20, 1  ;;  %v457_v46 = vld [vmem:[%s4177_s19 + $0x78] sm:$0xff]  ;;  %v458_v47 = vld [vmem:[%s4177_s19 + $0x80] sm:$0xff]  ;;  %v4336_v48 = vsel %vm542_vm0, %v554_v18, %v556_v28  ;;  %v4348_v56 = vld [vmem:[%s4177_s19 + $0x88] sm:$0xff] }
  0x5c   : > { %3437 = vmatpush3.bf16.msra.mxu1 %v3434_v32  ;;  %v5040_v32 = vmax.f32 %v4283_v16, 0.0  ;;  %v564_v54 = vrot.slane %v4310_v35, 1  ;;  %v509_v60 = vld [vmem:[%s5033_s1 + $0x38] sm:$0xff]  ;;  %v4362_v0 = vmax.f32 %v457_v46, 0.0  ;;  %v4364_v1 = vmax.f32 %v458_v47, 0.0  ;;  %v460_v3 = vld [vmem:[%s4177_s19 + $0x90] sm:$0xff] }
  0x5d   : > { %3565 = vmatpush3.bf16.msra.mxu0 %v3562_v34  ;;  %3439 = vmatprep.subr.bf16.mxu1 %v3438_v44  ;;  %v4308_v34 = vmax.f32 %v454_v21, 0.0  ;;  %v4351_v57 = vsel %vm542_vm0, %v558_v39, %v559_v40  ;;  %v461_v4 = vld [vmem:[%s4177_s19 + $0x98] sm:$0xff]  ;;  %v510_v9 = vld [vmem:[%s5033_s1 + $0x40] sm:$0xff]  ;;  %v5038_v11 = vmax.f32 %v4348_v56, 0.0  ;;  %v4398_v24 = vmax.f32 %v460_v3, 0.0  ;;  %v512_v39 = vld [vmem:[%s5033_s1 + $0x50] sm:$0xff] }
  0x5e   : > { %3567 = vmatprep.subr.bf16.mxu0 %v3566_v45  ;;  %v561_v49 = vrot.slane %v5040_v32, 1  ;;  %v2563_v17 = vld [vmem:[%s5033_s1 + $0x2c0] sm:$0xff]  ;;  %v2564_v18 = vld [vmem:[%s5033_s1 + $0x2c8] sm:$0xff]  ;;  %v568_v22 = vrot.slane %v4362_v0, 1  ;;  %v4400_v25 = vmax.f32 %v461_v4, 0.0  ;;  %v910_v4 = vrot.slane %v474_v58, 2 }
  0x5f   : > { %v563_v53 = vrot.slane %v4308_v34, 1  ;;  %v4393_v21 = vld [vmem:[%s4177_s19 + $0xa0] sm:$0xff]  ;;  %v464_v28 = vld [vmem:[%s4177_s19 + $0xb0] sm:$0xff]  ;;  %v467_v3 = vld [vmem:[%s4177_s19 + $0xc8] sm:$0xff] }
  0x60   : > { %3441 = vmatpush3.bf16.msra.mxu1 %v3438_v44  ;;  %v2559_v44 = vld [vmem:[%s5033_s1 + $0x2a0] sm:$0xff]  ;;  %v4371_v7 = vsel %vm542_vm0, %v559_v40, %v561_v49  ;;  %v513_v40 = vld [vmem:[%s5033_s1 + $0x58] sm:$0xff]  ;;  %v4422_v47 = vmax.f32 %v464_v28, 0.0 }
  0x61   : > { %3569 = vmatpush3.bf16.msra.mxu0 %v3566_v45  ;;  %3443 = vmatprep.subr.bf16.mxu1 %v3442_v50  ;;  %v2560_v45 = vld [vmem:[%s5033_s1 + $0x2a8] sm:$0xff] }
  0x62   : > { %3571 = vmatprep.subr.bf16.mxu0 %v3570_v52  ;;  %v3586_v59 = vpack.c.bf16 %v2560_v45, %v2559_v44  ;;  %v3594_v45 = vpack.c.bf16 %v2564_v18, %v2563_v17  ;;  %v4425_v49 = vld [vmem:[%s4177_s19 + $0xb8] sm:$0xff] }
  0x63   : > { %v515_v18 = vld [vmem:[%s5033_s1 + $0x68] sm:$0xff] }
  0x64   : > { %3445 = vmatpush3.bf16.msra.mxu1 %v3442_v50  ;;  %v5039_v50 = vmax.f32 %v4313_v36, 0.0 }
  0x65   : > { %3573 = vmatpush3.bf16.msra.mxu0 %v3570_v52  ;;  %3447 = vmatprep.subr.bf16.mxu1 %v3446_v61  ;;  %v3458_v52 = vpack.c.bf16 %v507_v42, %v506_v41  ;;  %v5037_v41 = vmax.f32 %v4393_v21, 0.0  ;;  %v907_v42 = vrot.slane %v4181_v26, 2 }
  0x66   : > { %3575 = vmatprep.subr.bf16.mxu0 %v3574_v63  ;;  %v566_v8 = vrot.slane %v5039_v50, 1  ;;  %v471_v50 = vld [vmem:[%s4177_s19 + $0xe8] sm:$0xff] }
  0x67   : > { %v501_v62 = vmax.f32 %v471_v50, 0.0  ;;  %v2571_v50 = vld [vmem:[%s5033_s1 + $0x300] sm:$0xff] }
  0x68   : > { %3449 = vmatpush3.bf16.msra.mxu1 %v3446_v61  ;;  %v2561_v61 = vld [vmem:[%s5033_s1 + $0x2b0] sm:$0xff] }
  0x69   : > { %3577 = vmatpush3.bf16.msra.mxu0 %v3574_v63  ;;  %3451 = vmatprep.subr.bf16.mxu1 %v3450_v10  ;;  %v2562_v63 = vld [vmem:[%s5033_s1 + $0x2b8] sm:$0xff] }
  0x6a   : > { %3579 = vmatprep.subr.bf16.mxu0 %v3578_v13  ;;  %v3590_v15 = vpack.c.bf16 %v2562_v63, %v2561_v61  ;;  %v3470_v61 = vpack.c.bf16 %v513_v40, %v512_v39  ;;  %v466_v63 = vld [vmem:[%s4177_s19 + $0xc0] sm:$0xff]  ;;  %v2568_v39 = vld [vmem:[%s5033_s1 + $0x2e8] sm:$0xff] }
  0x6b   : > { %2947 = vmatmul.mubr.f32.vlgmr.msra.gmra.mrb[0].mxu1 %v547_v23  ;;  %v569_v23 = vrot.slane %v4364_v1, 1  ;;  %v4481_v40 = vmax.f32 %v466_v63, 0.0 }
  0x6c   : > { %3171 = vmatmul.mubr.f32.vlgmr.msra.gmra.mrb[0].mxu0 %v552_v27  ;;  %3453 = vmatpush3.bf16.msra.mxu1 %v3450_v10  ;;  %v511_v10 = vld [vmem:[%s5033_s1 + $0x48] sm:$0xff] }
  0x6d   : > { %3581 = vmatpush3.bf16.msra.mxu0 %v3578_v13  ;;  %2949 = vmatprep.mubr.f32.mxu1 %v4213_v43  ;;  %v508_v43 = vld [vmem:[%s5033_s1 + $0x30] sm:$0xff]  ;;  %v4384_v13 = vsel %vm542_vm0, %v563_v53, %v564_v54  ;;  %v3466_v44 = vpack.c.bf16 %v511_v10, %v510_v9  ;;  %v573_v53 = vrot.slane %v4398_v24, 1  ;;  %v576_v9 = vrot.slane %v5037_v41, 1  ;;  %v514_v10 = vld [vmem:[%s5033_s1 + $0x60] sm:$0xff] }
  0x6e   : > { %3173 = vmatprep.mubr.f32.mxu0 %v4316_v37  ;;  %3455 = vmatprep.subr.bf16.mxu1 %v3454_v33  ;;  %v3462_v14 = vpack.c.bf16 %v509_v60, %v508_v43  ;;  %v2565_v43 = vld [vmem:[%s5033_s1 + $0x2d0] sm:$0xff]  ;;  %v908_v60 = vrot.slane %v4185_v29, 2 }
  0x6f   : > { %2950 = vmatmul.mubr.f32.gmra.mrb[2].mxu1 %v552_v27  ;;  %3583 = vmatprep.subr.bf16.mxu0 %v3582_v38  ;;  %v463_v27 = vld [vmem:[%s4177_s19 + $0xa8] sm:$0xff] }
  0x70   : > { %3174 = vmatmul.mubr.f32.gmra.mrb[2].mxu0 %v4336_v48  ;;  %3457 = vmatpush3.bf16.msra.mxu1 %v3454_v33  ;;  %v4407_v33 = vsel %vm542_vm0, %v564_v54, %v566_v8  ;;  %v4420_v46 = vmax.f32 %v463_v27, 0.0  ;;  %v574_v54 = vrot.slane %v4400_v25, 1  ;;  %v4456_v17 = vsel %vm906_vm1, %v907_v42, %v908_v60  ;;  %v469_v27 = vld [vmem:[%s4177_s19 + $0xd8] sm:$0xff] }
  0x71   : > { %3585 = vmatpush3.bf16.msra.mxu0 %v3582_v38  ;;  %2952 = vmatprep.mubr.f32.mxu1 %v4316_v37  ;;  %v571_v38 = vrot.slane %v5038_v11, 1  ;;  %v4483_v42 = vmax.f32 %v467_v3, 0.0 }
  0x72   : > { %3176 = vmatprep.mubr.f32.mxu0 %v4351_v57  ;;  %3459 = vmatprep.subr.bf16.mxu1 %v3458_v52  ;;  %v578_v58 = vrot.slane %v4420_v46, 1  ;;  %v4473_v28 = vsel %vm542_vm0, %v573_v53, %v574_v54 }
  0x73   : > { %2953 = vmatmul.mubr.f32.gmra.mrb[4].mxu1 %v4336_v48  ;;  %3587 = vmatprep.subr.bf16.mxu0 %v3586_v59  ;;  %v4447_v8 = vsel %vm542_vm0, %v569_v23, %v571_v38  ;;  %v2567_v38 = vld [vmem:[%s5033_s1 + $0x2e0] sm:$0xff] }
  0x74   : > { %3177 = vmatmul.mubr.f32.gmra.mrb[4].mxu0 %v4371_v7  ;;  %3461 = vmatpush3.bf16.msra.mxu1 %v3458_v52  ;;  %v4429_v52 = vsel %vm542_vm0, %v568_v22, %v569_v23  ;;  %v4465_v22 = vld [vmem:[%s4177_s19 + $0xd0] sm:$0xff]  ;;  %v4468_v23 = vsel %vm906_vm1, %v908_v60, %v910_v4  ;;  %v4493_v60 = vsel %vm542_vm0, %v574_v54, %v576_v9  ;;  %v1322_v54 = vrot.slane %v4481_v40, 1 }
  0x75   : > { %3589 = vmatpush3.bf16.msra.mxu0 %v3586_v59  ;;  %2955 = vmatprep.mubr.f32.mxu1 %v4351_v57  ;;  %v2566_v59 = vld [vmem:[%s5033_s1 + $0x2d8] sm:$0xff]  ;;  %5045 = vst [vmem:[#allocation7_spill] sm:$0xff] %v4493_v60  ;;  %v5043_v3 = vmax.f32 %v4465_v22, 0.0  ;;  %v1323_v9 = vrot.slane %v4483_v42, 1 }
  0x76   : > { %3179 = vmatprep.mubr.f32.mxu0 %v4384_v13  ;;  %3463 = vmatprep.subr.bf16.mxu1 %v3462_v14  ;;  %v3598_v51 = vpack.c.bf16 %v2566_v59, %v2565_v43  ;;  %v4485_v43 = vmax.f32 %v469_v27, 0.0  ;;  %v470_v59 = vld [vmem:[%s4177_s19 + $0xe0] sm:$0xff]  ;;  %v3474_v27 = vpack.c.bf16 %v515_v18, %v514_v10 }
  0x77   : > { %2956 = vmatmul.mubr.f32.gmra.mrb[6].mxu1 %v4371_v7  ;;  %3591 = vmatprep.subr.bf16.mxu0 %v3590_v15  ;;  %v4489_v53 = vmax.f32 %v470_v59, 0.0 }
  0x78   : > { %3180 = vmatmul.mubr.f32.gmra.mrb[6].mxu0 %v4407_v33  ;;  %3465 = vmatpush3.bf16.msra.mxu1 %v3462_v14  ;;  %v5036_v14 = vmax.f32 %v4425_v49, 0.0  ;;  %v1873_v4 = vrot.slane %v4485_v43, 1  ;;  %v2058_v10 = vrot.slane %v4485_v43, 2 }
  0x79   : > { %3593 = vmatpush3.bf16.msra.mxu0 %v3590_v15  ;;  %2958 = vmatprep.mubr.f32.mxu1 %v4384_v13  ;;  %v579_v15 = vrot.slane %v4422_v47, 1  ;;  %v1874_v59 = vrot.slane %v4489_v53, 1  ;;  %v2059_v18 = vrot.slane %v4489_v53, 2 }
  0x7a   : > { %3182 = vmatprep.mubr.f32.mxu0 %v4429_v52  ;;  %3467 = vmatprep.subr.bf16.mxu1 %v3466_v44  ;;  %v581_v63 = vrot.slane %v5036_v14, 1  ;;  %v516_v14 = vld [vmem:[%s5033_s1 + $0x70] sm:$0xff] }
  0x7b   : > { %2959 = vmatmul.mubr.f32.gmra.mrb[8].mxu1 %v4407_v33  ;;  %3595 = vmatprep.subr.bf16.mxu0 %v3594_v45  ;;  %v4523_v41 = vsel %vm542_vm0, %v1873_v4, %v1874_v59  ;;  %v4533_v32 = vsel %vm906_vm1, %v2058_v10, %v2059_v18  ;;  %v913_v4 = vrot.slane %v4189_v31, 2  ;;  %v2507_v10 = vld [vmem:[%s5033_s1 + $0x100] sm:$0xff] }
  0x7c   : > { %3183 = vmatmul.mubr.f32.gmra.mrb[8].mxu0 %v4447_v8  ;;  %3469 = vmatpush3.bf16.msra.mxu1 %v3466_v44  ;;  %v4501_v44 = vsel %vm542_vm0, %v578_v58, %v579_v15  ;;  %v517_v58 = vld [vmem:[%s5033_s1 + $0x78] sm:$0xff]  ;;  %5046 = vst [vmem:[#allocation8_spill] sm:$0xff] %v4523_v41  ;;  %v4527_v11 = vsel %vm542_vm0, %v579_v15, %v581_v63  ;;  %5047 = vst [vmem:[#allocation9_spill] sm:$0xff] %v4533_v32  ;;  %v912_v63 = vrot.slane %v4187_v30, 2 }
  0x7d   : > { %3597 = vmatpush3.bf16.msra.mxu0 %v3594_v45  ;;  %2961 = vmatprep.mubr.f32.mxu1 %v4429_v52  ;;  %v3602_v45 = vpack.c.bf16 %v2568_v39, %v2567_v38  ;;  %v2569_v38 = vld [vmem:[%s5033_s1 + $0x2f0] sm:$0xff]  ;;  %v2570_v39 = vld [vmem:[%s5033_s1 + $0x2f8] sm:$0xff]  ;;  %v3478_v12 = vpack.c.bf16 %v517_v58, %v516_v14  ;;  %v2508_v14 = vld [vmem:[%s5033_s1 + $0x108] sm:$0xff]  ;;  %v1876_v58 = vrot.slane %v501_v62, 1 }
  0x7e   : > { %3185 = vmatprep.mubr.f32.mxu0 %v4473_v28  ;;  %3471 = vmatprep.subr.bf16.mxu1 %v3470_v61  ;;  %v3606_v15 = vpack.c.bf16 %v2570_v39, %v2569_v38  ;;  %v2061_v38 = vrot.slane %v501_v62, 2  ;;  %v4570_v62 = vsel %vm906_vm1, %v912_v63, %v913_v4 }
  0x7f   : > { %2962 = vmatmul.mubr.f32.gmra.mrb[10].mxu1 %v4447_v8  ;;  %3599 = vmatprep.subr.bf16.mxu0 %v3598_v51  ;;  %v4563_v41 = vsel %vm542_vm0, %v1874_v59, %v1876_v58  ;;  %v2510_v59 = vld [vmem:[%s5033_s1 + $0x118] sm:$0xff] }
  0x80   : > { %3186 = vmatmul.mubr.f32.gmra.mrb[10].mxu0 %v4493_v60  ;;  %3473 = vmatpush3.bf16.msra.mxu1 %v3470_v61  ;;  %v1325_v61 = vrot.slane %v5043_v3, 1  ;;  %v5048_v3 = vmax.f32 %v4238_v55, 0.0  ;;  %5049 = vst [vmem:[#allocation10_spill] sm:$0xff] %v4563_v41  ;;  %v917_v55 = vrot.slane %v4265_v5, 2  ;;  %v1508_v41 = vrot.slane %v4483_v42, 2 }
  0x81   : > { %3601 = vmatpush3.bf16.msra.mxu0 %v3598_v51  ;;  %2964 = vmatprep.mubr.f32.mxu1 %v4473_v28  ;;  %v4538_v51 = vsel %vm542_vm0, %v1322_v54, %v1323_v9  ;;  %v2572_v54 = vld [vmem:[%s5033_s1 + $0x308] sm:$0xff] }
  0x82   : > { %3188 = vmatprep.mubr.f32.mxu0 %v4501_v44  ;;  %3475 = vmatprep.subr.bf16.mxu1 %v3474_v27  ;;  %v4557_v39 = vsel %vm542_vm0, %v1323_v9, %v1325_v61  ;;  %v915_v32 = vrot.slane %v5048_v3, 2  ;;  %v918_v3 = vrot.slane %v4267_v6, 2  ;;  %v2509_v9 = vld [vmem:[%s5033_s1 + $0x110] sm:$0xff]  ;;  %v2574_v61 = vld [vmem:[%s5033_s1 + $0x318] sm:$0xff] }
  0x83   : > { %2965 = vmatmul.mubr.f32.gmra.mrb[12].mxu1 %v4493_v60  ;;  %3603 = vmatprep.subr.bf16.mxu0 %v3602_v45  ;;  %v4566_v60 = vsel %vm906_vm1, %v2059_v18, %v2061_v38  ;;  %v2573_v18 = vld [vmem:[%s5033_s1 + $0x310] sm:$0xff]  ;;  %v5052_v38 = vmax.f32 %v4283_v16, 0.0 }
  0x84   : > { %3189 = vmatmul.mubr.f32.gmra.mrb[12].mxu0 %v4527_v11  ;;  %3477 = vmatpush3.bf16.msra.mxu1 %v3474_v27  ;;  %v3482_v27 = vpack.c.bf16 %v2508_v14, %v2507_v10  ;;  %5050 = vst [vmem:[#allocation11_spill] sm:$0xff] %v4566_v60  ;;  %v4589_v63 = vsel %vm906_vm1, %v913_v4, %v915_v32  ;;  %v5051_v10 = vmax.f32 %v4257_v2, 0.0  ;;  %v2511_v2 = vld [vmem:[%s5033_s1 + $0x120] sm:$0xff]  ;;  %v2512_v32 = vld [vmem:[%s5033_s1 + $0x128] sm:$0xff]  ;;  %v2513_v16 = vld [vmem:[%s5033_s1 + $0x130] sm:$0xff]  ;;  %v943_v60 = vrot.slane %v4422_v47, 2 }
  0x85   : > { %3605 = vmatpush3.bf16.msra.mxu0 %v3602_v45  ;;  %2967 = vmatprep.mubr.f32.mxu1 %v4501_v44  ;;  %v3610_v45 = vpack.c.bf16 %v2572_v54, %v2571_v50  ;;  %v4596_v50 = vsel %vm906_vm1, %v917_v55, %v918_v3  ;;  %v3614_v54 = vpack.c.bf16 %v2574_v61, %v2573_v18  ;;  %v2576_v4 = vld [vmem:[%s5033_s1 + $0x328] sm:$0xff]  ;;  %v925_v55 = vrot.slane %v5052_v38, 2  ;;  %v2577_v61 = vld [vmem:[%s5033_s1 + $0x330] sm:$0xff]  ;;  %v2579_v38 = vld [vmem:[%s5033_s1 + $0x340] sm:$0xff] }
  0x86   : > { %3191 = vmatprep.mubr.f32.mxu0 %v4538_v51  ;;  %3479 = vmatprep.subr.bf16.mxu1 %v3478_v12  ;;  %v920_v14 = vrot.slane %v5051_v10, 2  ;;  %v928_v18 = vrot.slane %v4310_v35, 2  ;;  %v2578_v10 = vld [vmem:[%s5033_s1 + $0x338] sm:$0xff] }
  0x87   : > { %2968 = vmatmul.mubr.f32.gmra.mrb[14].mxu1 %v4527_v11  ;;  %3607 = vmatprep.subr.bf16.mxu0 %v3606_v15 }
  0x88   : > { %3192 = vmatmul.mubr.f32.gmra.mrb[14].mxu0 %v4557_v39  ;;  %3481 = vmatpush3.bf16.msra.mxu1 %v3478_v12  ;;  %v3486_v12 = vpack.c.bf16 %v2510_v59, %v2509_v9  ;;  %v4615_v58 = vsel %vm906_vm1, %v918_v3, %v920_v14  ;;  %v2514_v3 = vld [vmem:[%s5033_s1 + $0x138] sm:$0xff] }
  0x89   : > { %3609 = vmatpush3.bf16.msra.mxu0 %v3606_v15  ;;  %3002 = vmatprep.mubr.f32.mxu1 %v4181_v26  ;;  %v922_v15 = vrot.slane %v4287_v19, 2  ;;  %v923_v26 = vrot.slane %v4289_v20, 2 }
  0x8a   : > { %3226 = vmatprep.mubr.f32.mxu0 %v4570_v62  ;;  %3483 = vmatprep.subr.bf16.mxu1 %v3482_v27 }
  0x8b   : > { %3003 = vmatmul.mubr.f32.vlgmr.msra.gmra.mrb[0].mxu1 %v4185_v29  ;;  %3611 = vmatprep.subr.bf16.mxu0 %v3610_v45  ;;  %v2575_v29 = vld [vmem:[%s5033_s1 + $0x320] sm:$0xff]  ;;  %v4622_v9 = vsel %vm906_vm1, %v922_v15, %v923_v26  ;;  %v4641_v14 = vsel %vm906_vm1, %v923_v26, %v925_v55  ;;  %v5053_v15 = vmax.f32 %v4313_v36, 0.0  ;;  %v2516_v26 = vld [vmem:[%s5033_s1 + $0x148] sm:$0xff] }
  0x8c   : > { %3227 = vmatmul.mubr.f32.vlgmr.msra.gmra.mrb[0].mxu0 %v4589_v63  ;;  %3485 = vmatpush3.bf16.msra.mxu1 %v3482_v27  ;;  %v3490_v27 = vpack.c.bf16 %v2512_v32, %v2511_v2  ;;  %v3618_v59 = vpack.c.bf16 %v2576_v4, %v2575_v29  ;;  %v3622_v29 = vpack.c.bf16 %v2578_v10, %v2577_v61  ;;  %v933_v4 = vrot.slane %v4364_v1, 2  ;;  %v2515_v36 = vld [vmem:[%s5033_s1 + $0x140] sm:$0xff]  ;;  %v2580_v55 = vld [vmem:[%s5033_s1 + $0x348] sm:$0xff] }
  0x8d   : > { %3613 = vmatpush3.bf16.msra.mxu0 %v3610_v45  ;;  %3005 = vmatprep.mubr.f32.mxu1 %v4187_v30  ;;  %v927_v45 = vrot.slane %v4308_v34, 2  ;;  %v930_v2 = vrot.slane %v5053_v15, 2  ;;  %v3626_v10 = vpack.c.bf16 %v2580_v55, %v2579_v38  ;;  %v938_v15 = vrot.slane %v4400_v25, 2 }
  0x8e   : > { %3229 = vmatprep.mubr.f32.mxu0 %v4596_v50  ;;  %3487 = vmatprep.subr.bf16.mxu1 %v3486_v12 }
  0x8f   : > { %3006 = vmatmul.mubr.f32.gmra.mrb[2].mxu1 %v4189_v31  ;;  %3615 = vmatprep.subr.bf16.mxu0 %v3614_v54  ;;  %v4648_v32 = vsel %vm906_vm1, %v927_v45, %v928_v18  ;;  %v4667_v45 = vsel %vm906_vm1, %v928_v18, %v930_v2  ;;  %v2518_v18 = vld [vmem:[%s5033_s1 + $0x158] sm:$0xff]  ;;  %v2581_v2 = vld [vmem:[%s5033_s1 + $0x350] sm:$0xff] }
  0x90   : > { %3230 = vmatmul.mubr.f32.gmra.mrb[2].mxu0 %v4615_v58  ;;  %3489 = vmatpush3.bf16.msra.mxu1 %v3486_v12  ;;  %v3494_v12 = vpack.c.bf16 %v2514_v3, %v2513_v16  ;;  %v5054_v16 = vmax.f32 %v4348_v56, 0.0  ;;  %v2517_v56 = vld [vmem:[%s5033_s1 + $0x150] sm:$0xff] }
  0x91   : > { %3617 = vmatpush3.bf16.msra.mxu0 %v3614_v54  ;;  %3008 = vmatprep.mubr.f32.mxu1 %v4265_v5  ;;  %v932_v54 = vrot.slane %v4362_v0, 2 }
  0x92   : > { %3232 = vmatprep.mubr.f32.mxu0 %v4622_v9  ;;  %3491 = vmatprep.subr.bf16.mxu1 %v3490_v27  ;;  %v935_v3 = vrot.slane %v5054_v16, 2 }
  0x93   : > { %3009 = vmatmul.mubr.f32.gmra.mrb[4].mxu1 %v4267_v6  ;;  %3619 = vmatprep.subr.bf16.mxu0 %v3618_v59  ;;  %v4674_v61 = vsel %vm906_vm1, %v932_v54, %v933_v4  ;;  %v2582_v54 = vld [vmem:[%s5033_s1 + $0x358] sm:$0xff] }
  0x94   : > { %3233 = vmatmul.mubr.f32.gmra.mrb[4].mxu0 %v4641_v14  ;;  %3493 = vmatpush3.bf16.msra.mxu1 %v3490_v27  ;;  %v3498_v27 = vpack.c.bf16 %v2516_v26, %v2515_v36  ;;  %v4693_v36 = vsel %vm906_vm1, %v933_v4, %v935_v3  ;;  %v5055_v26 = vmax.f32 %v4393_v21, 0.0  ;;  %v3630_v16 = vpack.c.bf16 %v2582_v54, %v2581_v2  ;;  %v2519_v21 = vld [vmem:[%s5033_s1 + $0x160] sm:$0xff]  ;;  %v2520_v4 = vld [vmem:[%s5033_s1 + $0x168] sm:$0xff] }
  0x95   : > { %3621 = vmatpush3.bf16.msra.mxu0 %v3618_v59  ;;  %3011 = vmatprep.mubr.f32.mxu1 %v4287_v19  ;;  %v937_v59 = vrot.slane %v4398_v24, 2  ;;  %v2583_v3 = vld [vmem:[%s5033_s1 + $0x360] sm:$0xff] }
  0x96   : > { %3235 = vmatprep.mubr.f32.mxu0 %v4648_v32  ;;  %3495 = vmatprep.subr.bf16.mxu1 %v3494_v12  ;;  %v940_v38 = vrot.slane %v5055_v26, 2 }
  0x97   : > { %3012 = vmatmul.mubr.f32.gmra.mrb[6].mxu1 %v4289_v20  ;;  %3623 = vmatprep.subr.bf16.mxu0 %v3622_v29  ;;  %v4700_v55 = vsel %vm906_vm1, %v937_v59, %v938_v15  ;;  %v2584_v59 = vld [vmem:[%s5033_s1 + $0x368] sm:$0xff] }
  0x98   : > { %3236 = vmatmul.mubr.f32.gmra.mrb[6].mxu0 %v4667_v45  ;;  %3497 = vmatpush3.bf16.msra.mxu1 %v3494_v12  ;;  %v3502_v12 = vpack.c.bf16 %v2518_v18, %v2517_v56  ;;  %v4719_v56 = vsel %vm906_vm1, %v938_v15, %v940_v38  ;;  %v5056_v18 = vmax.f32 %v4425_v49, 0.0  ;;  %v3634_v26 = vpack.c.bf16 %v2584_v59, %v2583_v3  ;;  %v2521_v49 = vld [vmem:[%s5033_s1 + $0x170] sm:$0xff]  ;;  %v2522_v15 = vld [vmem:[%s5033_s1 + $0x178] sm:$0xff] }
  0x99   : > { %3625 = vmatpush3.bf16.msra.mxu0 %v3622_v29  ;;  %3014 = vmatprep.mubr.f32.mxu1 %v4308_v34  ;;  %v942_v29 = vrot.slane %v4420_v46, 2  ;;  %v2585_v38 = vld [vmem:[%s5033_s1 + $0x370] sm:$0xff] }
  0x9a   : > { %3238 = vmatprep.mubr.f32.mxu0 %v4674_v61  ;;  %3499 = vmatprep.subr.bf16.mxu1 %v3498_v27  ;;  %v945_v2 = vrot.slane %v5056_v18, 2 }
  0x9b   : > { %3015 = vmatmul.mubr.f32.gmra.mrb[8].mxu1 %v4310_v35  ;;  %3627 = vmatprep.subr.bf16.mxu0 %v3626_v10  ;;  %v4726_v54 = vsel %vm906_vm1, %v942_v29, %v943_v60  ;;  %v2586_v29 = vld [vmem:[%s5033_s1 + $0x378] sm:$0xff] }
  0x9c   : > { %3239 = vmatmul.mubr.f32.gmra.mrb[8].mxu0 %v4693_v36  ;;  %3501 = vmatpush3.bf16.msra.mxu1 %v3498_v27  ;;  %v3506_v27 = vpack.c.bf16 %v2520_v4, %v2519_v21  ;;  %v4745_v21 = vsel %vm906_vm1, %v943_v60, %v945_v2  ;;  %v5057_v4 = vmax.f32 %v4465_v22, 0.0  ;;  %v3638_v18 = vpack.c.bf16 %v2586_v29, %v2585_v38  ;;  %v2524_v22 = vld [vmem:[%s5033_s1 + $0x188] sm:$0xff]  ;;  %v2587_v60 = vld [vmem:[%s5033_s1 + $0x380] sm:$0xff]  ;;  %v2590_v38 = vld [vmem:[%s5033_s1 + $0x398] sm:$0xff] }
  0x9d   : > { %3629 = vmatpush3.bf16.msra.mxu0 %v3626_v10  ;;  %3017 = vmatprep.mubr.f32.mxu1 %v4362_v0  ;;  %v1507_v10 = vrot.slane %v4481_v40, 2  ;;  %v2588_v2 = vld [vmem:[%s5033_s1 + $0x388] sm:$0xff] }
  0x9e   : > { %3241 = vmatprep.mubr.f32.mxu0 %v4700_v55  ;;  %3503 = vmatprep.subr.bf16.mxu1 %v3502_v12  ;;  %v1510_v3 = vrot.slane %v5057_v4, 2 }
  0x9f   : > { %3018 = vmatmul.mubr.f32.gmra.mrb[10].mxu1 %v4364_v1  ;;  %3631 = vmatprep.subr.bf16.mxu0 %v3630_v16  ;;  %v4752_v59 = vsel %vm906_vm1, %v1507_v10, %v1508_v41 }
  0xa0   : > { %3242 = vmatmul.mubr.f32.gmra.mrb[10].mxu0 %v4719_v56  ;;  %3505 = vmatpush3.bf16.msra.mxu1 %v3502_v12  ;;  %v3510_v12 = vpack.c.bf16 %v2522_v15, %v2521_v49  ;;  %v4769_v10 = vsel %vm906_vm1, %v1508_v41, %v1510_v3  ;;  %v2525_v15 = vld [vmem:[%s5033_s1 + $0x190] sm:$0xff]  ;;  %v2527_v3 = vld [vmem:[%s5033_s1 + $0x1a0] sm:$0xff] }
  0xa1   : > { %3633 = vmatpush3.bf16.msra.mxu0 %v3630_v16  ;;  %3020 = vmatprep.mubr.f32.mxu1 %v4398_v24  ;;  %v2523_v16 = vld [vmem:[%s5033_s1 + $0x180] sm:$0xff]  ;;  %v2589_v41 = vld [vmem:[%s5033_s1 + $0x390] sm:$0xff] }
  0xa2   : > { %3244 = vmatprep.mubr.f32.mxu0 %v4726_v54  ;;  %3507 = vmatprep.subr.bf16.mxu1 %v3506_v27  ;;  %v3514_v49 = vpack.c.bf16 %v2524_v22, %v2523_v16  ;;  %v3646_v4 = vpack.c.bf16 %v2590_v38, %v2589_v41  ;;  %v2529_v22 = vld [vmem:[%s5033_s1 + $0x1b0] sm:$0xff]  ;;  %v2596_v41 = vld [vmem:[%s5033_s1 + $0x3c8] sm:$0xff] }
  0xa3   : > { %3021 = vmatmul.mubr.f32.gmra.mrb[12].mxu1 %v4400_v25  ;;  %3635 = vmatprep.subr.bf16.mxu0 %v3634_v26 }
  0xa4   : > { %3245 = vmatmul.mubr.f32.gmra.mrb[12].mxu0 %v4745_v21  ;;  %3509 = vmatpush3.bf16.msra.mxu1 %v3506_v27  ;;  %v3642_v27 = vpack.c.bf16 %v2588_v2, %v2587_v60  ;;  %v2530_v60 = vld [vmem:[%s5033_s1 + $0x1b8] sm:$0xff] }
  0xa5   : > { %3637 = vmatpush3.bf16.msra.mxu0 %v3634_v26  ;;  %3023 = vmatprep.mubr.f32.mxu1 %v4420_v46  ;;  %v2526_v26 = vld [vmem:[%s5033_s1 + $0x198] sm:$0xff]  ;;  %v3526_v2 = vpack.c.bf16 %v2530_v60, %v2529_v22  ;;  %v2536_v22 = vld [vmem:[%s5033_s1 + $0x1e8] sm:$0xff]  ;;  %v2599_v60 = vld [vmem:[%s5033_s1 + $0x3e0] sm:$0xff] }
  0xa6   : > { %3247 = vmatprep.mubr.f32.mxu0 %v4752_v59  ;;  %3511 = vmatprep.subr.bf16.mxu1 %v3510_v12  ;;  %v3518_v29 = vpack.c.bf16 %v2526_v26, %v2525_v15  ;;  %v2532_v15 = vld [vmem:[%s5033_s1 + $0x1c8] sm:$0xff]  ;;  %v2595_v26 = vld [vmem:[%s5033_s1 + $0x3c0] sm:$0xff] }
  0xa7   : > { %3024 = vmatmul.mubr.f32.gmra.mrb[14].mxu1 %v4422_v47  ;;  %3639 = vmatprep.subr.bf16.mxu0 %v3638_v18 }
  0xa8   : > { %3248 = vmatmul.mubr.f32.gmra.mrb[14].mxu0 %v4769_v10  ;;  %3513 = vmatpush3.bf16.msra.mxu1 %v3510_v12  ;;  %v2528_v12 = vld [vmem:[%s5033_s1 + $0x1a8] sm:$0xff] }
  0xa9   : > { %3641 = vmatpush3.bf16.msra.mxu0 %v3638_v18  ;;  %3058 = vmatprep.mubr.f32.mxu1 %v4456_v17  ;;  %v2591_v17 = vld [vmem:[%s5033_s1 + $0x3a0] sm:$0xff]  ;;  %v3522_v18 = vpack.c.bf16 %v2528_v12, %v2527_v3  ;;  %v2534_v3 = vld [vmem:[%s5033_s1 + $0x1d8] sm:$0xff]  ;;  %v2597_v12 = vld [vmem:[%s5033_s1 + $0x3d0] sm:$0xff] }
  0xaa   : > { %3282 = vmatprep.mubr.f32.mxu0 %v4265_v5  ;;  %3515 = vmatprep.subr.bf16.mxu1 %v3514_v49 }
  0xab   : > { %3059 = vmatmul.mubr.f32.vlgmr.msra.gmra.mrb[0].mxu1 %v4468_v23  ;;  %3643 = vmatprep.subr.bf16.mxu0 %v3642_v27  ;;  %v2592_v23 = vld [vmem:[%s5033_s1 + $0x3a8] sm:$0xff] }
  0xac   : > { %3283 = vmatmul.mubr.f32.vlgmr.msra.gmra.mrb[0].mxu0 %v4267_v6  ;;  %3517 = vmatpush3.bf16.msra.mxu1 %v3514_v49  ;;  %v3650_v16 = vpack.c.bf16 %v2592_v23, %v2591_v17  ;;  %v2598_v17 = vld [vmem:[%s5033_s1 + $0x3d8] sm:$0xff] }
  0xad   : > { %3645 = vmatpush3.bf16.msra.mxu0 %v3642_v27  ;;  %3061 = vmatprep.mubr.f32.mxu1 %v4570_v62  ;;  %v2593_v62 = vld [vmem:[%s5033_s1 + $0x3b0] sm:$0xff]  ;;  %v2531_v27 = vld [vmem:[%s5033_s1 + $0x1c0] sm:$0xff] }
  0xae   : > { %3285 = vmatprep.mubr.f32.mxu0 %v4287_v19  ;;  %3519 = vmatprep.subr.bf16.mxu1 %v3518_v29  ;;  %v3530_v38 = vpack.c.bf16 %v2532_v15, %v2531_v27  ;;  %v2538_v27 = vld [vmem:[%s5033_s1 + $0x1f8] sm:$0xff]  ;;  %v2601_v15 = vld [vmem:[%s5033_s1 + $0x3f0] sm:$0xff] }
  0xaf   : > { %3062 = vmatmul.mubr.f32.gmra.mrb[2].mxu1 %v4589_v63  ;;  %3647 = vmatprep.subr.bf16.mxu0 %v3646_v4  ;;  %v2594_v63 = vld [vmem:[%s5033_s1 + $0x3b8] sm:$0xff] }
  0xb0   : > { %3286 = vmatmul.mubr.f32.gmra.mrb[2].mxu0 %v4289_v20  ;;  %3521 = vmatpush3.bf16.msra.mxu1 %v3518_v29  ;;  %v3654_v49 = vpack.c.bf16 %v2594_v63, %v2593_v62  ;;  %v3658_v29 = vpack.c.bf16 %v2596_v41, %v2595_v26  ;;  %v2600_v62 = vld [vmem:[%s5033_s1 + $0x3e8] sm:$0xff]  ;;  %v2602_v26 = vld [vmem:[%s5033_s1 + $0x3f8] sm:$0xff] }
  0xb1   : > { %3649 = vmatpush3.bf16.msra.mxu0 %v3646_v4  ;;  %3064 = vmatprep.mubr.f32.mxu1 %v4596_v50  ;;  %v2533_v4 = vld [vmem:[%s5033_s1 + $0x1d0] sm:$0xff] }
  0xb2   : > { %3288 = vmatprep.mubr.f32.mxu0 %v4308_v34  ;;  %3523 = vmatprep.subr.bf16.mxu1 %v3522_v18  ;;  %v3534_v23 = vpack.c.bf16 %v2534_v3, %v2533_v4  ;;  %v2604_v4 = vld [vmem:[%s5033_s1 + $0x408] sm:$0xff] }
  0xb3   : > { %3065 = vmatmul.mubr.f32.gmra.mrb[4].mxu1 %v4615_v58  ;;  %3651 = vmatprep.subr.bf16.mxu0 %v3650_v16 }
  0xb4   : > { %3289 = vmatmul.mubr.f32.gmra.mrb[4].mxu0 %v4310_v35  ;;  %3525 = vmatpush3.bf16.msra.mxu1 %v3522_v18  ;;  %v3662_v18 = vpack.c.bf16 %v2598_v17, %v2597_v12  ;;  %v2605_v12 = vld [vmem:[%s5033_s1 + $0x410] sm:$0xff]  ;;  %v2606_v17 = vld [vmem:[%s5033_s1 + $0x418] sm:$0xff] }
  0xb5   : > { %3653 = vmatpush3.bf16.msra.mxu0 %v3650_v16  ;;  %3067 = vmatprep.mubr.f32.mxu1 %v4622_v9  ;;  %v2535_v16 = vld [vmem:[%s5033_s1 + $0x1e0] sm:$0xff] }
  0xb6   : > { %3291 = vmatprep.mubr.f32.mxu0 %v4362_v0  ;;  %3527 = vmatprep.subr.bf16.mxu1 %v3526_v2  ;;  %v3538_v63 = vpack.c.bf16 %v2536_v22, %v2535_v16 }
  0xb7   : > { %3068 = vmatmul.mubr.f32.gmra.mrb[6].mxu1 %v4641_v14  ;;  %3655 = vmatprep.subr.bf16.mxu0 %v3654_v49 }
  0xb8   : > { %3292 = vmatmul.mubr.f32.gmra.mrb[6].mxu0 %v4364_v1  ;;  %3529 = vmatpush3.bf16.msra.mxu1 %v3526_v2  ;;  %v3666_v2 = vpack.c.bf16 %v2600_v62, %v2599_v60 }
  0xb9   : > { %3657 = vmatpush3.bf16.msra.mxu0 %v3654_v49  ;;  %3070 = vmatprep.mubr.f32.mxu1 %v4648_v32  ;;  %v2537_v49 = vld [vmem:[%s5033_s1 + $0x1f0] sm:$0xff] }
  0xba   : > { %3294 = vmatprep.mubr.f32.mxu0 %v4398_v24  ;;  %3531 = vmatprep.subr.bf16.mxu1 %v3530_v38  ;;  %v3542_v41 = vpack.c.bf16 %v2538_v27, %v2537_v49 }
  0xbb   : > { %3071 = vmatmul.mubr.f32.gmra.mrb[8].mxu1 %v4667_v45  ;;  %3659 = vmatprep.subr.bf16.mxu0 %v3658_v29 }
  0xbc   : > { %3295 = vmatmul.mubr.f32.gmra.mrb[8].mxu0 %v4400_v25  ;;  %3533 = vmatpush3.bf16.msra.mxu1 %v3530_v38  ;;  %v3670_v38 = vpack.c.bf16 %v2602_v26, %v2601_v15  ;;  %v2619_v26 = vld [vmem:[%s5034_s2] ss:$0 sm:$0xff] }
  0xbd   : > { %3661 = vmatpush3.bf16.msra.mxu0 %v3658_v29  ;;  %3073 = vmatprep.mubr.f32.mxu1 %v4674_v61  ;;  %v2603_v29 = vld [vmem:[%s5033_s1 + $0x400] sm:$0xff] }
  0xbe   : > { %3297 = vmatprep.mubr.f32.mxu0 %v4420_v46  ;;  %3535 = vmatprep.subr.bf16.mxu1 %v3534_v23  ;;  %v3674_v3 = vpack.c.bf16 %v2604_v4, %v2603_v29 }
  0xbf   : > { %3074 = vmatmul.mubr.f32.gmra.mrb[10].mxu1 %v4693_v36  ;;  %3663 = vmatprep.subr.bf16.mxu0 %v3662_v18 }
  0xc0   : > { %3298 = vmatmul.mubr.f32.gmra.mrb[10].mxu0 %v4422_v47  ;;  %3537 = vmatpush3.bf16.msra.mxu1 %v3534_v23  ;;  %v2607_v23 = vld [vmem:[%s5033_s1 + $0x420] sm:$0xff] }
  0xc1   : > { %3665 = vmatpush3.bf16.msra.mxu0 %v3662_v18  ;;  %3076 = vmatprep.mubr.f32.mxu1 %v4700_v55  ;;  %v2608_v18 = vld [vmem:[%s5033_s1 + $0x428] sm:$0xff] }
  0xc2   : > { %3300 = vmatprep.mubr.f32.mxu0 %v4481_v40  ;;  %3539 = vmatprep.subr.bf16.mxu1 %v3538_v63 }
  0xc3   : > { %3077 = vmatmul.mubr.f32.gmra.mrb[12].mxu1 %v4719_v56  ;;  %3667 = vmatprep.subr.bf16.mxu0 %v3666_v2 }
  0xc4   : > { %3301 = vmatmul.mubr.f32.gmra.mrb[12].mxu0 %v4483_v42  ;;  %3541 = vmatpush3.bf16.msra.mxu1 %v3538_v63 }
  0xc5   : > { %3669 = vmatpush3.bf16.msra.mxu0 %v3666_v2  ;;  %3079 = vmatprep.mubr.f32.mxu1 %v4726_v54 }
  0xc6   : > { %3303 = vmatprep.mubr.f32.mxu0 %v4485_v43  ;;  %3543 = vmatprep.subr.bf16.mxu1 %v3542_v41  ;;  %v3678_v43 = vpack.c.bf16 %v2606_v17, %v2605_v12 }
  0xc7   : > { %3080 = vmatmul.mubr.f32.gmra.mrb[14].mxu1 %v4745_v21  ;;  %3671 = vmatprep.subr.bf16.mxu0 %v3670_v38 }
  0xc8   : > { %3304 = vmatmul.mubr.f32.gmra.mrb[14].mxu0 %v4489_v53  ;;  %3545 = vmatpush3.bf16.msra.mxu1 %v3542_v41 }
  0xc9   : > { %3673 = vmatpush3.bf16.msra.mxu0 %v3670_v38  ;;  %3114 = vmatprep.mubr.f32.mxu1 %v4187_v30  ;;  %v3682_v30 = vpack.c.bf16 %v2608_v18, %v2607_v23 }
  0xca   : > { %3338 = vmatprep.mubr.f32.mxu0 %v4316_v37  ;;  %3675 = vmatprep.subr.bf16.mxu0 %v3674_v3  ;;  %v2610_v37 = vld [vmem:[%s5033_s1 + $0x438] sm:$0xff] }
  0xcb   : > { %3115 = vmatmul.mubr.f32.vlgmr.msra.gmra.mrb[0].mxu1 %v4189_v31  ;;  %3706 = vmatprep.subr.bf16.mxu1 %v3674_v3  ;;  %v2609_v31 = vld [vmem:[%s5033_s1 + $0x430] sm:$0xff] }
  0xcc   : > { %3339 = vmatmul.mubr.f32.vlgmr.msra.gmra.mrb[0].mxu0 %v4336_v48  ;;  %3714 = vmatpush3.bf16.msra.mxu1 %v3674_v3  ;;  %v2612_v48 = vld [vmem:[%s5033_s1 + $0x448] sm:$0xff] }
  0xcd   : > { %3677 = vmatpush3.bf16.msra.mxu0 %v3674_v3  ;;  %3117 = vmatprep.mubr.f32.mxu1 %v4265_v5  ;;  %v3686_v5 = vpack.c.bf16 %v2610_v37, %v2609_v31 }
  0xce   : > { %3341 = vmatprep.mubr.f32.mxu0 %v4351_v57  ;;  %3679 = vmatprep.subr.bf16.mxu0 %v3678_v43  ;;  %v2614_v57 = vld [vmem:[%s5033_s1 + $0x458] sm:$0xff] }
  0xcf   : > { %3118 = vmatmul.mubr.f32.gmra.mrb[2].mxu1 %v4267_v6  ;;  %3707 = vmatprep.subr.bf16.mxu1 %v3678_v43  ;;  %v2611_v6 = vld [vmem:[%s5033_s1 + $0x440] sm:$0xff] }
  0xd0   : > { %3342 = vmatmul.mubr.f32.gmra.mrb[2].mxu0 %v4371_v7  ;;  %3715 = vmatpush3.bf16.msra.mxu1 %v3678_v43  ;;  %v2616_v7 = vld [vmem:[%s5033_s1 + $0x468] sm:$0xff] }
  0xd1   : > { %3681 = vmatpush3.bf16.msra.mxu0 %v3678_v43  ;;  %3120 = vmatprep.mubr.f32.mxu1 %v4287_v19  ;;  %v3690_v19 = vpack.c.bf16 %v2612_v48, %v2611_v6 }
  0xd2   : > { %3344 = vmatprep.mubr.f32.mxu0 %v4384_v13  ;;  %3683 = vmatprep.subr.bf16.mxu0 %v3682_v30  ;;  %v5058_v13 = vld [vmem:[#allocation7_spill] sm:$0xff] }
  0xd3   : > { %3121 = vmatmul.mubr.f32.gmra.mrb[4].mxu1 %v4289_v20  ;;  %3708 = vmatprep.subr.bf16.mxu1 %v3682_v30  ;;  %v2613_v20 = vld [vmem:[%s5033_s1 + $0x450] sm:$0xff] }
  0xd4   : > { %3345 = vmatmul.mubr.f32.gmra.mrb[4].mxu0 %v4407_v33  ;;  %3716 = vmatpush3.bf16.msra.mxu1 %v3682_v30  ;;  %v2618_v33 = vld [vmem:[%s5033_s1 + $0x478] sm:$0xff] }
  0xd5   : > { %3685 = vmatpush3.bf16.msra.mxu0 %v3682_v30  ;;  %3123 = vmatprep.mubr.f32.mxu1 %v4308_v34  ;;  %v3694_v34 = vpack.c.bf16 %v2614_v57, %v2613_v20 }
  0xd6   : > { %3347 = vmatprep.mubr.f32.mxu0 %v4429_v52  ;;  %3687 = vmatprep.subr.bf16.mxu0 %v3686_v5 }
  0xd7   : > { %3124 = vmatmul.mubr.f32.gmra.mrb[6].mxu1 %v4310_v35  ;;  %3709 = vmatprep.subr.bf16.mxu1 %v3686_v5  ;;  %v2615_v35 = vld [vmem:[%s5033_s1 + $0x460] sm:$0xff] }
  0xd8   : > { %3348 = vmatmul.mubr.f32.gmra.mrb[6].mxu0 %v4447_v8  ;;  %3717 = vmatpush3.bf16.msra.mxu1 %v3686_v5 }
  0xd9   : > { %3689 = vmatpush3.bf16.msra.mxu0 %v3686_v5  ;;  %3126 = vmatprep.mubr.f32.mxu1 %v4362_v0  ;;  %v3698_v0 = vpack.c.bf16 %v2616_v7, %v2615_v35 }
  0xda   : > { %3350 = vmatprep.mubr.f32.mxu0 %v4473_v28  ;;  %3691 = vmatprep.subr.bf16.mxu0 %v3690_v19 }
  0xdb   : > { %3127 = vmatmul.mubr.f32.gmra.mrb[8].mxu1 %v4364_v1  ;;  %3710 = vmatprep.subr.bf16.mxu1 %v3690_v19  ;;  %v2617_v1 = vld [vmem:[%s5033_s1 + $0x470] sm:$0xff] }
  0xdc   : > { %3351 = vmatmul.mubr.f32.gmra.mrb[8].mxu0 %v5058_v13  ;;  %3718 = vmatpush3.bf16.msra.mxu1 %v3690_v19 }
  0xdd   : > { %3693 = vmatpush3.bf16.msra.mxu0 %v3690_v19  ;;  %3129 = vmatprep.mubr.f32.mxu1 %v4398_v24  ;;  %v3702_v24 = vpack.c.bf16 %v2618_v33, %v2617_v1 }
  0xde   : > { %3353 = vmatprep.mubr.f32.mxu0 %v4501_v44  ;;  %3695 = vmatprep.subr.bf16.mxu0 %v3694_v34 }
  0xdf   : > { %3130 = vmatmul.mubr.f32.gmra.mrb[10].mxu1 %v4400_v25  ;;  %3711 = vmatprep.subr.bf16.mxu1 %v3694_v34  ;;  %v5059_v25 = vld [vmem:[#allocation8_spill] sm:$0xff] }
  0xe0   : > { %3354 = vmatmul.mubr.f32.gmra.mrb[10].mxu0 %v4527_v11  ;;  %3719 = vmatpush3.bf16.msra.mxu1 %v3694_v34  ;;  %v5060_v11 = vld [vmem:[#allocation10_spill] sm:$0xff] }
  0xe1   : > { %3697 = vmatpush3.bf16.msra.mxu0 %v3694_v34  ;;  %3132 = vmatprep.mubr.f32.mxu1 %v4420_v46  ;;  %v5061_v46 = vld [vmem:[#allocation9_spill] sm:$0xff] }
  0xe2   : > { %3356 = vmatprep.mubr.f32.mxu0 %v4538_v51  ;;  %3699 = vmatprep.subr.bf16.mxu0 %v3698_v0 }
  0xe3   : > { %3133 = vmatmul.mubr.f32.gmra.mrb[12].mxu1 %v4422_v47  ;;  %3712 = vmatprep.subr.bf16.mxu1 %v3698_v0  ;;  %v5062_v47 = vld [vmem:[#allocation11_spill] sm:$0xff] }
  0xe4   : > { %3357 = vmatmul.mubr.f32.gmra.mrb[12].mxu0 %v4557_v39  ;;  %3720 = vmatpush3.bf16.msra.mxu1 %v3698_v0 }
  0xe5   : > { %3701 = vmatpush3.bf16.msra.mxu0 %v3698_v0  ;;  %3135 = vmatprep.mubr.f32.mxu1 %v4481_v40 }
  0xe6   : > { %3359 = vmatprep.mubr.f32.mxu0 %v5059_v25  ;;  %3703 = vmatprep.subr.bf16.mxu0 %v3702_v24 }
  0xe7   : > { %3136 = vmatmul.mubr.f32.gmra.mrb[14].mxu1 %v4483_v42  ;;  %3713 = vmatprep.subr.bf16.mxu1 %v3702_v24 }
  0xe8   : > { %3360 = vmatmul.mubr.f32.gmra.mrb[14].mxu0 %v5060_v11  ;;  %3721 = vmatpush3.bf16.msra.mxu1 %v3702_v24 }
  0xe9   : > { %3705 = vmatpush3.bf16.msra.mxu0 %v3702_v24  ;;  %3394 = vmatprep.mubr.f32.mxu0 %v4596_v50 }
  0xea   : > { %3406 = vmatprep.mubr.f32.mxu1 %v4700_v55 }
  0xeb   : > { %3407 = vmatmul.mubr.f32.vlgmr.msra.gmra.mrb[16].mxu1 %v4719_v56 }
  0xec   : > { %3395 = vmatmul.mubr.f32.vlgmr.msra.gmra.mrb[0].mxu0 %v4615_v58  ;;  %3409 = vmatprep.mubr.f32.mxu1 %v4726_v54 }
  0xed   : > { %3397 = vmatprep.mubr.f32.mxu0 %v4622_v9 }
  0xef   : > { %3410 = vmatmul.mubr.f32.gmra.mrb[18].mxu1 %v4745_v21 }
  0xf0   : > { %3398 = vmatmul.mubr.f32.gmra.mrb[2].mxu0 %v4641_v14  ;;  %3412 = vmatprep.mubr.f32.mxu1 %v4752_v59 }
  0xf1   : > { %3400 = vmatprep.mubr.f32.mxu0 %v4648_v32 }
  0xf3   : > { %3413 = vmatmul.mubr.f32.gmra.mrb[20].mxu1 %v4769_v10 }
  0xf4   : > { %3401 = vmatmul.mubr.f32.gmra.mrb[4].mxu0 %v4667_v45  ;;  %3415 = vmatprep.mubr.f32.mxu1 %v5061_v46 }
  0xf5   : > { %3403 = vmatprep.mubr.f32.mxu0 %v4674_v61 }
  0xf7   : > { %3416 = vmatmul.mubr.f32.gmra.mrb[22].mxu1 %v5062_v47 }
  0xf8   : > { %3404 = vmatmul.mubr.f32.gmra.mrb[6].mxu0 %v4693_v36 }
 0x19e   : > { %v3116_v52 = vpop.f32.mrb[0].mxu1 }
 0x19f   : > { %v1224_v8 = vpop.f32.mrb[1].mxu1 }
 0x1a2   : > { %v3119_v28 = vpop.f32.mrb[2].mxu1 }
 0x1a3   : > { %v1234_v40 = vpop.f32.mrb[3].mxu1 }
 0x1a6   : > { %v4986_v42 = vpop.f32.mrb[4].mxu1 }
 0x1a7   : > { %v4988_v53 = vpop.f32.mrb[5].mxu1 }
 0x1aa   : > { %v4990_v44 = vpop.f32.mrb[6].mxu1 }
 0x1ab   : > { %v4992_v51 = vpop.f32.mrb[7].mxu1 }
 0x1ae   : > { %v3128_v39 = vpop.f32.mrb[8].mxu1 }
 0x1af   : > { %v3352_v50 = vpop.f32.mrb[8].mxu0  ;;  %v1264_v58 = vpop.f32.mrb[9].mxu1 }
 0x1b0   : > { %v3730_v9 = vadd.f32 %v3352_v50, %v3128_v39  ;;  %v2003_v14 = vpop.f32.mrb[9].mxu0 }
 0x1b1   : > { %v3732_v32 = vadd.f32 %v2003_v14, %v1264_v58 }
 0x1b2   : > { %v3131_v45 = vpop.f32.mrb[10].mxu1 }
 0x1b3   : > { %v3355_v61 = vpop.f32.mrb[10].mxu0  ;;  %v1274_v36 = vpop.f32.mrb[11].mxu1 }
 0x1b4   : > { %v3734_v55 = vadd.f32 %v3355_v61, %v3131_v45  ;;  %v2013_v56 = vpop.f32.mrb[11].mxu0 }
 0x1b5   : > { %v3736_v54 = vadd.f32 %v2013_v56, %v1274_v36 }
 0x1b6   : > { %v3134_v21 = vpop.f32.mrb[12].mxu1 }
 0x1b7   : > { %v3358_v59 = vpop.f32.mrb[12].mxu0  ;;  %v1284_v10 = vpop.f32.mrb[13].mxu1 }
 0x1b8   : > { %v3738_v16 = vadd.f32 %v3358_v59, %v3134_v21  ;;  %v2023_v22 = vpop.f32.mrb[13].mxu0 }
 0x1b9   : > { %v3740_v60 = vadd.f32 %v2023_v22, %v1284_v10 }
 0x1ba   : > { %v3137_v62 = vpop.f32.mrb[14].mxu1 }
 0x1bb   : > { %v3361_v63 = vpop.f32.mrb[14].mxu0  ;;  %v1294_v2 = vpop.f32.mrb[15].mxu1 }
 0x1bc   : > { %v3742_v49 = vadd.f32 %v3361_v63, %v3137_v62  ;;  %v2033_v27 = vpop.f32.mrb[15].mxu0 }
 0x1bd   : > { %v3744_v15 = vadd.f32 %v2033_v27, %v1294_v2 }
 0x1be   : > { %v3408_v41 = vpop.f32.mrb[16].mxu1 }
 0x1bf   : > { %v3396_v38 = vpop.f32.mrb[0].mxu0  ;;  %v3731_v29 = vadd.f32 %v3730_v9, %v3408_v41  ;;  %v2188_v4 = vpop.f32.mrb[17].mxu1 }
 0x1c0   : > { %v3722_v3 = vadd.f32 %v3396_v38, %v3116_v52  ;;  %v2148_v12 = vpop.f32.mrb[1].mxu0  ;;  %v3733_v17 = vadd.f32 %v3732_v32, %v2188_v4 }
 0x1c1   : > { %v2259_v43 = vadd.f32 %v3731_v29, %v2619_v26  ;;  %v3723_v23 = vadd.f32 %v2148_v12, %v1224_v8 }
 0x1c2   : > { %v2251_v18 = vadd.f32 %v3722_v3, %v2619_v26  ;;  %v2258_v30 = vadd.f32 %v3733_v17, %v2619_v26  ;;  %v3411_v31 = vpop.f32.mrb[18].mxu1 }
 0x1c3   : > { %2275 = vst [vmem:[%s3999_s5 + $0x48] sm:$0xff] %v2259_v43  ;;  %v2250_v37 = vadd.f32 %v3723_v23, %v2619_v26  ;;  %v3399_v5 = vpop.f32.mrb[2].mxu0  ;;  %v3735_v6 = vadd.f32 %v3734_v55, %v3411_v31  ;;  %v2198_v48 = vpop.f32.mrb[19].mxu1 }
 0x1c4   : > { %2267 = vst [vmem:[%s3999_s5 + $0x8] sm:$0xff] %v2251_v18  ;;  %2274 = vst [vmem:[%s3999_s5 + $0x40] sm:$0xff] %v2258_v30  ;;  %v3724_v19 = vadd.f32 %v3399_v5, %v3119_v28  ;;  %v2158_v20 = vpop.f32.mrb[3].mxu0  ;;  %v3737_v57 = vadd.f32 %v3736_v54, %v2198_v48 }
 0x1c5   : > { %2266 = vst [vmem:[%s3999_s5] sm:$0xff] %v2250_v37  ;;  %v2261_v34 = vadd.f32 %v3735_v6, %v2619_v26  ;;  %v3725_v35 = vadd.f32 %v2158_v20, %v1234_v40 }
 0x1c6   : > { %v2253_v7 = vadd.f32 %v3724_v19, %v2619_v26  ;;  %v2260_v13 = vadd.f32 %v3737_v57, %v2619_v26  ;;  %v3414_v0 = vpop.f32.mrb[20].mxu1 }
 0x1c7   : > { %2277 = vst [vmem:[%s3999_s5 + $0x58] sm:$0xff] %v2261_v34  ;;  %v2252_v1 = vadd.f32 %v3725_v35, %v2619_v26  ;;  %v3402_v33 = vpop.f32.mrb[4].mxu0  ;;  %v3739_v24 = vadd.f32 %v3738_v16, %v3414_v0  ;;  %v2208_v25 = vpop.f32.mrb[21].mxu1 }
 0x1c8   : > { %2269 = vst [vmem:[%s3999_s5 + $0x18] sm:$0xff] %v2253_v7  ;;  %2276 = vst [vmem:[%s3999_s5 + $0x50] sm:$0xff] %v2260_v13  ;;  %v3726_v11 = vadd.f32 %v3402_v33, %v4986_v42  ;;  %v2168_v46 = vpop.f32.mrb[5].mxu0  ;;  %v3741_v47 = vadd.f32 %v3740_v60, %v2208_v25 }
 0x1c9   : > { %2268 = vst [vmem:[%s3999_s5 + $0x10] sm:$0xff] %v2252_v1  ;;  %v2263_v52 = vadd.f32 %v3739_v24, %v2619_v26  ;;  %v3727_v8 = vadd.f32 %v2168_v46, %v4988_v53 }
 0x1ca   : > { %v2255_v28 = vadd.f32 %v3726_v11, %v2619_v26  ;;  %v2262_v40 = vadd.f32 %v3741_v47, %v2619_v26  ;;  %v3417_v39 = vpop.f32.mrb[22].mxu1 }
 0x1cb   : > { %2279 = vst [vmem:[%s3999_s5 + $0x68] sm:$0xff] %v2263_v52  ;;  %v2254_v50 = vadd.f32 %v3727_v8, %v2619_v26  ;;  %v3405_v58 = vpop.f32.mrb[6].mxu0  ;;  %v3743_v9 = vadd.f32 %v3742_v49, %v3417_v39  ;;  %v2218_v14 = vpop.f32.mrb[23].mxu1 }
 0x1cc   : > { %2271 = vst [vmem:[%s3999_s5 + $0x28] sm:$0xff] %v2255_v28  ;;  %2278 = vst [vmem:[%s3999_s5 + $0x60] sm:$0xff] %v2262_v40  ;;  %v3728_v42 = vadd.f32 %v3405_v58, %v4990_v44  ;;  %v2178_v32 = vpop.f32.mrb[7].mxu0  ;;  %v3745_v45 = vadd.f32 %v3744_v15, %v2218_v14 }
 0x1cd   : > { %2270 = vst [vmem:[%s3999_s5 + $0x20] sm:$0xff] %v2254_v50  ;;  %v2265_v53 = vadd.f32 %v3743_v9, %v2619_v26  ;;  %v3729_v61 = vadd.f32 %v2178_v32, %v4992_v51 }
 0x1ce   : > { %v2257_v36 = vadd.f32 %v3728_v42, %v2619_v26  ;;  %v2264_v55 = vadd.f32 %v3745_v45, %v2619_v26 }
 0x1cf   : > { %2281 = vst [vmem:[%s3999_s5 + $0x78] sm:$0xff] %v2265_v53  ;;  %v2256_v56 = vadd.f32 %v3729_v61, %v2619_v26 }
 0x1d0   : > { %2273 = vst [vmem:[%s3999_s5 + $0x38] sm:$0xff] %v2257_v36  ;;  %2280 = vst [vmem:[%s3999_s5 + $0x70] sm:$0xff] %v2264_v55 }
 0x1d1   : > { %2272 = vst [vmem:[%s3999_s5 + $0x30] sm:$0xff] %v2256_v56 }
 0x1d2 PF: > { %s13_s16 = sadd.s32 1, %s3930_s16   ;;  %s5063_s12 = smov %s3922_s14 }
 0x1d3   : > { %p10_p11 = scmp.ge.s32.totalorder %s13_s16, 6   ;;  %s5064_s13 = smov %s3926_s15 }
 0x1d4   : > { %s5065_s14 = smov %s5068_s17  ;;  %s5066_s15 = smov %s5072_s18 }
 0x1d5   :  { %12 = sbr.rel (!%p10_p11) target bundleno = 3 (0x3), region = 172 }
 0x1dc   :  { %2320 = vsyncmov [#allocation3] }
 0x1df   :  { %s2321_s5 = vpop.sfrf %2320 }
 0x1e0   :  { %p2622_p12 = scmp.ne.s32.totalorder %s2321_s5, 0 }
 0x1e2   :  { %2325 = shalt.err (%p2622_p12)  }
 0x1e3   :  { %2327 = vsyncmov [#allocation3 + $0x1] }
 0x1e6   :  { %s2328_s4 = vpop.sfrf %2327 }
 0x1e7   :  { %p2623_p13 = scmp.ne.s32.totalorder %s2328_s4, 0 }
 0x1e9   :  { %2332 = shalt.err (%p2623_p13)  }

</bundles_post_ra>
